<compile_context>
chip_gen: v7x
topology: tpu7x:2x2x1
jax: 0.10.0
libtpu: 0.0.40
codegen_flags: <defaults>
</compile_context>

<pallas_src>
import functools

import jax
import jax.numpy as jnp
from jax import lax
from jax.experimental import pallas as pl
from jax.experimental.pallas import tpu as pltpu


# ----------------------------- in-kernel helpers -----------------------------

def _layernorm(v, gamma, beta, eps=1e-5):
    """PyTorch LayerNorm semantics (biased variance, eps=1e-5)."""
    mu = jnp.mean(v, axis=-1, keepdims=True)
    c = v - mu
    var = jnp.mean(c * c, axis=-1, keepdims=True)
    return c * lax.rsqrt(var + eps) * gamma + beta


def _softmax_lastdim(s):
    m = jnp.max(s, axis=-1, keepdims=True)
    e = jnp.exp(s - m)
    d = jnp.sum(e, axis=-1, keepdims=True)
    # EUP approximate reciprocal + one Newton step -> ~f32 accuracy.
    r = pl.reciprocal(d, approx=True)
    r = r * (2.0 - d * r)
    return e * r


def _erf(z):
    # Abramowitz & Stegun 7.1.26, max abs error ~1.5e-7 (f32-safe).
    a1, a2, a3, a4, a5 = (0.254829592, -0.284496736, 1.421413741,
                          -1.453152027, 1.061405429)
    p = 0.3275911
    az = jnp.abs(z)
    d = 1.0 + p * az
    # EUP reciprocal + Newton step instead of an exact divide.
    t = pl.reciprocal(d, approx=True)
    t = t * (2.0 - d * t)
    poly = ((((a5 * t + a4) * t + a3) * t + a2) * t + a1) * t
    y = 1.0 - poly * jnp.exp(-az * az)
    return jnp.where(z >= 0.0, y, -y)


def _gelu_exact(v):
    # Exact (erf) GELU, matching torch.nn.GELU() default.
    return 0.5 * v * (1.0 + _erf(v * 0.7071067811865476))


# --------------------------------- kernel ------------------------------------

def _alpha_mha_kernel(x_ref, y_ref,
                      gx_ref, bx_ref, gy_ref, by_ref,
                      wq_ref, bq_ref, wk_ref, bk_ref, wv_ref, bv_ref,
                      wo_ref, bo_ref,
                      gd_ref, bd_ref, w1_ref, b1_ref, w2_ref, b2_ref,
                      o_ref,
                      temp_ref,
                      *, n_heads: int, proj_dim: int, mask: bool):
    f32 = jnp.float32
    cdt = wq_ref.dtype                       # matmul input dtype (f32 or bf16)
    bb, Sx, Dx = x_ref.shape
    _, Sy, Dy = y_ref.shape
    HP = n_heads * proj_dim

    # Batch-row fusion: all row-wise ops run on (bb*S, D) slabs -> M = bb*Sx.
    x = x_ref[...].reshape(bb * Sx, Dx).astype(f32)
    yv = y_ref[...].reshape(bb * Sy, Dy).astype(f32)

    # LayerNorms on the raw inputs (residual below uses the ORIGINAL x).
    xn = _layernorm(x, gx_ref[...], bx_ref[...]).astype(cdt)
    yn = _layernorm(yv, gy_ref[...], by_ref[...]).astype(cdt)

    # Fused, pre-transposed projections for all heads at once.
    # 1/sqrt(proj_dim) is already folded into wq/bq by the wrapper.
    q = (jnp.dot(xn, wq_ref[...], preferred_element_type=f32)
         + bq_ref[...]).reshape(bb, Sx, HP)
    k = (jnp.dot(yn, wk_ref[...], preferred_element_type=f32)
         + bk_ref[...]).reshape(bb, Sy, HP)
    v = (jnp.dot(yn, wv_ref[...], preferred_element_type=f32)
         + bv_ref[...]).reshape(bb, Sy, HP)

    # Build the mask ONCE (hoisted out of the unrolled head loop).
    if mask:
        rows = lax.broadcasted_iota(jnp.int32, (bb, Sx, Sy), 1)
        cols = lax.broadcasted_iota(jnp.int32, (bb, Sx, Sy), 2)
        keep = cols > rows   # torch.triu(attention, diagonal=1), post-softmax

    # Per-head scaled-dot-product attention (statically unrolled), results
    # written into a lane-dense (bb, Sx, H*P) VMEM scratch (no concat chain).
    for h in range(n_heads):
        lo = h * proj_dim
        qh = q[:, :, lo:lo + proj_dim].astype(cdt)
        kh = k[:, :, lo:lo + proj_dim].astype(cdt)
        vh = v[:, :, lo:lo + proj_dim].astype(cdt)
        scores = jnp.einsum('bqd,bkd->bqk', qh, kh,
                            preferred_element_type=f32)        # (bb, Sx, Sy)
        attn = _softmax_lastdim(scores)
        if mask:
            # Applied AFTER softmax, keeping the strictly-upper triangle,
            # exactly as in the reference module (no renormalization).
            attn = jnp.where(keep, attn, 0.0)
        temp_ref[:, :, lo:lo + proj_dim] = jnp.einsum(
            'bqk,bkd->bqd', attn.astype(cdt), vh,
            preferred_element_type=f32)                         # (bb, Sx, P)

    temp = temp_ref[...].reshape(bb * Sx, HP).astype(cdt)

    # Output projection + residual (row-wise over bb*Sx rows).
    x1 = x + jnp.dot(temp, wo_ref[...], preferred_element_type=f32) + bo_ref[...]

    # AttentionDenseBlock: x1 + Linear(GELU(Linear(LayerNorm(x1)))).
    xd = _layernorm(x1, gd_ref[...], bd_ref[...]).astype(cdt)
    h1 = _gelu_exact(jnp.dot(xd, w1_ref[...], preferred_element_type=f32)
                     + b1_ref[...]).astype(cdt)
    out = x1 + jnp.dot(h1, w2_ref[...], preferred_element_type=f32) + b2_ref[...]

    o_ref[...] = out.reshape(bb, Sx, Dx).astype(o_ref.dtype)


# -------------------------------- wrapper ------------------------------------

def alpha_mha_forward(x, y, params, *, mask: bool = False,
                      block_b: int | None = None, use_bf16: bool = False):
    """x: (B, Sx, x_dim), y: (B, Sy, y_dim) -> (B, Sx, x_dim).

    Demo shapes are tile-aligned (Sx, Sy multiples of 8; x_dim, H*P multiples
    of 128); general shapes should be padded in the wrapper before use.
    """
    B, Sx, Dx = x.shape
    _, Sy, Dy = y.shape
    heads = params["heads"]
    H = len(heads)
    P = heads[0][0].shape[0]
    HP = H * P
    hidden = params["dense_lin1"][0].shape[0]
    scale = 1.0 / float(P) ** 0.5

    # Bb batch elements per grid step; keep grid length a multiple of 2 so
    # v7x's two TensorCores both get work (single TC on v5e/v6e just sees
    # larger, better-amortized steps).
    if block_b is None:
        block_b = B // 2 if (B % 2 == 0 and B >= 2) else B
    assert B % block_b == 0, "B must be divisible by block_b"
    nsteps = B // block_b

    wdt = jnp.bfloat16 if use_bf16 else jnp.float32
    row = lambda a: a.reshape(1, -1).astype(jnp.float32)   # 1-D params -> 2-D tiles

    # Fuse per-head weights into lane-dense slabs; pre-transpose everything;
    # fold the attention scale into the query projection.
    wq_t = (jnp.concatenate([h[0].T for h in heads], axis=1) * scale).astype(wdt)
    bq = row(jnp.concatenate([h[1] for h in heads]) * scale)               # (1, H*P)
    wk_t = jnp.concatenate([h[2].T for h in heads], axis=1).astype(wdt)    # (Dy, H*P)
    bk = row(jnp.concatenate([h[3] for h in heads]))
    wv_t = jnp.concatenate([h[4].T for h in heads], axis=1).astype(wdt)    # (Dy, H*P)
    bv = row(jnp.concatenate([h[5] for h in heads]))

    wo_t = params["out_linear"][0].T.astype(wdt)                           # (H*P, Dx)
    bo = row(params["out_linear"][1])
    w1_t = params["dense_lin1"][0].T.astype(wdt)                           # (Dx, M*Dx)
    b1 = row(params["dense_lin1"][1])
    w2_t = params["dense_lin2"][0].T.astype(wdt)                           # (M*Dx, Dx)
    b2 = row(params["dense_lin2"][1])

    gx, bx = (row(v) for v in params["ln_x"])
    gy, by = (row(v) for v in params["ln_y"])
    gd, bd = (row(v) for v in params["dense_ln"])

    consts = [gx, bx, gy, by, wq_t, bq, wk_t, bk, wv_t, bv,
              wo_t, bo, gd, bd, w1_t, b1, w2_t, b2]

    if use_bf16:
        x = x.astype(jnp.bfloat16)
        y = y.astype(jnp.bfloat16)

    def const_spec(arr):
        # Resident across the whole grid (index_map constant).
        # TODO(synk): at large Dx/hidden on v7x (64 MiB VMEM), single-buffer
        # these with pipeline_mode=pl.Buffered(1) and prefer bf16 weights.
        return pl.BlockSpec(arr.shape, lambda g: (0, 0))

    kernel = functools.partial(_alpha_mha_kernel,
                               n_heads=H, proj_dim=P, mask=mask)

    # Advisory cost estimate so XLA schedules surrounding ops sensibly.
    flops = 2 * B * (Sx * Dx * HP + 2 * Sy * Dy * HP + 2 * H * Sx * Sy * P
                     + Sx * HP * Dx + 2 * Sx * Dx * hidden)
    transcendentals = B * (H * Sx * Sy + Sx * hidden)
    weight_bytes = sum(int(a.size) * a.dtype.itemsize for a in consts)
    bytes_accessed = int(x.size * x.dtype.itemsize
                         + y.size * y.dtype.itemsize
                         + B * Sx * Dx * x.dtype.itemsize
                         + weight_bytes)
    cost = pl.CostEstimate(flops=int(flops),
                           transcendentals=int(transcendentals),
                           bytes_accessed=bytes_accessed)

    out_dtype = x.dtype

    return pl.pallas_call(
        kernel,
        out_shape=jax.ShapeDtypeStruct((B, Sx, Dx), out_dtype),
        grid_spec=pltpu.PrefetchScalarGridSpec(
            num_scalar_prefetch=0,
            grid=(nsteps,),
            in_specs=[pl.BlockSpec((block_b, Sx, Dx), lambda g: (g, 0, 0)),
                      pl.BlockSpec((block_b, Sy, Dy), lambda g: (g, 0, 0))]
                     + [const_spec(a) for a in consts],
            out_specs=pl.BlockSpec((block_b, Sx, Dx), lambda g: (g, 0, 0)),
            scratch_shapes=[pltpu.VMEM((block_b, Sx, HP), jnp.float32)],
        ),
        compiler_params=pltpu.CompilerParams(
            dimension_semantics=("parallel",)),
        cost_estimate=cost,
    )(x, y, *consts)


# ------------------------------ params & ref ----------------------------------

def init_params(key, x_dim, y_dim, proj_dim, n_heads, multiplier):
    keys = iter(jax.random.split(key, 6 * n_heads + 16))

    def w(shape, s=0.1):
        return jax.random.normal(next(keys), shape, jnp.float32) * s

    heads = []
    for _ in range(n_heads):
        heads.append((w((proj_dim, x_dim)), w((proj_dim,)),
                      w((proj_dim, y_dim)), w((proj_dim,)),
                      w((proj_dim, y_dim)), w((proj_dim,))))
    hidden = multiplier * x_dim
    return {
        "ln_x": (1.0 + w((x_dim,)), w((x_dim,))),
        "ln_y": (1.0 + w((y_dim,)), w((y_dim,))),
        "heads": heads,
        "out_linear": (w((x_dim, n_heads * proj_dim)), w((x_dim,))),
        "dense_ln": (1.0 + w((x_dim,)), w((x_dim,))),
        "dense_lin1": (w((hidden, x_dim)), w((hidden,))),
        "dense_lin2": (w((x_dim, hidden)), w((x_dim,))),
    }


def _reference(x, y, params, *, mask=False):
    def ln(v, g, b, eps=1e-5):
        mu = v.mean(-1, keepdims=True)
        var = ((v - mu) ** 2).mean(-1, keepdims=True)
        return (v - mu) / jnp.sqrt(var + eps) * g + b

    gx, bx = params["ln_x"]
    gy, by = params["ln_y"]
    xn = ln(x, gx, bx)
    yn = ln(y, gy, by)

    outs = []
    for (wq, bq, wk, bk, wv, bv) in params["heads"]:
        q = xn @ wq.T + bq
        k = yn @ wk.T + bk
        v = yn @ wv.T + bv
        scale = 1.0 / jnp.sqrt(jnp.float32(wq.shape[0]))
        a = jax.nn.softmax(jnp.einsum("bqd,bkd->bqk", q, k) * scale, axis=-1)
        if mask:
            a = jnp.triu(a, k=1)
        outs.append(jnp.einsum("bqk,bkd->bqd", a, v))
    temp = jnp.concatenate(outs, axis=-1)

    wo, bo = params["out_linear"]
    x1 = x + temp @ wo.T + bo

    gd, bd = params["dense_ln"]
    w1, b1 = params["dense_lin1"]
    w2, b2 = params["dense_lin2"]
    xd = ln(x1, gd, bd)
    h = jax.nn.gelu(xd @ w1.T + b1, approximate=False)
    return x1 + h @ w2.T + b2


if __name__ == "__main__":
    # Small, lane-/sublane-aligned shapes consistent with the module's forward:
    # x_dim = 128 (lane-dense output), n_heads * proj_dim = 128, Sx = Sy = 8.
    # B = 8 so each grid step fuses 4 batch rows (M = 32) and the grid of 2
    # keeps both v7x TensorCores busy.
    B, Sx, Sy = 8, 8, 8
    x_dim, y_dim = 128, 64
    proj_dim, n_heads, multiplier = 16, 8, 4

    key = jax.random.PRNGKey(0)
    kx, ky, kp = jax.random.split(key, 3)
    x = jax.random.normal(kx, (B, Sx, x_dim), dtype=jnp.float32)
    y = jax.random.normal(ky, (B, Sy, y_dim), dtype=jnp.float32)
    params = init_params(kp, x_dim, y_dim, proj_dim, n_heads, multiplier)

    ok = True
    for mask in (False, True):
        out = jax.block_until_ready(alpha_mha_forward(x, y, params, mask=mask))
        ref = _reference(x, y, params, mask=mask)
        ok &= bool(jnp.allclose(out, ref, atol=1e-4, rtol=1e-4))

    print("KERNEL_OK" if ok else "MISMATCH")
</pallas_src>

<mosaic_0001>
module attributes {stable_mosaic.version = 11 : i64} {
  func.func @_alpha_mha_kernel(%arg0: i32, %arg1: memref<4x8x128xf32, #tpu.memory_space<vmem>>, %arg2: memref<4x8x64xf32, #tpu.memory_space<vmem>>, %arg3: memref<1x128xf32, #tpu.memory_space<vmem>>, %arg4: memref<1x128xf32, #tpu.memory_space<vmem>>, %arg5: memref<1x64xf32, #tpu.memory_space<vmem>>, %arg6: memref<1x64xf32, #tpu.memory_space<vmem>>, %arg7: memref<128x128xf32, #tpu.memory_space<vmem>>, %arg8: memref<1x128xf32, #tpu.memory_space<vmem>>, %arg9: memref<64x128xf32, #tpu.memory_space<vmem>>, %arg10: memref<1x128xf32, #tpu.memory_space<vmem>>, %arg11: memref<64x128xf32, #tpu.memory_space<vmem>>, %arg12: memref<1x128xf32, #tpu.memory_space<vmem>>, %arg13: memref<128x128xf32, #tpu.memory_space<vmem>>, %arg14: memref<1x128xf32, #tpu.memory_space<vmem>>, %arg15: memref<1x128xf32, #tpu.memory_space<vmem>>, %arg16: memref<1x128xf32, #tpu.memory_space<vmem>>, %arg17: memref<128x512xf32, #tpu.memory_space<vmem>>, %arg18: memref<1x512xf32, #tpu.memory_space<vmem>>, %arg19: memref<512x128xf32, #tpu.memory_space<vmem>>, %arg20: memref<1x128xf32, #tpu.memory_space<vmem>>, %arg21: memref<4x8x128xf32, #tpu.memory_space<vmem>>, %arg22: memref<4x8x128xf32, #tpu.memory_space<vmem>>) attributes {dimension_semantics = [#tpu.dimension_semantics<parallel>], iteration_bounds = array<i64: 2>, scalar_prefetch = 0 : i64, scratch_operands = 1 : i64, tpu.core_type = #tpu.core_type<tc>, window_params = [{transform_indices = @transform_0, window_bounds = array<i64: 4, 8, 128>}, {transform_indices = @transform_1, window_bounds = array<i64: 4, 8, 64>}, {pipeline_mode = #tpu.pipeline_mode<synchronous>, transform_indices = @transform_2, window_bounds = array<i64: 1, 128>}, {pipeline_mode = #tpu.pipeline_mode<synchronous>, transform_indices = @transform_3, window_bounds = array<i64: 1, 128>}, {pipeline_mode = #tpu.pipeline_mode<synchronous>, transform_indices = @transform_4, window_bounds = array<i64: 1, 64>}, {pipeline_mode = #tpu.pipeline_mode<synchronous>, transform_indices = @transform_5, window_bounds = array<i64: 1, 64>}, {pipeline_mode = #tpu.pipeline_mode<synchronous>, transform_indices = @transform_6, window_bounds = array<i64: 128, 128>}, {pipeline_mode = #tpu.pipeline_mode<synchronous>, transform_indices = @transform_7, window_bounds = array<i64: 1, 128>}, {pipeline_mode = #tpu.pipeline_mode<synchronous>, transform_indices = @transform_8, window_bounds = array<i64: 64, 128>}, {pipeline_mode = #tpu.pipeline_mode<synchronous>, transform_indices = @transform_9, window_bounds = array<i64: 1, 128>}, {pipeline_mode = #tpu.pipeline_mode<synchronous>, transform_indices = @transform_10, window_bounds = array<i64: 64, 128>}, {pipeline_mode = #tpu.pipeline_mode<synchronous>, transform_indices = @transform_11, window_bounds = array<i64: 1, 128>}, {pipeline_mode = #tpu.pipeline_mode<synchronous>, transform_indices = @transform_12, window_bounds = array<i64: 128, 128>}, {pipeline_mode = #tpu.pipeline_mode<synchronous>, transform_indices = @transform_13, window_bounds = array<i64: 1, 128>}, {pipeline_mode = #tpu.pipeline_mode<synchronous>, transform_indices = @transform_14, window_bounds = array<i64: 1, 128>}, {pipeline_mode = #tpu.pipeline_mode<synchronous>, transform_indices = @transform_15, window_bounds = array<i64: 1, 128>}, {pipeline_mode = #tpu.pipeline_mode<synchronous>, transform_indices = @transform_16, window_bounds = array<i64: 128, 512>}, {pipeline_mode = #tpu.pipeline_mode<synchronous>, transform_indices = @transform_17, window_bounds = array<i64: 1, 512>}, {pipeline_mode = #tpu.pipeline_mode<synchronous>, transform_indices = @transform_18, window_bounds = array<i64: 512, 128>}, {pipeline_mode = #tpu.pipeline_mode<synchronous>, transform_indices = @transform_19, window_bounds = array<i64: 1, 128>}, {transform_indices = @transform_20, window_bounds = array<i64: 4, 8, 128>}]} {
    %c0 = arith.constant 0 : index
    %c0_0 = arith.constant 0 : index
    %c0_1 = arith.constant 0 : index
    %0 = vector.load %arg1[%c0, %c0_0, %c0_1] : memref<4x8x128xf32, #tpu.memory_space<vmem>>, vector<4x8x128xf32>
    %1 = vector.shape_cast %0 : vector<4x8x128xf32> to vector<32x128xf32>
    %c0_2 = arith.constant 0 : index
    %c0_3 = arith.constant 0 : index
    %c0_4 = arith.constant 0 : index
    %2 = vector.load %arg2[%c0_2, %c0_3, %c0_4] : memref<4x8x64xf32, #tpu.memory_space<vmem>>, vector<4x8x64xf32>
    %3 = vector.shape_cast %2 : vector<4x8x64xf32> to vector<32x64xf32>
    %c0_5 = arith.constant 0 : index
    %c0_6 = arith.constant 0 : index
    %4 = vector.load %arg3[%c0_5, %c0_6] : memref<1x128xf32, #tpu.memory_space<vmem>>, vector<1x128xf32>
    %c0_7 = arith.constant 0 : index
    %c0_8 = arith.constant 0 : index
    %5 = vector.load %arg4[%c0_7, %c0_8] : memref<1x128xf32, #tpu.memory_space<vmem>>, vector<1x128xf32>
    %cst = arith.constant dense<0.000000e+00> : vector<32xf32>
    %6 = vector.multi_reduction <add>, %1, %cst [1] : vector<32x128xf32> to vector<32xf32>
    %7 = vector.shape_cast %6 : vector<32xf32> to vector<32x1xf32>
    %cst_9 = arith.constant 1.280000e+02 : f32
    %8 = vector.broadcast %cst_9 : f32 to vector<32x1xf32>
    %9 = arith.divf %7, %8 : vector<32x1xf32>
    %10 = vector.broadcast %9 : vector<32x1xf32> to vector<32x128xf32>
    %11 = arith.subf %1, %10 : vector<32x128xf32>
    %12 = arith.mulf %11, %11 : vector<32x128xf32>
    %cst_10 = arith.constant dense<0.000000e+00> : vector<32xf32>
    %13 = vector.multi_reduction <add>, %12, %cst_10 [1] : vector<32x128xf32> to vector<32xf32>
    %14 = vector.shape_cast %13 : vector<32xf32> to vector<32x1xf32>
    %cst_11 = arith.constant 1.280000e+02 : f32
    %15 = vector.broadcast %cst_11 : f32 to vector<32x1xf32>
    %16 = arith.divf %14, %15 : vector<32x1xf32>
    %cst_12 = arith.constant 9.99999974E-6 : f32
    %17 = vector.broadcast %cst_12 : f32 to vector<32x1xf32>
    %18 = arith.addf %16, %17 : vector<32x1xf32>
    %19 = math.rsqrt %18 : vector<32x1xf32>
    %20 = vector.broadcast %19 : vector<32x1xf32> to vector<32x128xf32>
    %21 = arith.mulf %11, %20 : vector<32x128xf32>
    %22 = vector.broadcast %4 : vector<1x128xf32> to vector<32x128xf32>
    %23 = arith.mulf %21, %22 : vector<32x128xf32>
    %24 = vector.broadcast %5 : vector<1x128xf32> to vector<32x128xf32>
    %25 = arith.addf %23, %24 : vector<32x128xf32>
    %c0_13 = arith.constant 0 : index
    %c0_14 = arith.constant 0 : index
    %26 = vector.load %arg5[%c0_13, %c0_14] : memref<1x64xf32, #tpu.memory_space<vmem>>, vector<1x64xf32>
    %c0_15 = arith.constant 0 : index
    %c0_16 = arith.constant 0 : index
    %27 = vector.load %arg6[%c0_15, %c0_16] : memref<1x64xf32, #tpu.memory_space<vmem>>, vector<1x64xf32>
    %cst_17 = arith.constant dense<0.000000e+00> : vector<32xf32>
    %28 = vector.multi_reduction <add>, %3, %cst_17 [1] : vector<32x64xf32> to vector<32xf32>
    %29 = vector.shape_cast %28 : vector<32xf32> to vector<32x1xf32>
    %cst_18 = arith.constant 6.400000e+01 : f32
    %30 = vector.broadcast %cst_18 : f32 to vector<32x1xf32>
    %31 = arith.divf %29, %30 : vector<32x1xf32>
    %32 = vector.broadcast %31 : vector<32x1xf32> to vector<32x64xf32>
    %33 = arith.subf %3, %32 : vector<32x64xf32>
    %34 = arith.mulf %33, %33 : vector<32x64xf32>
    %cst_19 = arith.constant dense<0.000000e+00> : vector<32xf32>
    %35 = vector.multi_reduction <add>, %34, %cst_19 [1] : vector<32x64xf32> to vector<32xf32>
    %36 = vector.shape_cast %35 : vector<32xf32> to vector<32x1xf32>
    %cst_20 = arith.constant 6.400000e+01 : f32
    %37 = vector.broadcast %cst_20 : f32 to vector<32x1xf32>
    %38 = arith.divf %36, %37 : vector<32x1xf32>
    %cst_21 = arith.constant 9.99999974E-6 : f32
    %39 = vector.broadcast %cst_21 : f32 to vector<32x1xf32>
    %40 = arith.addf %38, %39 : vector<32x1xf32>
    %41 = math.rsqrt %40 : vector<32x1xf32>
    %42 = vector.broadcast %41 : vector<32x1xf32> to vector<32x64xf32>
    %43 = arith.mulf %33, %42 : vector<32x64xf32>
    %44 = vector.broadcast %26 : vector<1x64xf32> to vector<32x64xf32>
    %45 = arith.mulf %43, %44 : vector<32x64xf32>
    %46 = vector.broadcast %27 : vector<1x64xf32> to vector<32x64xf32>
    %47 = arith.addf %45, %46 : vector<32x64xf32>
    %c0_22 = arith.constant 0 : index
    %c0_23 = arith.constant 0 : index
    %48 = vector.load %arg7[%c0_22, %c0_23] : memref<128x128xf32, #tpu.memory_space<vmem>>, vector<128x128xf32>
    %cst_24 = arith.constant dense<0.000000e+00> : vector<32x128xf32>
    %49 = tpu.matmul %25, %48, %cst_24 {dimension_numbers = #tpu.dot_dimension_numbers<[1], [0], [0], [1], [0, 0, 1, 1], [], []>} : vector<32x128xf32>, vector<128x128xf32>, vector<32x128xf32> -> vector<32x128xf32>
    %c0_25 = arith.constant 0 : index
    %c0_26 = arith.constant 0 : index
    %50 = vector.load %arg8[%c0_25, %c0_26] : memref<1x128xf32, #tpu.memory_space<vmem>>, vector<1x128xf32>
    %51 = vector.broadcast %50 : vector<1x128xf32> to vector<32x128xf32>
    %52 = arith.addf %49, %51 : vector<32x128xf32>
    %53 = vector.shape_cast %52 : vector<32x128xf32> to vector<4x8x128xf32>
    %c0_27 = arith.constant 0 : index
    %c0_28 = arith.constant 0 : index
    %54 = vector.load %arg9[%c0_27, %c0_28] : memref<64x128xf32, #tpu.memory_space<vmem>>, vector<64x128xf32>
    %cst_29 = arith.constant dense<0.000000e+00> : vector<32x128xf32>
    %55 = tpu.matmul %47, %54, %cst_29 {dimension_numbers = #tpu.dot_dimension_numbers<[1], [0], [0], [1], [0, 0, 1, 1], [], []>} : vector<32x64xf32>, vector<64x128xf32>, vector<32x128xf32> -> vector<32x128xf32>
    %c0_30 = arith.constant 0 : index
    %c0_31 = arith.constant 0 : index
    %56 = vector.load %arg10[%c0_30, %c0_31] : memref<1x128xf32, #tpu.memory_space<vmem>>, vector<1x128xf32>
    %57 = vector.broadcast %56 : vector<1x128xf32> to vector<32x128xf32>
    %58 = arith.addf %55, %57 : vector<32x128xf32>
    %59 = vector.shape_cast %58 : vector<32x128xf32> to vector<4x8x128xf32>
    %c0_32 = arith.constant 0 : index
    %c0_33 = arith.constant 0 : index
    %60 = vector.load %arg11[%c0_32, %c0_33] : memref<64x128xf32, #tpu.memory_space<vmem>>, vector<64x128xf32>
    %cst_34 = arith.constant dense<0.000000e+00> : vector<32x128xf32>
    %61 = tpu.matmul %47, %60, %cst_34 {dimension_numbers = #tpu.dot_dimension_numbers<[1], [0], [0], [1], [0, 0, 1, 1], [], []>} : vector<32x64xf32>, vector<64x128xf32>, vector<32x128xf32> -> vector<32x128xf32>
    %c0_35 = arith.constant 0 : index
    %c0_36 = arith.constant 0 : index
    %62 = vector.load %arg12[%c0_35, %c0_36] : memref<1x128xf32, #tpu.memory_space<vmem>>, vector<1x128xf32>
    %63 = vector.broadcast %62 : vector<1x128xf32> to vector<32x128xf32>
    %64 = arith.addf %61, %63 : vector<32x128xf32>
    %65 = vector.shape_cast %64 : vector<32x128xf32> to vector<4x8x128xf32>
    %66 = vector.extract_strided_slice %53 {offsets = [0, 0, 0], sizes = [4, 8, 16], strides = [1, 1, 1]} : vector<4x8x128xf32> to vector<4x8x16xf32>
    %67 = vector.extract_strided_slice %59 {offsets = [0, 0, 0], sizes = [4, 8, 16], strides = [1, 1, 1]} : vector<4x8x128xf32> to vector<4x8x16xf32>
    %68 = vector.extract_strided_slice %65 {offsets = [0, 0, 0], sizes = [4, 8, 16], strides = [1, 1, 1]} : vector<4x8x128xf32> to vector<4x8x16xf32>
    "tpu.trace_start"() <{level = 10 : i32, message = "bqd,bkd->bqk"}> : () -> ()
    %cst_37 = arith.constant dense<0.000000e+00> : vector<4x8x8xf32>
    %69 = tpu.matmul %66, %67, %cst_37 {dimension_numbers = #tpu.dot_dimension_numbers<[2], [2], [1], [1], [0, 0, 0, 1, 1, 1], [0], [0]>} : vector<4x8x16xf32>, vector<4x8x16xf32>, vector<4x8x8xf32> -> vector<4x8x8xf32>
    "tpu.trace_stop"() : () -> ()
    %cst_38 = arith.constant dense<0xFF800000> : vector<4x8xf32>
    %70 = vector.multi_reduction <maximumf>, %69, %cst_38 [2] : vector<4x8x8xf32> to vector<4x8xf32>
    %71 = vector.shape_cast %70 : vector<4x8xf32> to vector<4x8x1xf32>
    %72 = vector.broadcast %71 : vector<4x8x1xf32> to vector<4x8x8xf32>
    %73 = arith.subf %69, %72 : vector<4x8x8xf32>
    %74 = math.exp %73 : vector<4x8x8xf32>
    %cst_39 = arith.constant dense<0.000000e+00> : vector<4x8xf32>
    %75 = vector.multi_reduction <add>, %74, %cst_39 [2] : vector<4x8x8xf32> to vector<4x8xf32>
    %76 = vector.shape_cast %75 : vector<4x8xf32> to vector<4x8x1xf32>
    %77 = tpu.reciprocal %76 {approx = true} : vector<4x8x1xf32> -> vector<4x8x1xf32>
    %78 = arith.mulf %76, %77 : vector<4x8x1xf32>
    %cst_40 = arith.constant 2.000000e+00 : f32
    %79 = vector.broadcast %cst_40 : f32 to vector<4x8x1xf32>
    %80 = arith.subf %79, %78 : vector<4x8x1xf32>
    %81 = arith.mulf %77, %80 : vector<4x8x1xf32>
    %82 = vector.broadcast %81 : vector<4x8x1xf32> to vector<4x8x8xf32>
    %83 = arith.mulf %74, %82 : vector<4x8x8xf32>
    "tpu.trace_start"() <{level = 10 : i32, message = "bqk,bkd->bqd"}> : () -> ()
    %cst_41 = arith.constant dense<0.000000e+00> : vector<4x8x16xf32>
    %84 = tpu.matmul %83, %68, %cst_41 {dimension_numbers = #tpu.dot_dimension_numbers<[2], [1], [1], [2], [0, 0, 0, 1, 1, 2], [0], [0]>} : vector<4x8x8xf32>, vector<4x8x16xf32>, vector<4x8x16xf32> -> vector<4x8x16xf32>
    "tpu.trace_stop"() : () -> ()
    %c0_42 = arith.constant 0 : index
    %c0_43 = arith.constant 0 : index
    %c0_44 = arith.constant 0 : index
    %85 = vector.load %arg22[%c0_42, %c0_43, %c0_44] : memref<4x8x128xf32, #tpu.memory_space<vmem>>, vector<4x8x16xf32>
    tpu.vector_store %arg22[%c0_42, %c0_43, %c0_44], %84 {strides = array<i32>} : memref<4x8x128xf32, #tpu.memory_space<vmem>>, vector<4x8x16xf32>,
    %86 = vector.extract_strided_slice %53 {offsets = [0, 0, 16], sizes = [4, 8, 16], strides = [1, 1, 1]} : vector<4x8x128xf32> to vector<4x8x16xf32>
    %87 = vector.extract_strided_slice %59 {offsets = [0, 0, 16], sizes = [4, 8, 16], strides = [1, 1, 1]} : vector<4x8x128xf32> to vector<4x8x16xf32>
    %88 = vector.extract_strided_slice %65 {offsets = [0, 0, 16], sizes = [4, 8, 16], strides = [1, 1, 1]} : vector<4x8x128xf32> to vector<4x8x16xf32>
    "tpu.trace_start"() <{level = 10 : i32, message = "bqd,bkd->bqk"}> : () -> ()
    %cst_45 = arith.constant dense<0.000000e+00> : vector<4x8x8xf32>
    %89 = tpu.matmul %86, %87, %cst_45 {dimension_numbers = #tpu.dot_dimension_numbers<[2], [2], [1], [1], [0, 0, 0, 1, 1, 1], [0], [0]>} : vector<4x8x16xf32>, vector<4x8x16xf32>, vector<4x8x8xf32> -> vector<4x8x8xf32>
    "tpu.trace_stop"() : () -> ()
    %cst_46 = arith.constant dense<0xFF800000> : vector<4x8xf32>
    %90 = vector.multi_reduction <maximumf>, %89, %cst_46 [2] : vector<4x8x8xf32> to vector<4x8xf32>
    %91 = vector.shape_cast %90 : vector<4x8xf32> to vector<4x8x1xf32>
    %92 = vector.broadcast %91 : vector<4x8x1xf32> to vector<4x8x8xf32>
    %93 = arith.subf %89, %92 : vector<4x8x8xf32>
    %94 = math.exp %93 : vector<4x8x8xf32>
    %cst_47 = arith.constant dense<0.000000e+00> : vector<4x8xf32>
    %95 = vector.multi_reduction <add>, %94, %cst_47 [2] : vector<4x8x8xf32> to vector<4x8xf32>
    %96 = vector.shape_cast %95 : vector<4x8xf32> to vector<4x8x1xf32>
    %97 = tpu.reciprocal %96 {approx = true} : vector<4x8x1xf32> -> vector<4x8x1xf32>
    %98 = arith.mulf %96, %97 : vector<4x8x1xf32>
    %cst_48 = arith.constant 2.000000e+00 : f32
    %99 = vector.broadcast %cst_48 : f32 to vector<4x8x1xf32>
    %100 = arith.subf %99, %98 : vector<4x8x1xf32>
    %101 = arith.mulf %97, %100 : vector<4x8x1xf32>
    %102 = vector.broadcast %101 : vector<4x8x1xf32> to vector<4x8x8xf32>
    %103 = arith.mulf %94, %102 : vector<4x8x8xf32>
    "tpu.trace_start"() <{level = 10 : i32, message = "bqk,bkd->bqd"}> : () -> ()
    %cst_49 = arith.constant dense<0.000000e+00> : vector<4x8x16xf32>
    %104 = tpu.matmul %103, %88, %cst_49 {dimension_numbers = #tpu.dot_dimension_numbers<[2], [1], [1], [2], [0, 0, 0, 1, 1, 2], [0], [0]>} : vector<4x8x8xf32>, vector<4x8x16xf32>, vector<4x8x16xf32> -> vector<4x8x16xf32>
    "tpu.trace_stop"() : () -> ()
    %c0_50 = arith.constant 0 : index
    %c0_51 = arith.constant 0 : index
    %c16 = arith.constant 16 : index
    %105 = vector.load %arg22[%c0_50, %c0_51, %c16] : memref<4x8x128xf32, #tpu.memory_space<vmem>>, vector<4x8x16xf32>
    tpu.vector_store %arg22[%c0_50, %c0_51, %c16], %104 {strides = array<i32>} : memref<4x8x128xf32, #tpu.memory_space<vmem>>, vector<4x8x16xf32>,
    %106 = vector.extract_strided_slice %53 {offsets = [0, 0, 32], sizes = [4, 8, 16], strides = [1, 1, 1]} : vector<4x8x128xf32> to vector<4x8x16xf32>
    %107 = vector.extract_strided_slice %59 {offsets = [0, 0, 32], sizes = [4, 8, 16], strides = [1, 1, 1]} : vector<4x8x128xf32> to vector<4x8x16xf32>
    %108 = vector.extract_strided_slice %65 {offsets = [0, 0, 32], sizes = [4, 8, 16], strides = [1, 1, 1]} : vector<4x8x128xf32> to vector<4x8x16xf32>
    "tpu.trace_start"() <{level = 10 : i32, message = "bqd,bkd->bqk"}> : () -> ()
    %cst_52 = arith.constant dense<0.000000e+00> : vector<4x8x8xf32>
    %109 = tpu.matmul %106, %107, %cst_52 {dimension_numbers = #tpu.dot_dimension_numbers<[2], [2], [1], [1], [0, 0, 0, 1, 1, 1], [0], [0]>} : vector<4x8x16xf32>, vector<4x8x16xf32>, vector<4x8x8xf32> -> vector<4x8x8xf32>
    "tpu.trace_stop"() : () -> ()
    %cst_53 = arith.constant dense<0xFF800000> : vector<4x8xf32>
    %110 = vector.multi_reduction <maximumf>, %109, %cst_53 [2] : vector<4x8x8xf32> to vector<4x8xf32>
    %111 = vector.shape_cast %110 : vector<4x8xf32> to vector<4x8x1xf32>
    %112 = vector.broadcast %111 : vector<4x8x1xf32> to vector<4x8x8xf32>
    %113 = arith.subf %109, %112 : vector<4x8x8xf32>
    %114 = math.exp %113 : vector<4x8x8xf32>
    %cst_54 = arith.constant dense<0.000000e+00> : vector<4x8xf32>
    %115 = vector.multi_reduction <add>, %114, %cst_54 [2] : vector<4x8x8xf32> to vector<4x8xf32>
    %116 = vector.shape_cast %115 : vector<4x8xf32> to vector<4x8x1xf32>
    %117 = tpu.reciprocal %116 {approx = true} : vector<4x8x1xf32> -> vector<4x8x1xf32>
    %118 = arith.mulf %116, %117 : vector<4x8x1xf32>
    %cst_55 = arith.constant 2.000000e+00 : f32
    %119 = vector.broadcast %cst_55 : f32 to vector<4x8x1xf32>
    %120 = arith.subf %119, %118 : vector<4x8x1xf32>
    %121 = arith.mulf %117, %120 : vector<4x8x1xf32>
    %122 = vector.broadcast %121 : vector<4x8x1xf32> to vector<4x8x8xf32>
    %123 = arith.mulf %114, %122 : vector<4x8x8xf32>
    "tpu.trace_start"() <{level = 10 : i32, message = "bqk,bkd->bqd"}> : () -> ()
    %cst_56 = arith.constant dense<0.000000e+00> : vector<4x8x16xf32>
    %124 = tpu.matmul %123, %108, %cst_56 {dimension_numbers = #tpu.dot_dimension_numbers<[2], [1], [1], [2], [0, 0, 0, 1, 1, 2], [0], [0]>} : vector<4x8x8xf32>, vector<4x8x16xf32>, vector<4x8x16xf32> -> vector<4x8x16xf32>
    "tpu.trace_stop"() : () -> ()
    %c0_57 = arith.constant 0 : index
    %c0_58 = arith.constant 0 : index
    %c32 = arith.constant 32 : index
    %125 = vector.load %arg22[%c0_57, %c0_58, %c32] : memref<4x8x128xf32, #tpu.memory_space<vmem>>, vector<4x8x16xf32>
    tpu.vector_store %arg22[%c0_57, %c0_58, %c32], %124 {strides = array<i32>} : memref<4x8x128xf32, #tpu.memory_space<vmem>>, vector<4x8x16xf32>,
    %126 = vector.extract_strided_slice %53 {offsets = [0, 0, 48], sizes = [4, 8, 16], strides = [1, 1, 1]} : vector<4x8x128xf32> to vector<4x8x16xf32>
    %127 = vector.extract_strided_slice %59 {offsets = [0, 0, 48], sizes = [4, 8, 16], strides = [1, 1, 1]} : vector<4x8x128xf32> to vector<4x8x16xf32>
    %128 = vector.extract_strided_slice %65 {offsets = [0, 0, 48], sizes = [4, 8, 16], strides = [1, 1, 1]} : vector<4x8x128xf32> to vector<4x8x16xf32>
    "tpu.trace_start"() <{level = 10 : i32, message = "bqd,bkd->bqk"}> : () -> ()
    %cst_59 = arith.constant dense<0.000000e+00> : vector<4x8x8xf32>
    %129 = tpu.matmul %126, %127, %cst_59 {dimension_numbers = #tpu.dot_dimension_numbers<[2], [2], [1], [1], [0, 0, 0, 1, 1, 1], [0], [0]>} : vector<4x8x16xf32>, vector<4x8x16xf32>, vector<4x8x8xf32> -> vector<4x8x8xf32>
    "tpu.trace_stop"() : () -> ()
    %cst_60 = arith.constant dense<0xFF800000> : vector<4x8xf32>
    %130 = vector.multi_reduction <maximumf>, %129, %cst_60 [2] : vector<4x8x8xf32> to vector<4x8xf32>
    %131 = vector.shape_cast %130 : vector<4x8xf32> to vector<4x8x1xf32>
    %132 = vector.broadcast %131 : vector<4x8x1xf32> to vector<4x8x8xf32>
    %133 = arith.subf %129, %132 : vector<4x8x8xf32>
    %134 = math.exp %133 : vector<4x8x8xf32>
    %cst_61 = arith.constant dense<0.000000e+00> : vector<4x8xf32>
    %135 = vector.multi_reduction <add>, %134, %cst_61 [2] : vector<4x8x8xf32> to vector<4x8xf32>
    %136 = vector.shape_cast %135 : vector<4x8xf32> to vector<4x8x1xf32>
    %137 = tpu.reciprocal %136 {approx = true} : vector<4x8x1xf32> -> vector<4x8x1xf32>
    %138 = arith.mulf %136, %137 : vector<4x8x1xf32>
    %cst_62 = arith.constant 2.000000e+00 : f32
    %139 = vector.broadcast %cst_62 : f32 to vector<4x8x1xf32>
    %140 = arith.subf %139, %138 : vector<4x8x1xf32>
    %141 = arith.mulf %137, %140 : vector<4x8x1xf32>
    %142 = vector.broadcast %141 : vector<4x8x1xf32> to vector<4x8x8xf32>
    %143 = arith.mulf %134, %142 : vector<4x8x8xf32>
    "tpu.trace_start"() <{level = 10 : i32, message = "bqk,bkd->bqd"}> : () -> ()
    %cst_63 = arith.constant dense<0.000000e+00> : vector<4x8x16xf32>
    %144 = tpu.matmul %143, %128, %cst_63 {dimension_numbers = #tpu.dot_dimension_numbers<[2], [1], [1], [2], [0, 0, 0, 1, 1, 2], [0], [0]>} : vector<4x8x8xf32>, vector<4x8x16xf32>, vector<4x8x16xf32> -> vector<4x8x16xf32>
    "tpu.trace_stop"() : () -> ()
    %c0_64 = arith.constant 0 : index
    %c0_65 = arith.constant 0 : index
    %c48 = arith.constant 48 : index
    %145 = vector.load %arg22[%c0_64, %c0_65, %c48] : memref<4x8x128xf32, #tpu.memory_space<vmem>>, vector<4x8x16xf32>
    tpu.vector_store %arg22[%c0_64, %c0_65, %c48], %144 {strides = array<i32>} : memref<4x8x128xf32, #tpu.memory_space<vmem>>, vector<4x8x16xf32>,
    %146 = vector.extract_strided_slice %53 {offsets = [0, 0, 64], sizes = [4, 8, 16], strides = [1, 1, 1]} : vector<4x8x128xf32> to vector<4x8x16xf32>
    %147 = vector.extract_strided_slice %59 {offsets = [0, 0, 64], sizes = [4, 8, 16], strides = [1, 1, 1]} : vector<4x8x128xf32> to vector<4x8x16xf32>
    %148 = vector.extract_strided_slice %65 {offsets = [0, 0, 64], sizes = [4, 8, 16], strides = [1, 1, 1]} : vector<4x8x128xf32> to vector<4x8x16xf32>
    "tpu.trace_start"() <{level = 10 : i32, message = "bqd,bkd->bqk"}> : () -> ()
    %cst_66 = arith.constant dense<0.000000e+00> : vector<4x8x8xf32>
    %149 = tpu.matmul %146, %147, %cst_66 {dimension_numbers = #tpu.dot_dimension_numbers<[2], [2], [1], [1], [0, 0, 0, 1, 1, 1], [0], [0]>} : vector<4x8x16xf32>, vector<4x8x16xf32>, vector<4x8x8xf32> -> vector<4x8x8xf32>
    "tpu.trace_stop"() : () -> ()
    %cst_67 = arith.constant dense<0xFF800000> : vector<4x8xf32>
    %150 = vector.multi_reduction <maximumf>, %149, %cst_67 [2] : vector<4x8x8xf32> to vector<4x8xf32>
    %151 = vector.shape_cast %150 : vector<4x8xf32> to vector<4x8x1xf32>
    %152 = vector.broadcast %151 : vector<4x8x1xf32> to vector<4x8x8xf32>
    %153 = arith.subf %149, %152 : vector<4x8x8xf32>
    %154 = math.exp %153 : vector<4x8x8xf32>
    %cst_68 = arith.constant dense<0.000000e+00> : vector<4x8xf32>
    %155 = vector.multi_reduction <add>, %154, %cst_68 [2] : vector<4x8x8xf32> to vector<4x8xf32>
    %156 = vector.shape_cast %155 : vector<4x8xf32> to vector<4x8x1xf32>
    %157 = tpu.reciprocal %156 {approx = true} : vector<4x8x1xf32> -> vector<4x8x1xf32>
    %158 = arith.mulf %156, %157 : vector<4x8x1xf32>
    %cst_69 = arith.constant 2.000000e+00 : f32
    %159 = vector.broadcast %cst_69 : f32 to vector<4x8x1xf32>
    %160 = arith.subf %159, %158 : vector<4x8x1xf32>
    %161 = arith.mulf %157, %160 : vector<4x8x1xf32>
    %162 = vector.broadcast %161 : vector<4x8x1xf32> to vector<4x8x8xf32>
    %163 = arith.mulf %154, %162 : vector<4x8x8xf32>
    "tpu.trace_start"() <{level = 10 : i32, message = "bqk,bkd->bqd"}> : () -> ()
    %cst_70 = arith.constant dense<0.000000e+00> : vector<4x8x16xf32>
    %164 = tpu.matmul %163, %148, %cst_70 {dimension_numbers = #tpu.dot_dimension_numbers<[2], [1], [1], [2], [0, 0, 0, 1, 1, 2], [0], [0]>} : vector<4x8x8xf32>, vector<4x8x16xf32>, vector<4x8x16xf32> -> vector<4x8x16xf32>
    "tpu.trace_stop"() : () -> ()
    %c0_71 = arith.constant 0 : index
    %c0_72 = arith.constant 0 : index
    %c64 = arith.constant 64 : index
    %165 = vector.load %arg22[%c0_71, %c0_72, %c64] : memref<4x8x128xf32, #tpu.memory_space<vmem>>, vector<4x8x16xf32>
    tpu.vector_store %arg22[%c0_71, %c0_72, %c64], %164 {strides = array<i32>} : memref<4x8x128xf32, #tpu.memory_space<vmem>>, vector<4x8x16xf32>,
    %166 = vector.extract_strided_slice %53 {offsets = [0, 0, 80], sizes = [4, 8, 16], strides = [1, 1, 1]} : vector<4x8x128xf32> to vector<4x8x16xf32>
    %167 = vector.extract_strided_slice %59 {offsets = [0, 0, 80], sizes = [4, 8, 16], strides = [1, 1, 1]} : vector<4x8x128xf32> to vector<4x8x16xf32>
    %168 = vector.extract_strided_slice %65 {offsets = [0, 0, 80], sizes = [4, 8, 16], strides = [1, 1, 1]} : vector<4x8x128xf32> to vector<4x8x16xf32>
    "tpu.trace_start"() <{level = 10 : i32, message = "bqd,bkd->bqk"}> : () -> ()
    %cst_73 = arith.constant dense<0.000000e+00> : vector<4x8x8xf32>
    %169 = tpu.matmul %166, %167, %cst_73 {dimension_numbers = #tpu.dot_dimension_numbers<[2], [2], [1], [1], [0, 0, 0, 1, 1, 1], [0], [0]>} : vector<4x8x16xf32>, vector<4x8x16xf32>, vector<4x8x8xf32> -> vector<4x8x8xf32>
    "tpu.trace_stop"() : () -> ()
    %cst_74 = arith.constant dense<0xFF800000> : vector<4x8xf32>
    %170 = vector.multi_reduction <maximumf>, %169, %cst_74 [2] : vector<4x8x8xf32> to vector<4x8xf32>
    %171 = vector.shape_cast %170 : vector<4x8xf32> to vector<4x8x1xf32>
    %172 = vector.broadcast %171 : vector<4x8x1xf32> to vector<4x8x8xf32>
    %173 = arith.subf %169, %172 : vector<4x8x8xf32>
    %174 = math.exp %173 : vector<4x8x8xf32>
    %cst_75 = arith.constant dense<0.000000e+00> : vector<4x8xf32>
    %175 = vector.multi_reduction <add>, %174, %cst_75 [2] : vector<4x8x8xf32> to vector<4x8xf32>
    %176 = vector.shape_cast %175 : vector<4x8xf32> to vector<4x8x1xf32>
    %177 = tpu.reciprocal %176 {approx = true} : vector<4x8x1xf32> -> vector<4x8x1xf32>
    %178 = arith.mulf %176, %177 : vector<4x8x1xf32>
    %cst_76 = arith.constant 2.000000e+00 : f32
    %179 = vector.broadcast %cst_76 : f32 to vector<4x8x1xf32>
    %180 = arith.subf %179, %178 : vector<4x8x1xf32>
    %181 = arith.mulf %177, %180 : vector<4x8x1xf32>
    %182 = vector.broadcast %181 : vector<4x8x1xf32> to vector<4x8x8xf32>
    %183 = arith.mulf %174, %182 : vector<4x8x8xf32>
    "tpu.trace_start"() <{level = 10 : i32, message = "bqk,bkd->bqd"}> : () -> ()
    %cst_77 = arith.constant dense<0.000000e+00> : vector<4x8x16xf32>
    %184 = tpu.matmul %183, %168, %cst_77 {dimension_numbers = #tpu.dot_dimension_numbers<[2], [1], [1], [2], [0, 0, 0, 1, 1, 2], [0], [0]>} : vector<4x8x8xf32>, vector<4x8x16xf32>, vector<4x8x16xf32> -> vector<4x8x16xf32>
    "tpu.trace_stop"() : () -> ()
    %c0_78 = arith.constant 0 : index
    %c0_79 = arith.constant 0 : index
    %c80 = arith.constant 80 : index
    %185 = vector.load %arg22[%c0_78, %c0_79, %c80] : memref<4x8x128xf32, #tpu.memory_space<vmem>>, vector<4x8x16xf32>
    tpu.vector_store %arg22[%c0_78, %c0_79, %c80], %184 {strides = array<i32>} : memref<4x8x128xf32, #tpu.memory_space<vmem>>, vector<4x8x16xf32>,
    %186 = vector.extract_strided_slice %53 {offsets = [0, 0, 96], sizes = [4, 8, 16], strides = [1, 1, 1]} : vector<4x8x128xf32> to vector<4x8x16xf32>
    %187 = vector.extract_strided_slice %59 {offsets = [0, 0, 96], sizes = [4, 8, 16], strides = [1, 1, 1]} : vector<4x8x128xf32> to vector<4x8x16xf32>
    %188 = vector.extract_strided_slice %65 {offsets = [0, 0, 96], sizes = [4, 8, 16], strides = [1, 1, 1]} : vector<4x8x128xf32> to vector<4x8x16xf32>
    "tpu.trace_start"() <{level = 10 : i32, message = "bqd,bkd->bqk"}> : () -> ()
    %cst_80 = arith.constant dense<0.000000e+00> : vector<4x8x8xf32>
    %189 = tpu.matmul %186, %187, %cst_80 {dimension_numbers = #tpu.dot_dimension_numbers<[2], [2], [1], [1], [0, 0, 0, 1, 1, 1], [0], [0]>} : vector<4x8x16xf32>, vector<4x8x16xf32>, vector<4x8x8xf32> -> vector<4x8x8xf32>
    "tpu.trace_stop"() : () -> ()
    %cst_81 = arith.constant dense<0xFF800000> : vector<4x8xf32>
    %190 = vector.multi_reduction <maximumf>, %189, %cst_81 [2] : vector<4x8x8xf32> to vector<4x8xf32>
    %191 = vector.shape_cast %190 : vector<4x8xf32> to vector<4x8x1xf32>
    %192 = vector.broadcast %191 : vector<4x8x1xf32> to vector<4x8x8xf32>
    %193 = arith.subf %189, %192 : vector<4x8x8xf32>
    %194 = math.exp %193 : vector<4x8x8xf32>
    %cst_82 = arith.constant dense<0.000000e+00> : vector<4x8xf32>
    %195 = vector.multi_reduction <add>, %194, %cst_82 [2] : vector<4x8x8xf32> to vector<4x8xf32>
    %196 = vector.shape_cast %195 : vector<4x8xf32> to vector<4x8x1xf32>
    %197 = tpu.reciprocal %196 {approx = true} : vector<4x8x1xf32> -> vector<4x8x1xf32>
    %198 = arith.mulf %196, %197 : vector<4x8x1xf32>
    %cst_83 = arith.constant 2.000000e+00 : f32
    %199 = vector.broadcast %cst_83 : f32 to vector<4x8x1xf32>
    %200 = arith.subf %199, %198 : vector<4x8x1xf32>
    %201 = arith.mulf %197, %200 : vector<4x8x1xf32>
    %202 = vector.broadcast %201 : vector<4x8x1xf32> to vector<4x8x8xf32>
    %203 = arith.mulf %194, %202 : vector<4x8x8xf32>
    "tpu.trace_start"() <{level = 10 : i32, message = "bqk,bkd->bqd"}> : () -> ()
    %cst_84 = arith.constant dense<0.000000e+00> : vector<4x8x16xf32>
    %204 = tpu.matmul %203, %188, %cst_84 {dimension_numbers = #tpu.dot_dimension_numbers<[2], [1], [1], [2], [0, 0, 0, 1, 1, 2], [0], [0]>} : vector<4x8x8xf32>, vector<4x8x16xf32>, vector<4x8x16xf32> -> vector<4x8x16xf32>
    "tpu.trace_stop"() : () -> ()
    %c0_85 = arith.constant 0 : index
    %c0_86 = arith.constant 0 : index
    %c96 = arith.constant 96 : index
    %205 = vector.load %arg22[%c0_85, %c0_86, %c96] : memref<4x8x128xf32, #tpu.memory_space<vmem>>, vector<4x8x16xf32>
    tpu.vector_store %arg22[%c0_85, %c0_86, %c96], %204 {strides = array<i32>} : memref<4x8x128xf32, #tpu.memory_space<vmem>>, vector<4x8x16xf32>,
    %206 = vector.extract_strided_slice %53 {offsets = [0, 0, 112], sizes = [4, 8, 16], strides = [1, 1, 1]} : vector<4x8x128xf32> to vector<4x8x16xf32>
    %207 = vector.extract_strided_slice %59 {offsets = [0, 0, 112], sizes = [4, 8, 16], strides = [1, 1, 1]} : vector<4x8x128xf32> to vector<4x8x16xf32>
    %208 = vector.extract_strided_slice %65 {offsets = [0, 0, 112], sizes = [4, 8, 16], strides = [1, 1, 1]} : vector<4x8x128xf32> to vector<4x8x16xf32>
    "tpu.trace_start"() <{level = 10 : i32, message = "bqd,bkd->bqk"}> : () -> ()
    %cst_87 = arith.constant dense<0.000000e+00> : vector<4x8x8xf32>
    %209 = tpu.matmul %206, %207, %cst_87 {dimension_numbers = #tpu.dot_dimension_numbers<[2], [2], [1], [1], [0, 0, 0, 1, 1, 1], [0], [0]>} : vector<4x8x16xf32>, vector<4x8x16xf32>, vector<4x8x8xf32> -> vector<4x8x8xf32>
    "tpu.trace_stop"() : () -> ()
    %cst_88 = arith.constant dense<0xFF800000> : vector<4x8xf32>
    %210 = vector.multi_reduction <maximumf>, %209, %cst_88 [2] : vector<4x8x8xf32> to vector<4x8xf32>
    %211 = vector.shape_cast %210 : vector<4x8xf32> to vector<4x8x1xf32>
    %212 = vector.broadcast %211 : vector<4x8x1xf32> to vector<4x8x8xf32>
    %213 = arith.subf %209, %212 : vector<4x8x8xf32>
    %214 = math.exp %213 : vector<4x8x8xf32>
    %cst_89 = arith.constant dense<0.000000e+00> : vector<4x8xf32>
    %215 = vector.multi_reduction <add>, %214, %cst_89 [2] : vector<4x8x8xf32> to vector<4x8xf32>
    %216 = vector.shape_cast %215 : vector<4x8xf32> to vector<4x8x1xf32>
    %217 = tpu.reciprocal %216 {approx = true} : vector<4x8x1xf32> -> vector<4x8x1xf32>
    %218 = arith.mulf %216, %217 : vector<4x8x1xf32>
    %cst_90 = arith.constant 2.000000e+00 : f32
    %219 = vector.broadcast %cst_90 : f32 to vector<4x8x1xf32>
    %220 = arith.subf %219, %218 : vector<4x8x1xf32>
    %221 = arith.mulf %217, %220 : vector<4x8x1xf32>
    %222 = vector.broadcast %221 : vector<4x8x1xf32> to vector<4x8x8xf32>
    %223 = arith.mulf %214, %222 : vector<4x8x8xf32>
    "tpu.trace_start"() <{level = 10 : i32, message = "bqk,bkd->bqd"}> : () -> ()
    %cst_91 = arith.constant dense<0.000000e+00> : vector<4x8x16xf32>
    %224 = tpu.matmul %223, %208, %cst_91 {dimension_numbers = #tpu.dot_dimension_numbers<[2], [1], [1], [2], [0, 0, 0, 1, 1, 2], [0], [0]>} : vector<4x8x8xf32>, vector<4x8x16xf32>, vector<4x8x16xf32> -> vector<4x8x16xf32>
    "tpu.trace_stop"() : () -> ()
    %c0_92 = arith.constant 0 : index
    %c0_93 = arith.constant 0 : index
    %c112 = arith.constant 112 : index
    %225 = vector.load %arg22[%c0_92, %c0_93, %c112] : memref<4x8x128xf32, #tpu.memory_space<vmem>>, vector<4x8x16xf32>
    tpu.vector_store %arg22[%c0_92, %c0_93, %c112], %224 {strides = array<i32>} : memref<4x8x128xf32, #tpu.memory_space<vmem>>, vector<4x8x16xf32>,
    %c0_94 = arith.constant 0 : index
    %c0_95 = arith.constant 0 : index
    %c0_96 = arith.constant 0 : index
    %226 = vector.load %arg22[%c0_94, %c0_95, %c0_96] : memref<4x8x128xf32, #tpu.memory_space<vmem>>, vector<4x8x128xf32>
    %227 = vector.shape_cast %226 : vector<4x8x128xf32> to vector<32x128xf32>
    %c0_97 = arith.constant 0 : index
    %c0_98 = arith.constant 0 : index
    %228 = vector.load %arg13[%c0_97, %c0_98] : memref<128x128xf32, #tpu.memory_space<vmem>>, vector<128x128xf32>
    %cst_99 = arith.constant dense<0.000000e+00> : vector<32x128xf32>
    %229 = tpu.matmul %227, %228, %cst_99 {dimension_numbers = #tpu.dot_dimension_numbers<[1], [0], [0], [1], [0, 0, 1, 1], [], []>} : vector<32x128xf32>, vector<128x128xf32>, vector<32x128xf32> -> vector<32x128xf32>
    %230 = arith.addf %1, %229 : vector<32x128xf32>
    %c0_100 = arith.constant 0 : index
    %c0_101 = arith.constant 0 : index
    %231 = vector.load %arg14[%c0_100, %c0_101] : memref<1x128xf32, #tpu.memory_space<vmem>>, vector<1x128xf32>
    %232 = vector.broadcast %231 : vector<1x128xf32> to vector<32x128xf32>
    %233 = arith.addf %230, %232 : vector<32x128xf32>
    %c0_102 = arith.constant 0 : index
    %c0_103 = arith.constant 0 : index
    %234 = vector.load %arg15[%c0_102, %c0_103] : memref<1x128xf32, #tpu.memory_space<vmem>>, vector<1x128xf32>
    %c0_104 = arith.constant 0 : index
    %c0_105 = arith.constant 0 : index
    %235 = vector.load %arg16[%c0_104, %c0_105] : memref<1x128xf32, #tpu.memory_space<vmem>>, vector<1x128xf32>
    %cst_106 = arith.constant dense<0.000000e+00> : vector<32xf32>
    %236 = vector.multi_reduction <add>, %233, %cst_106 [1] : vector<32x128xf32> to vector<32xf32>
    %237 = vector.shape_cast %236 : vector<32xf32> to vector<32x1xf32>
    %cst_107 = arith.constant 1.280000e+02 : f32
    %238 = vector.broadcast %cst_107 : f32 to vector<32x1xf32>
    %239 = arith.divf %237, %238 : vector<32x1xf32>
    %240 = vector.broadcast %239 : vector<32x1xf32> to vector<32x128xf32>
    %241 = arith.subf %233, %240 : vector<32x128xf32>
    %242 = arith.mulf %241, %241 : vector<32x128xf32>
    %cst_108 = arith.constant dense<0.000000e+00> : vector<32xf32>
    %243 = vector.multi_reduction <add>, %242, %cst_108 [1] : vector<32x128xf32> to vector<32xf32>
    %244 = vector.shape_cast %243 : vector<32xf32> to vector<32x1xf32>
    %cst_109 = arith.constant 1.280000e+02 : f32
    %245 = vector.broadcast %cst_109 : f32 to vector<32x1xf32>
    %246 = arith.divf %244, %245 : vector<32x1xf32>
    %cst_110 = arith.constant 9.99999974E-6 : f32
    %247 = vector.broadcast %cst_110 : f32 to vector<32x1xf32>
    %248 = arith.addf %246, %247 : vector<32x1xf32>
    %249 = math.rsqrt %248 : vector<32x1xf32>
    %250 = vector.broadcast %249 : vector<32x1xf32> to vector<32x128xf32>
    %251 = arith.mulf %241, %250 : vector<32x128xf32>
    %252 = vector.broadcast %234 : vector<1x128xf32> to vector<32x128xf32>
    %253 = arith.mulf %251, %252 : vector<32x128xf32>
    %254 = vector.broadcast %235 : vector<1x128xf32> to vector<32x128xf32>
    %255 = arith.addf %253, %254 : vector<32x128xf32>
    %c0_111 = arith.constant 0 : index
    %c0_112 = arith.constant 0 : index
    %256 = vector.load %arg17[%c0_111, %c0_112] : memref<128x512xf32, #tpu.memory_space<vmem>>, vector<128x512xf32>
    %cst_113 = arith.constant dense<0.000000e+00> : vector<32x512xf32>
    %257 = tpu.matmul %255, %256, %cst_113 {dimension_numbers = #tpu.dot_dimension_numbers<[1], [0], [0], [1], [0, 0, 1, 1], [], []>} : vector<32x128xf32>, vector<128x512xf32>, vector<32x512xf32> -> vector<32x512xf32>
    %c0_114 = arith.constant 0 : index
    %c0_115 = arith.constant 0 : index
    %258 = vector.load %arg18[%c0_114, %c0_115] : memref<1x512xf32, #tpu.memory_space<vmem>>, vector<1x512xf32>
    %259 = vector.broadcast %258 : vector<1x512xf32> to vector<32x512xf32>
    %260 = arith.addf %257, %259 : vector<32x512xf32>
    %cst_116 = arith.constant 5.000000e-01 : f32
    %261 = vector.broadcast %cst_116 : f32 to vector<32x512xf32>
    %262 = arith.mulf %261, %260 : vector<32x512xf32>
    %cst_117 = arith.constant 0.707106769 : f32
    %263 = vector.broadcast %cst_117 : f32 to vector<32x512xf32>
    %264 = arith.mulf %260, %263 : vector<32x512xf32>
    %265 = math.absf %264 : vector<32x512xf32>
    %cst_118 = arith.constant 0.327591091 : f32
    %266 = vector.broadcast %cst_118 : f32 to vector<32x512xf32>
    %267 = arith.mulf %266, %265 : vector<32x512xf32>
    %cst_119 = arith.constant 1.000000e+00 : f32
    %268 = vector.broadcast %cst_119 : f32 to vector<32x512xf32>
    %269 = arith.addf %268, %267 : vector<32x512xf32>
    %270 = tpu.reciprocal %269 {approx = true} : vector<32x512xf32> -> vector<32x512xf32>
    %271 = arith.mulf %269, %270 : vector<32x512xf32>
    %cst_120 = arith.constant 2.000000e+00 : f32
    %272 = vector.broadcast %cst_120 : f32 to vector<32x512xf32>
    %273 = arith.subf %272, %271 : vector<32x512xf32>
    %274 = arith.mulf %270, %273 : vector<32x512xf32>
    %cst_121 = arith.constant 1.06140542 : f32
    %275 = vector.broadcast %cst_121 : f32 to vector<32x512xf32>
    %276 = arith.mulf %275, %274 : vector<32x512xf32>
    %cst_122 = arith.constant -1.45315206 : f32
    %277 = vector.broadcast %cst_122 : f32 to vector<32x512xf32>
    %278 = arith.addf %276, %277 : vector<32x512xf32>
    %279 = arith.mulf %278, %274 : vector<32x512xf32>
    %cst_123 = arith.constant 1.42141378 : f32
    %280 = vector.broadcast %cst_123 : f32 to vector<32x512xf32>
    %281 = arith.addf %279, %280 : vector<32x512xf32>
    %282 = arith.mulf %281, %274 : vector<32x512xf32>
    %cst_124 = arith.constant -0.284496725 : f32
    %283 = vector.broadcast %cst_124 : f32 to vector<32x512xf32>
    %284 = arith.addf %282, %283 : vector<32x512xf32>
    %285 = arith.mulf %284, %274 : vector<32x512xf32>
    %cst_125 = arith.constant 0.254829586 : f32
    %286 = vector.broadcast %cst_125 : f32 to vector<32x512xf32>
    %287 = arith.addf %285, %286 : vector<32x512xf32>
    %288 = arith.mulf %287, %274 : vector<32x512xf32>
    %cst_126 = arith.constant 0.000000e+00 : f32
    %289 = vector.broadcast %cst_126 : f32 to vector<32x512xf32>
    %290 = arith.subf %289, %265 : vector<32x512xf32>
    %291 = arith.mulf %290, %265 : vector<32x512xf32>
    %292 = math.exp %291 : vector<32x512xf32>
    %293 = arith.mulf %288, %292 : vector<32x512xf32>
    %cst_127 = arith.constant 1.000000e+00 : f32
    %294 = vector.broadcast %cst_127 : f32 to vector<32x512xf32>
    %295 = arith.subf %294, %293 : vector<32x512xf32>
    %cst_128 = arith.constant 0.000000e+00 : f32
    %296 = vector.broadcast %cst_128 : f32 to vector<32x512xf32>
    %297 = arith.cmpf oge, %264, %296 : vector<32x512xf32>
    %cst_129 = arith.constant 0.000000e+00 : f32
    %298 = vector.broadcast %cst_129 : f32 to vector<32x512xf32>
    %299 = arith.subf %298, %295 : vector<32x512xf32>
    %300 = arith.select %297, %295, %299 : vector<32x512xi1>, vector<32x512xf32>
    %cst_130 = arith.constant 1.000000e+00 : f32
    %301 = vector.broadcast %cst_130 : f32 to vector<32x512xf32>
    %302 = arith.addf %301, %300 : vector<32x512xf32>
    %303 = arith.mulf %262, %302 : vector<32x512xf32>
    %c0_131 = arith.constant 0 : index
    %c0_132 = arith.constant 0 : index
    %304 = vector.load %arg19[%c0_131, %c0_132] : memref<512x128xf32, #tpu.memory_space<vmem>>, vector<512x128xf32>
    %cst_133 = arith.constant dense<0.000000e+00> : vector<32x128xf32>
    %305 = tpu.matmul %303, %304, %cst_133 {dimension_numbers = #tpu.dot_dimension_numbers<[1], [0], [0], [1], [0, 0, 1, 1], [], []>} : vector<32x512xf32>, vector<512x128xf32>, vector<32x128xf32> -> vector<32x128xf32>
    %306 = arith.addf %233, %305 : vector<32x128xf32>
    %c0_134 = arith.constant 0 : index
    %c0_135 = arith.constant 0 : index
    %307 = vector.load %arg20[%c0_134, %c0_135] : memref<1x128xf32, #tpu.memory_space<vmem>>, vector<1x128xf32>
    %308 = vector.broadcast %307 : vector<1x128xf32> to vector<32x128xf32>
    %309 = arith.addf %306, %308 : vector<32x128xf32>
    %310 = vector.shape_cast %309 : vector<32x128xf32> to vector<4x8x128xf32>
    %c0_136 = arith.constant 0 : index
    %c0_137 = arith.constant 0 : index
    %c0_138 = arith.constant 0 : index
    %311 = vector.load %arg21[%c0_136, %c0_137, %c0_138] : memref<4x8x128xf32, #tpu.memory_space<vmem>>, vector<4x8x128xf32>
    tpu.vector_store %arg21[%c0_136, %c0_137, %c0_138], %310 {strides = array<i32>} : memref<4x8x128xf32, #tpu.memory_space<vmem>>, vector<4x8x128xf32>,
    return
  }
  func.func @transform_0(%arg0: i32) -> (i32, i32, i32) {
    %c0_i32 = arith.constant 0 : i32
    %c0_i32_0 = arith.constant 0 : i32
    %c0_i32_1 = arith.constant 0 : i32
    return %arg0, %c0_i32, %c0_i32_0 : i32, i32, i32
  }
  func.func @transform_1(%arg0: i32) -> (i32, i32, i32) {
    %c0_i32 = arith.constant 0 : i32
    %c0_i32_0 = arith.constant 0 : i32
    %c0_i32_1 = arith.constant 0 : i32
    return %arg0, %c0_i32, %c0_i32_0 : i32, i32, i32
  }
  func.func @transform_2(%arg0: i32) -> (i32, i32) {
    %c0_i32 = arith.constant 0 : i32
    %c0_i32_0 = arith.constant 0 : i32
    %c0_i32_1 = arith.constant 0 : i32
    return %c0_i32, %c0_i32_0 : i32, i32
  }
  func.func @transform_3(%arg0: i32) -> (i32, i32) {
    %c0_i32 = arith.constant 0 : i32
    %c0_i32_0 = arith.constant 0 : i32
    %c0_i32_1 = arith.constant 0 : i32
    return %c0_i32, %c0_i32_0 : i32, i32
  }
  func.func @transform_4(%arg0: i32) -> (i32, i32) {
    %c0_i32 = arith.constant 0 : i32
    %c0_i32_0 = arith.constant 0 : i32
    %c0_i32_1 = arith.constant 0 : i32
    return %c0_i32, %c0_i32_0 : i32, i32
  }
  func.func @transform_5(%arg0: i32) -> (i32, i32) {
    %c0_i32 = arith.constant 0 : i32
    %c0_i32_0 = arith.constant 0 : i32
    %c0_i32_1 = arith.constant 0 : i32
    return %c0_i32, %c0_i32_0 : i32, i32
  }
  func.func @transform_6(%arg0: i32) -> (i32, i32) {
    %c0_i32 = arith.constant 0 : i32
    %c0_i32_0 = arith.constant 0 : i32
    %c0_i32_1 = arith.constant 0 : i32
    return %c0_i32, %c0_i32_0 : i32, i32
  }
  func.func @transform_7(%arg0: i32) -> (i32, i32) {
    %c0_i32 = arith.constant 0 : i32
    %c0_i32_0 = arith.constant 0 : i32
    %c0_i32_1 = arith.constant 0 : i32
    return %c0_i32, %c0_i32_0 : i32, i32
  }
  func.func @transform_8(%arg0: i32) -> (i32, i32) {
    %c0_i32 = arith.constant 0 : i32
    %c0_i32_0 = arith.constant 0 : i32
    %c0_i32_1 = arith.constant 0 : i32
    return %c0_i32, %c0_i32_0 : i32, i32
  }
  func.func @transform_9(%arg0: i32) -> (i32, i32) {
    %c0_i32 = arith.constant 0 : i32
    %c0_i32_0 = arith.constant 0 : i32
    %c0_i32_1 = arith.constant 0 : i32
    return %c0_i32, %c0_i32_0 : i32, i32
  }
  func.func @transform_10(%arg0: i32) -> (i32, i32) {
    %c0_i32 = arith.constant 0 : i32
    %c0_i32_0 = arith.constant 0 : i32
    %c0_i32_1 = arith.constant 0 : i32
    return %c0_i32, %c0_i32_0 : i32, i32
  }
  func.func @transform_11(%arg0: i32) -> (i32, i32) {
    %c0_i32 = arith.constant 0 : i32
    %c0_i32_0 = arith.constant 0 : i32
    %c0_i32_1 = arith.constant 0 : i32
    return %c0_i32, %c0_i32_0 : i32, i32
  }
  func.func @transform_12(%arg0: i32) -> (i32, i32) {
    %c0_i32 = arith.constant 0 : i32
    %c0_i32_0 = arith.constant 0 : i32
    %c0_i32_1 = arith.constant 0 : i32
    return %c0_i32, %c0_i32_0 : i32, i32
  }
  func.func @transform_13(%arg0: i32) -> (i32, i32) {
    %c0_i32 = arith.constant 0 : i32
    %c0_i32_0 = arith.constant 0 : i32
    %c0_i32_1 = arith.constant 0 : i32
    return %c0_i32, %c0_i32_0 : i32, i32
  }
  func.func @transform_14(%arg0: i32) -> (i32, i32) {
    %c0_i32 = arith.constant 0 : i32
    %c0_i32_0 = arith.constant 0 : i32
    %c0_i32_1 = arith.constant 0 : i32
    return %c0_i32, %c0_i32_0 : i32, i32
  }
  func.func @transform_15(%arg0: i32) -> (i32, i32) {
    %c0_i32 = arith.constant 0 : i32
    %c0_i32_0 = arith.constant 0 : i32
    %c0_i32_1 = arith.constant 0 : i32
    return %c0_i32, %c0_i32_0 : i32, i32
  }
  func.func @transform_16(%arg0: i32) -> (i32, i32) {
    %c0_i32 = arith.constant 0 : i32
    %c0_i32_0 = arith.constant 0 : i32
    %c0_i32_1 = arith.constant 0 : i32
    return %c0_i32, %c0_i32_0 : i32, i32
  }
  func.func @transform_17(%arg0: i32) -> (i32, i32) {
    %c0_i32 = arith.constant 0 : i32
    %c0_i32_0 = arith.constant 0 : i32
    %c0_i32_1 = arith.constant 0 : i32
    return %c0_i32, %c0_i32_0 : i32, i32
  }
  func.func @transform_18(%arg0: i32) -> (i32, i32) {
    %c0_i32 = arith.constant 0 : i32
    %c0_i32_0 = arith.constant 0 : i32
    %c0_i32_1 = arith.constant 0 : i32
    return %c0_i32, %c0_i32_0 : i32, i32
  }
  func.func @transform_19(%arg0: i32) -> (i32, i32) {
    %c0_i32 = arith.constant 0 : i32
    %c0_i32_0 = arith.constant 0 : i32
    %c0_i32_1 = arith.constant 0 : i32
    return %c0_i32, %c0_i32_0 : i32, i32
  }
  func.func @transform_20(%arg0: i32) -> (i32, i32, i32) {
    %c0_i32 = arith.constant 0 : i32
    %c0_i32_0 = arith.constant 0 : i32
    %c0_i32_1 = arith.constant 0 : i32
    return %arg0, %c0_i32, %c0_i32_0 : i32, i32, i32
  }
}

</mosaic_0001>

<bundles_post_ra>
// kernel: tpu_custom_call.1
= control target key start
LH: loop header
LB: loop body
LE: loop exit
PB: predicated region body
PF: predicated region fallthrough
CT: control target
= control target key end

     0   :  { %s11734_s0 = inlined_call_operand.hbm [shape: f32[8,8,128], index: 0, kind: input, shape index: {}]   ;;  %s11735_s1 = inlined_call_operand.hbm [shape: f32[8,8,64], index: 1, kind: input, shape index: {}]   ;;  %s11736_s2 = inlined_call_operand.vmem [shape: f32[1,128], index: 2, kind: input, shape index: {}]   ;;  %s11737_s3 = inlined_call_operand.vmem [shape: f32[1,128], index: 3, kind: input, shape index: {}]   ;;  %s11738_s4 = inlined_call_operand.vmem [shape: f32[1,64], index: 4, kind: input, shape index: {}]   ;;  %s11739_s5 = inlined_call_operand.vmem [shape: f32[1,64], index: 5, kind: input, shape index: {}]   ;;  %s11740_s6 = inlined_call_operand.hbm [shape: f32[128,128], index: 6, kind: input, shape index: {}]   ;;  %s11741_s7 = inlined_call_operand.vmem [shape: f32[1,128], index: 7, kind: input, shape index: {}]   ;;  %s11742_s8 = inlined_call_operand.hbm [shape: f32[64,128], index: 8, kind: input, shape index: {}]   ;;  %s11743_s9 = inlined_call_operand.vmem [shape: f32[1,128], index: 9, kind: input, shape index: {}]   ;;  %s11744_s10 = inlined_call_operand.hbm [shape: f32[64,128], index: 10, kind: input, shape index: {}]   ;;  %s11745_s11 = inlined_call_operand.vmem [shape: f32[1,128], index: 11, kind: input, shape index: {}]   ;;  %s11746_s12 = inlined_call_operand.hbm [shape: f32[128,128], index: 12, kind: input, shape index: {}]   ;;  %s11747_s13 = inlined_call_operand.vmem [shape: f32[1,128], index: 13, kind: input, shape index: {}]   ;;  %s11748_s14 = inlined_call_operand.vmem [shape: f32[1,128], index: 14, kind: input, shape index: {}]   ;;  %s11749_s15 = inlined_call_operand.vmem [shape: f32[1,128], index: 15, kind: input, shape index: {}]   ;;  %s11750_s16 = inlined_call_operand.hbm [shape: f32[128,512], index: 16, kind: input, shape index: {}]   ;;  %s11751_s17 = inlined_call_operand.vmem [shape: f32[1,512], index: 17, kind: input, shape index: {}]   ;;  %s11752_s18 = inlined_call_operand.hbm [shape: f32[512,128], index: 18, kind: input, shape index: {}]   ;;  %s11753_s19 = inlined_call_operand.vmem [shape: f32[1,128], index: 19, kind: input, shape index: {}]   ;;  %s11754_s20 = inlined_call_operand.hbm [shape: f32[8,8,128], index: 20, kind: output, shape index: {}]  }
   0x1   :  { %11796 = sst [smem:[#allocation60_spill]] %s11734_s0 }
   0x2   :  { %11797 = sst [smem:[#allocation61_spill]] %s11735_s1 }
   0x3   :  { %11798 = sst [smem:[#allocation62_spill]] %s11736_s2 }
   0x4   :  { %11799 = sst [smem:[#allocation63_spill]] %s11737_s3 }
   0x5   :  { %11800 = sst [smem:[#allocation64_spill]] %s11738_s4 }
   0x6   :  { %11801 = sst [smem:[#allocation65_spill]] %s11740_s6 }
   0x7   :  { %11802 = sst [smem:[#allocation66_spill]] %s11742_s8 }
   0x8   :  { %11803 = sst [smem:[#allocation67_spill]] %s11744_s10 }
   0x9   :  { %11804 = sst [smem:[#allocation68_spill]] %s11745_s11 }
   0xa   :  { %11805 = sst [smem:[#allocation69_spill]] %s11746_s12 }
   0xb   :  { %11806 = sst [smem:[#allocation70_spill]] %s11747_s13 }
   0xc   :  { %11807 = sst [smem:[#allocation71_spill]] %s11748_s14 }
   0xd   :  { %11808 = sst [smem:[#allocation72_spill]] %s11749_s15 }
   0xe   :  { %11809 = sst [smem:[#allocation73_spill]] %s11750_s16 }
   0xf   :  { %11810 = sst [smem:[#allocation74_spill]] %s11751_s17 }
  0x10   :  { %11811 = sst [smem:[#allocation75_spill]] %s11752_s18 }
  0x11   :  { %11812 = sst [smem:[#allocation76_spill]] %s11753_s19 }
  0x12   :  { %11813 = sst [smem:[#allocation77_spill]] %s11754_s20 }
  0x13   :  { %25 = vsyncpa [#allocation4], 0 }
  0x14   :  { %27 = vsyncpa [#allocation4 + $0x1], 0 }
  0x15   :  { %28 = vsyncpa [#allocation7], 0 }
  0x16   :  { %30 = vsyncpa [#allocation7 + $0x1], 0 }
  0x17   :  { %31 = vsyncpa [#allocation10], 0 }
  0x18   :  { %32 = vsyncpa [#allocation13], 0 }
  0x19   :  { %33 = vsyncpa [#allocation16], 0 }
  0x1a   :  { %34 = vsyncpa [#allocation5], 0 }
  0x1b   :  { %36 = vsyncpa [#allocation5 + $0x1], 0  ;;  %s9996_s1 = smov 0   ;;  %s9998_s22 = smov 0  }
  0x1c   :  { %s10000_s23 = smov 0   ;;  %s10002_s24 = smov 0  }
  0x1d LB: > { %s9867_s2 = smov [#allocation8]   ;;  %s10017_s3 = sadd.s32 4294967295, %s9865_s24   ;;  %s9865_s24 = sphi %s10002_s24, %s11928_s24   ;;  %s9861_s23 = sphi %s10000_s23, %s11927_s23   ;;  %s9857_s22 = sphi %s9998_s22, %s11926_s22   ;;  %s9853_s1 = sphi %s9996_s1, %s11925_s1  }
  0x1e   : > { %s527_s25 = sshll.u32 %s9867_s2, 4  ;;  %p8097_p0 = scmp.ge.s32.totalorder %s9865_s24, 1  ;;  %s10022_s25 = int_to_ptr.vmem [resolvable:$true] %s527_s25 }
  0x1f   : > { %p11758_p1 = scmp.eq.s32.totalorder %s10017_s3, 0  ;;  %p503_p2 = scmp.lt.s32.totalorder %s9865_s24, 3 }
  0x20   : > { %s9868_s27 = smov [#allocation9]   ;;  %s9869_s29 = smov [#allocation12]  }
  0x21   : > { %p10024_p3 = pnand %p8097_p0, %p503_p2  ;;  %s543_s28 = sshll.u32 %s9868_s27, 4  ;;  %s10037_s28 = int_to_ptr.vmem [resolvable:$true] %s543_s28 }
  0x22   : > { %s575_s30 = sshll.u32 %s9869_s29, 4  ;;  %s11816_s6 = sld [smem:[#allocation65_spill]]  ;;  %s10039_s30 = int_to_ptr.vmem [resolvable:$true] %s575_s30 }
  0x23   : > { %s11814_s26 = scalar_select %p10024_p3, 1, 0 }
  0x24   : > { %p9234_p5 = pneg %p10024_p3 }
  0x26   : > { %p10033_p6 = pnand %p9234_p5, %p11758_p1 }
  0x28   : > { %s9551_s2 = scalar_lea.hbm %s11816_s6, 2048  ;;  %p10049_p8 = pneg %p10033_p6 }
  0x29   : > { %p9552_p7 = scmp.ne.s32.totalorder %s11816_s6, %s9551_s2  ;;  %p9558_p11 = scmp.lt.u32.totalorder %s9551_s2, %s11816_s6 }
  0x2b   : > { %p9554_p9 = pnand %p10049_p8, %p9552_p7 }
  0x2d   : > { %p9555_p10 = pneg %p9554_p9 }
  0x2f   : > { %p9560_p12 = pnand %p9558_p11, %p9555_p10 }
  0x31   : > { %9563 = shalt.err (!%p9560_p12)
}
  0x32   : > { %s9564_s19 = scalar_lea.vmem %s10022_s25, 2048  ;;  %p9572_p5 = scmp.lt.s32.totalorder %s10022_s25, %s10022_s25 }
  0x33   : > { %p9565_p13 = scmp.ne.s32.totalorder %s10022_s25, %s9564_s19  ;;  %p9573_p4 = scmp.lt.s32.totalorder %s9564_s19, %s9564_s19 }
  0x35   : > { %p9567_p0 = pnand %p9565_p13, %p10049_p8  ;;  %p9574_p7 = por %p9573_p4, %p9572_p5 }
  0x37   : > { %p9568_p2 = pneg %p9567_p0 }
  0x39   : > { %p9575_p9 = pnand %p9574_p7, %p9568_p2 }
  0x3b   : > { %9578 = shalt.err (!%p9575_p9)
}
  0x3c   : > { %s11760_s20 = smov 128   ;;  %s11762_s17 = smov 8  }
  0x3d   : > { %9237 = dma.hbm_to_vmem [thread:$0]  (!%p10033_p6), %s11816_s6, 2048, %s10022_s25, [#allocation7], %s11760_s20, %s11760_s20, %s11762_s17  }
  0x3e   : > { %s11818_s8 = sld [smem:[#allocation66_spill]] }
  0x44   : > { %s9579_s19 = scalar_lea.hbm %s11818_s8, 1024 }
  0x45   : > { %p9580_p4 = scmp.ne.s32.totalorder %s11818_s8, %s9579_s19  ;;  %p9586_p12 = scmp.lt.u32.totalorder %s9579_s19, %s11818_s8 }
  0x47   : > { %p9582_p10 = pnand %p9580_p4, %p10049_p8 }
  0x49   : > { %p9583_p11 = pneg %p9582_p10 }
  0x4b   : > { %p9588_p13 = pnand %p9586_p12, %p9583_p11 }
  0x4d   : > { %9591 = shalt.err (!%p9588_p13)
}
  0x4e   : > { %s9592_s25 = scalar_lea.vmem %s10037_s28, 1024  ;;  %p9600_p7 = scmp.lt.s32.totalorder %s10037_s28, %s10037_s28 }
  0x4f   : > { %p9593_p0 = scmp.ne.s32.totalorder %s10037_s28, %s9592_s25  ;;  %p9601_p9 = scmp.lt.s32.totalorder %s9592_s25, %s9592_s25 }
  0x51   : > { %p9595_p2 = pnand %p9593_p0, %p10049_p8  ;;  %p9602_p4 = por %p9601_p9, %p9600_p7 }
  0x53   : > { %p9596_p5 = pneg %p9595_p2 }
  0x55   : > { %p9603_p10 = pnand %p9602_p4, %p9596_p5 }
  0x57   : > { %9606 = shalt.err (!%p9603_p10)
}
  0x58   : > { %9240 = dma.hbm_to_vmem [thread:$0]  (!%p10033_p6), %s11818_s8, 1024, %s10037_s28, [#allocation10], %s11760_s20, %s11760_s20, %s11762_s17  }
  0x59   : > { %s11819_s12 = sld [smem:[#allocation69_spill]] }
  0x5f   : > { %s9607_s0 = scalar_lea.hbm %s11819_s12, 2048 }
  0x60   : > { %p9608_p11 = scmp.ne.s32.totalorder %s11819_s12, %s9607_s0  ;;  %p9614_p0 = scmp.lt.u32.totalorder %s9607_s0, %s11819_s12 }
  0x62   : > { %p9610_p12 = pnand %p9608_p11, %p10049_p8 }
  0x64   : > { %p9611_p13 = pneg %p9610_p12 }
  0x66   : > { %p9616_p2 = pnand %p9614_p0, %p9611_p13 }
  0x68   : > { %9619 = shalt.err (!%p9616_p2)
}
  0x69   : > { %s9620_s28 = scalar_lea.vmem %s10039_s30, 2048  ;;  %p9628_p4 = scmp.lt.s32.totalorder %s10039_s30, %s10039_s30 }
  0x6a   : > { %p9621_p5 = scmp.ne.s32.totalorder %s10039_s30, %s9620_s28  ;;  %p9629_p10 = scmp.lt.s32.totalorder %s9620_s28, %s9620_s28 }
  0x6c   : > { %p9623_p7 = pnand %p9621_p5, %p10049_p8  ;;  %p9630_p11 = por %p9629_p10, %p9628_p4 }
  0x6e   : > { %p9624_p9 = pneg %p9623_p7 }
  0x70   : > { %p9631_p12 = pnand %p9630_p11, %p9624_p9 }
  0x72   : > { %9634 = shalt.err (!%p9631_p12)
}
  0x73   : > { %9246 = dma.hbm_to_vmem [thread:$0]  (!%p10033_p6), %s11819_s12, 2048, %s10039_s30, [#allocation13], %s11760_s20, %s11760_s20, %s11762_s17  }
  0x74   : > { %s9872_s13 = smov [#allocation11]   ;;  %s9873_s15 = smov [#allocation14]  }
  0x75   : > { %s559_s14 = sshll.u32 %s9872_s13, 4  ;;  %s597_s0 = sshll.u32 %s9873_s15, 4  ;;  %s560_s14 = int_to_ptr.vmem [resolvable:$true] %s559_s14  ;;  %s598_s0 = int_to_ptr.vmem [resolvable:$true] %s597_s0 }
  0x76   : > { %s11820_s10 = sld [smem:[#allocation67_spill]] }
  0x7c   : > { %s9635_s29 = scalar_lea.hbm %s11820_s10, 1024 }
  0x7d   : > { %p9636_p13 = scmp.ne.s32.totalorder %s11820_s10, %s9635_s29  ;;  %p9642_p5 = scmp.lt.u32.totalorder %s9635_s29, %s11820_s10 }
  0x7f   : > { %p9638_p0 = pnand %p9636_p13, %p10049_p8 }
  0x81   : > { %p9639_p2 = pneg %p9638_p0 }
  0x83   : > { %p9644_p7 = pnand %p9642_p5, %p9639_p2 }
  0x85   : > { %9647 = shalt.err (!%p9644_p7)
}
  0x86   : > { %s9648_s30 = scalar_lea.vmem %s560_s14, 1024  ;;  %p9656_p11 = scmp.lt.s32.totalorder %s560_s14, %s560_s14 }
  0x87   : > { %p9649_p9 = scmp.ne.s32.totalorder %s560_s14, %s9648_s30  ;;  %p9657_p12 = scmp.lt.s32.totalorder %s9648_s30, %s9648_s30 }
  0x89   : > { %p9651_p4 = pnand %p9649_p9, %p10049_p8  ;;  %p9658_p1 = por %p9657_p12, %p9656_p11 }
  0x8b   : > { %p9652_p10 = pneg %p9651_p4 }
  0x8d   : > { %p9659_p3 = pnand %p9658_p1, %p9652_p10 }
  0x8f   : > { %9662 = shalt.err (!%p9659_p3)
}
  0x90   : > { %9243 = dma.hbm_to_vmem [thread:$0]  (!%p10033_p6), %s11820_s10, 1024, %s560_s14, [#allocation10], %s11760_s20, %s11760_s20, %s11762_s17  }
  0x91   : > { %s11821_s16 = sld [smem:[#allocation73_spill]] }
  0x97   : > { %s9663_s21 = scalar_lea.hbm %s11821_s16, 8192 }
  0x98   : > { %p9664_p1 = scmp.ne.s32.totalorder %s11821_s16, %s9663_s21  ;;  %p9670_p0 = scmp.lt.u32.totalorder %s9663_s21, %s11821_s16 }
  0x9a   : > { %p9666_p3 = pnand %p9664_p1, %p10049_p8 }
  0x9c   : > { %p9667_p13 = pneg %p9666_p3 }
  0x9e   : > { %p9672_p2 = pnand %p9670_p0, %p9667_p13 }
  0xa0   : > { %9675 = shalt.err (!%p9672_p2)
}
  0xa1   : > { %s9676_s25 = scalar_lea.vmem %s598_s0, 8192  ;;  %p9684_p4 = scmp.lt.s32.totalorder %s598_s0, %s598_s0 }
  0xa2   : > { %p9677_p5 = scmp.ne.s32.totalorder %s598_s0, %s9676_s25  ;;  %p9685_p10 = scmp.lt.s32.totalorder %s9676_s25, %s9676_s25 }
  0xa4   : > { %p9679_p7 = pnand %p9677_p5, %p10049_p8  ;;  %p9686_p11 = por %p9685_p10, %p9684_p4 }
  0xa6   : > { %p9680_p9 = pneg %p9679_p7 }
  0xa8   : > { %p9687_p12 = pnand %p9686_p11, %p9680_p9 }
  0xaa   : > { %9690 = shalt.err (!%p9687_p12)
}
  0xab   : > { %s9874_s14 = smov 512   ;;  %s9875_s30 = smov 32  }
  0xac   : > { %9249 = dma.hbm_to_vmem [thread:$0]  (!%p10033_p6), %s11821_s16, 8192, %s598_s0, [#allocation13], %s9874_s14, %s9874_s14, %s9875_s30  }
  0xad   : > { %s9876_s13 = smov [#allocation15]   ;;  %s11822_s18 = sld [smem:[#allocation75_spill]] }
  0xae   : > { %s613_s15 = sshll.u32 %s9876_s13, 4  ;;  %s614_s15 = int_to_ptr.vmem [resolvable:$true] %s613_s15 }
  0xb3   : > { %s9691_s29 = scalar_lea.hbm %s11822_s18, 8192 }
  0xb4   : > { %p9692_p1 = scmp.ne.s32.totalorder %s11822_s18, %s9691_s29  ;;  %p9698_p0 = scmp.lt.u32.totalorder %s9691_s29, %s11822_s18 }
  0xb6   : > { %p9694_p3 = pnand %p9692_p1, %p10049_p8 }
  0xb8   : > { %p9695_p13 = pneg %p9694_p3 }
  0xba   : > { %p9700_p2 = pnand %p9698_p0, %p9695_p13 }
  0xbc   : > { %9703 = shalt.err (!%p9700_p2)
}
  0xbd   : > { %s9704_s0 = scalar_lea.vmem %s614_s15, 8192  ;;  %p9712_p4 = scmp.lt.s32.totalorder %s614_s15, %s614_s15 }
  0xbe   : > { %p9705_p5 = scmp.ne.s32.totalorder %s614_s15, %s9704_s0  ;;  %p9713_p10 = scmp.lt.s32.totalorder %s9704_s0, %s9704_s0 }
  0xc0   : > { %p9707_p7 = pnand %p9705_p5, %p10049_p8  ;;  %p9714_p11 = por %p9713_p10, %p9712_p4 }
  0xc2   : > { %p9708_p9 = pneg %p9707_p7 }
  0xc4   : > { %p9715_p12 = pnand %p9714_p11, %p9708_p9 }
  0xc6   : > { %9718 = shalt.err (!%p9715_p12)
}
  0xc7   : > { %s11823_s14 = smov 128   ;;  %s8096_s4 = sadd.s32 4294967294, %s9865_s24  }
  0xc8   : > { %9252 = dma.hbm_to_vmem [thread:$0]  (!%p10033_p6), %s11822_s18, 8192, %s614_s15, [#allocation16], %s11823_s14, %s11823_s14, %s11762_s17  }
  0xc9   : > { %s10187_s27 = sadd.s32 1, %s9865_s24   ;;  %s49_s11 = sadd.s32 1, %s9861_s23 }
  0xca   : > { %s46_s6 = ssub.s32 %s9865_s24, %s10187_s27  ;;  %p56_p1 = scmp.ne.s32.totalorder %s9861_s23, %s9857_s22 }
  0xcb   : > { %p47_p8 = scmp.eq.s32.totalorder %s46_s6, 0  ;;  %p57_p3 = scmp.eq.s32.totalorder %s9865_s24, 0 }
  0xcc   : > { %p62_p13 = scmp.ne.s32.totalorder %s9857_s22, %s9853_s1  ;;  %p11826_p2 = scmp.eq.s32.totalorder %s10017_s3, 0 }
  0xcd   : > { %s10198_s13 = scalar_select %p47_p8, %s9861_s23, %s49_s11  }
  0xce   : > { %p10200_p0 = por %p57_p3, %p56_p1  ;;  %p10206_p6 = por %p11826_p2, %p62_p13 }
  0xcf   : > { %11824 = sst [smem:[#allocation25_spill]] %s10198_s13  ;;  %p490_p5 = scmp.eq.s32.totalorder %s10017_s3, 1 }
  0xd0   : > { %p496_p7 = scmp.eq.s32.totalorder %s8096_s4, 1  ;;  %p9270_p9 = scmp.lt.s32.totalorder %s9865_s24, 2 }
  0xd1   : > { %s630_s2 = sand.u32 1, %s9861_s23   ;;  %p10213_p4 = por %p490_p5, %p56_p1 }
  0xd2   : > { %p10217_p10 = por %p496_p7, %p62_p13  ;;  %s8105_s28 = sshll.u32 %s630_s2, 5 }
  0xd3   : > { %s11828_s29 = scalar_select %p10213_p4, 1, 0 }
  0xd4   : > { %s11829_s19 = scalar_select %p10217_p10, 1, 0 }
  0xd5   : > { %s8241_s25 = sshll.u32 %s9865_s24, 9  ;;  %s11830_s30 = sld [smem:[#allocation60_spill]] }
  0xd6   : > { %s634_s4 = scalar_lea.vmem [#allocation3], %s8105_s28  ;;  %p10231_p11 = pnand %p9270_p9, %p10200_p0 }
  0xd7   : > { %s641_s11 = sshll.u32 %s634_s4, 4  ;;  %s11832_s12 = sld [smem:[#allocation61_spill]]  ;;  %s10227_s11 = int_to_ptr.vmem [resolvable:$true] %s641_s11 }
  0xd8   : > { %s655_s20 = scalar_lea.vmem [#allocation6], %s8105_s28  ;;  %s10242_s18 = scalar_lea.sflag [#allocation4], %s630_s2 }
  0xd9   : > { %s10240_s16 = sshll.u32 %s655_s20, 4  ;;  %p9721_p8 = pneg %p10231_p11  ;;  %s10274_s16 = int_to_ptr.vmem [resolvable:$true] %s10240_s16 }
  0xdb   : > { %s10225_s6 = scalar_lea.hbm %s11830_s30, %s8241_s25  ;;  %s9724_s8 = scalar_lea.hbm %s11830_s30, 1024 }
  0xdc   : > { %s9719_s4 = scalar_lea.hbm %s10225_s6, 512  ;;  %p9725_p13 = scmp.lt.u32.totalorder %s10225_s6, %s11830_s30 }
  0xdd   : > { %s10238_s0 = scalar_lea.hbm %s11832_s12, %s8241_s25  ;;  %p9720_p12 = scmp.ne.s32.totalorder %s10225_s6, %s9719_s4 }
  0xde   : > { %p9726_p0 = scmp.lt.u32.totalorder %s9724_s8, %s9719_s4  ;;  %p9728_p5 = scmp.lt.u32.totalorder %s9719_s4, %s10225_s6 }
  0xdf   : > { %p9722_p1 = pnand %p9721_p8, %p9720_p12 }
  0xe0   : > { %p9727_p2 = por %p9726_p0, %p9725_p13 }
  0xe1   : > { %p9723_p3 = pneg %p9722_p1 }
  0xe2   : > { %p9729_p7 = por %p9728_p5, %p9727_p2 }
  0xe4   : > { %p9730_p9 = pnand %p9729_p7, %p9723_p3 }
  0xe6   : > { %9733 = shalt.err (!%p9730_p9)
}
  0xe7   : > { %s9734_s2 = scalar_lea.vmem %s10227_s11, 512  ;;  %s9877_s13 = smov [#allocation3]  }
  0xe8   : > { %p9735_p12 = scmp.ne.s32.totalorder %s10227_s11, %s9734_s2  ;;  %s9739_s28 = sshll.u32 %s9877_s13, 4  ;;  %s9740_s28 = int_to_ptr.vmem [resolvable:$false] %s9739_s28 }
  0xe9   : > { %s9741_s20 = scalar_lea.vmem %s9740_s28, 1024  ;;  %p9742_p4 = scmp.lt.s32.totalorder %s10227_s11, %s9740_s28 }
  0xea   : > { %p9737_p1 = pnand %p9735_p12, %p9721_p8  ;;  %p9743_p13 = scmp.lt.s32.totalorder %s9741_s20, %s9734_s2 }
  0xec   : > { %p9738_p10 = pneg %p9737_p1  ;;  %p9744_p0 = por %p9743_p13, %p9742_p4 }
  0xee   : > { %p9745_p2 = pnand %p9744_p0, %p9738_p10 }
  0xf0   : > { %9748 = shalt.err (!%p9745_p2)
}
  0xf1   : > { %s11833_s4 = smov 8   ;;  %s651_s21 = sand.u32 1, %s9865_s24  }
  0xf2   : > { %9256 = dma.hbm_to_vmem [thread:$0]  (!%p10231_p11), %s10225_s6, 512, %s10227_s11, %s10242_s18, %s11823_s14, %s11823_s14, %s11833_s4  }
  0xf3   : > { %s10277_s8 = scalar_lea.sflag [#allocation7], %s651_s21  ;;  %s9749_s10 = scalar_lea.hbm %s10238_s0, 512 }
  0xf4   : > { %p9750_p4 = scmp.ne.s32.totalorder %s10238_s0, %s9749_s10  ;;  %s9754_s13 = scalar_lea.hbm %s11832_s12, 1024 }
  0xf5   : > { %p9755_p5 = scmp.lt.u32.totalorder %s10238_s0, %s11832_s12  ;;  %p9756_p7 = scmp.lt.u32.totalorder %s9754_s13, %s9749_s10 }
  0xf6   : > { %p9752_p10 = pnand %p9750_p4, %p9721_p8  ;;  %p9758_p12 = scmp.lt.u32.totalorder %s9749_s10, %s10238_s0 }
  0xf7   : > { %p9757_p9 = por %p9756_p7, %p9755_p5 }
  0xf8   : > { %p9753_p3 = pneg %p9752_p10 }
  0xf9   : > { %p9759_p1 = por %p9758_p12, %p9757_p9 }
  0xfb   : > { %p9760_p13 = pnand %p9759_p1, %p9753_p3 }
  0xfd   : > { %9763 = shalt.err (!%p9760_p13)
}
  0xfe   : > { %s9764_s18 = scalar_lea.vmem %s10274_s16, 512  ;;  %s9878_s6 = smov [#allocation6]  }
  0xff   : > { %p9765_p0 = scmp.ne.s32.totalorder %s10274_s16, %s9764_s18  ;;  %s9769_s11 = sshll.u32 %s9878_s6, 4  ;;  %s9770_s11 = int_to_ptr.vmem [resolvable:$false] %s9769_s11 }
 0x100   : > { %s9771_s21 = scalar_lea.vmem %s9770_s11, 1024  ;;  %p9772_p10 = scmp.lt.s32.totalorder %s10274_s16, %s9770_s11 }
 0x101   : > { %p9767_p2 = pnand %p9765_p0, %p9721_p8  ;;  %p9773_p5 = scmp.lt.s32.totalorder %s9771_s21, %s9764_s18 }
 0x103   : > { %p9768_p4 = pneg %p9767_p2  ;;  %p9774_p7 = por %p9773_p5, %p9772_p10 }
 0x105   : > { %p9775_p9 = pnand %p9774_p7, %p9768_p4 }
 0x107   : > { %9778 = shalt.err (!%p9775_p9)
}
 0x108   : > { %9259 = dma.hbm_to_vmem [thread:$0]  (!%p10231_p11), %s10238_s0, 512, %s10274_s16, %s10277_s8, %s11823_s14, %s11823_s14, %s11833_s4  }
 0x109   : > { %p11834_p8 = scmp.ne.s32.totalorder %s11814_s26, 0 }
 0x10b   : > { %674 = sbr.rel (%p11834_p8) target bundleno = 6878 (0x1ade), region = 100 }
 0x112   : > { %s10309_s10 = sand.u32 1, %s9857_s22  }
 0x113   : > { %s10312_s25 = sshll.u32 %s10309_s10, 5  ;;  %s677_s17 = scalar_lea.sflag [#allocation4], %s10309_s10 }
 0x114   : > { %s10316_s2 = scalar_lea.vmem [#allocation3], %s10312_s25 }
 0x115   : > { %9824 = dma.done.wait (%p10206_p6), %s677_s17, 512  }
 0x116   : > { %9826 = vsyncadd (%p10206_p6), %s677_s17, 4294966784  ;;  %s685_s16 = sand.u32 1, %s10017_s3   ;;  %s689_s14 = scalar_lea.vmem [#allocation6], %s10312_s25 }
 0x117   : > { %s686_s26 = scalar_lea.sflag [#allocation7], %s685_s16 }
 0x118   : > { %9828 = dma.done.wait (%p10206_p6), %s686_s26, 512  }
 0x119   : > { %9830 = vsyncadd (%p10206_p6), %s686_s26, 4294966784  ;;  %p11835_p11 = scmp.eq.s32.totalorder %s10017_s3, 0 }
 0x11b   : > { %9832 = dma.done.wait (%p11835_p11), [#allocation7], 2048   ;;  %p11836_p3 = pmov %p11835_p11 }
 0x11d   : > { %9834 = vsyncadd (%p11836_p3), [#allocation7], 4294965248  ;;  %p11837_p12 = pmov %p11836_p3 }
 0x11e   : > { %p11838_p1 = pmov %p11836_p3 }
 0x11f   : > { %9836 = dma.done.wait (%p11837_p12), [#allocation10], 2048  }
 0x120   : > { %9838 = vsyncadd (%p11838_p1), [#allocation10], 4294965248  ;;  %p11839_p13 = pmov %p11838_p1 }
 0x121   : > { %p11840_p0 = pmov %p11838_p1 }
 0x122   : > { %9840 = dma.done.wait (%p11839_p13), [#allocation13], 10240  }
 0x123   : > { %9842 = vsyncadd (%p11840_p0), [#allocation13], 4294957056  ;;  %p11841_p6 = pmov %p11840_p0 }
 0x124   : > { %p11842_p2 = pmov %p11840_p0 }
 0x125   : > { %9844 = dma.done.wait (%p11841_p6), [#allocation16], 8192  }
 0x126   : > { %9846 = vsyncadd (%p11842_p2), [#allocation16], 4294959104  ;;  %vm855_vm0 = vcmask 523264   ;;  %v782_v0 = vld [vmem:[%s689_s14] sm:$0xff]  ;;  %v783_v1 = vld [vmem:[%s689_s14 + $0x8] sm:$0xff]  ;;  %s11843_s4 = sld [smem:[#allocation64_spill]] }
 0x127   : > { %v778_v2 = vld [vmem:[%s10316_s2] sm:$0xff]  ;;  %v856_v3 = vsel %vm855_vm0, %v782_v0, 0.0  ;;  %v779_v4 = vld [vmem:[%s10316_s2 + $0x8] sm:$0xff]  ;;  %v859_v5 = vsel %vm855_vm0, %v783_v1, 0.0  ;;  %v785_v6 = vld [vmem:[%s689_s14 + $0x18] sm:$0xff]  ;;  %s11844_s18 = sld [smem:[#allocation62_spill]] }
 0x128   : > { %788 = vadd.xlane.f32.xlu1 %v778_v2  ;;  %857 = vadd.xlane.f32.xlu0 %v856_v3  ;;  %v784_v7 = vld [vmem:[%s689_s14 + $0x10] sm:$0xff]  ;;  %v865_v8 = vsel %vm855_vm0, %v785_v6, 0.0  ;;  %v781_v10 = vld [vmem:[%s10316_s2 + $0x18] sm:$0xff]  ;;  %v929_v12 = vld [vmem:[#allocation8] sm:$0xff]  ;;  %s11845_s21 = sld [smem:[#allocation63_spill]]  ;;  %vm9880_vm1 = vmmov 0  }
 0x129   : > { %v862_v9 = vsel %vm855_vm0, %v784_v7, 0.0  ;;  %v780_v11 = vld [vmem:[%s10316_s2 + $0x10] sm:$0xff]  ;;  %v930_v13 = vld [vmem:[#allocation8 + $0x8] sm:$0xff]  ;;  %v932_v52 = vld [vmem:[#allocation8 + $0x18] sm:$0xff]  ;;  %vm1249_vm2 = vcmask 130048   ;;  %vm1554_vm3 = vcmask 64512  }
 0x12a   : > { %v8964_v14 = vpack.c.bf16 %v930_v13, %v929_v12  ;;  %v931_v51 = vld [vmem:[#allocation8 + $0x10] sm:$0xff]  ;;  %v933_v54 = vld [vmem:[#allocation8 + $0x20] sm:$0xff]  ;;  %v934_v55 = vld [vmem:[#allocation8 + $0x28] sm:$0xff]  ;;  %s9881_s8 = smov 112   ;;  %s9882_s13 = smov 96   ;;  %vm2599_vm4 = vcmask 261248  }
 0x12b   : > { %v8968_v53 = vpack.c.bf16 %v932_v52, %v931_v51  ;;  %v8972_v56 = vpack.c.bf16 %v934_v55, %v933_v54  ;;  %v1037_v57 = vld [vmem:[#allocation9] sm:$0xff]  ;;  %v1038_v58 = vld [vmem:[#allocation9 + $0x8] sm:$0xff]  ;;  %v935_v60 = vld [vmem:[#allocation8 + $0x30] sm:$0xff]  ;;  %s9883_s28 = smov 80   ;;  %s9884_s20 = smov 64   ;;  %vm3292_vm5 = vcmask 392448  }
 0x12c   : > { %790 = vadd.xlane.f32.xlu1 %v779_v4  ;;  %860 = vadd.xlane.f32.xlu0 %v859_v5  ;;  %v8996_v59 = vpack.c.bf16 %v1038_v58, %v1037_v57  ;;  %v936_v61 = vld [vmem:[#allocation8 + $0x38] sm:$0xff]  ;;  %v1039_v63 = vld [vmem:[#allocation9 + $0x10] sm:$0xff]  ;;  %v938_v3 = vld [vmem:[#allocation8 + $0x48] sm:$0xff]  ;;  %s9886_s6 = smov 32   ;;  %s9887_s11 = smov 16   ;;  %vm3985_vm6 = vcmask 523648  }
 0x12d   : > { %8965 = vmatprep.subr.bf16.mxu0 %v8964_v14  ;;  %v8976_v62 = vpack.c.bf16 %v936_v61, %v935_v60  ;;  %v1041_v5 = vld [vmem:[#allocation9 + $0x20] sm:$0xff]  ;;  %v1044_v12 = vld [vmem:[#allocation9 + $0x38] sm:$0xff]  ;;  %vm4678_vm7 = vcmask 654848   ;;  %vm5371_vm8 = vcmask 786048   ;;  %vm6064_vm9 = vcmask 917248   ;;  %s11847_s16 = sld [smem:[#allocation70_spill]] }
 0x12e   : > { %8967 = vmatpush3.bf16.msra.mxu0 %v8964_v14  ;;  %8997 = vmatprep.subr.bf16.mxu1 %v8996_v59  ;;  %v941_v14 = vld [vmem:[#allocation8 + $0x60] sm:$0xff]  ;;  %vm6757_vm10 = vcmask 1048448   ;;  %s11852_s14 = sld [smem:[#allocation71_spill]]  ;;  %p11921_p10 = scmp.ne.s32.totalorder %s11828_s29, 0 }
 0x12f   : > { %8969 = vmatprep.subr.bf16.mxu0 %v8968_v53  ;;  %8999 = vmatpush3.bf16.msra.mxu1 %v8996_v59  ;;  %v8124_v57 = vld [vmem:[%s11739_s5] ss:$0 sm:$0xff] }
 0x130   : > { %866 = vadd.xlane.f32.xlu1 %v865_v8  ;;  %863 = vadd.xlane.f32.xlu0 %v862_v9  ;;  %v939_v8 = vld [vmem:[#allocation8 + $0x50] sm:$0xff]  ;;  %v940_v9 = vld [vmem:[#allocation8 + $0x58] sm:$0xff]  ;;  %v8121_v61 = vld [vmem:[%s11844_s18] ss:$0 sm:$0xff]  ;;  %s9885_s18 = smov 48  }
 0x132   : > { %8971 = vmatpush3.bf16.msra.mxu0 %v8968_v53  ;;  %v8123_v53 = vld [vmem:[%s11843_s4] ss:$0 sm:$0xff]  ;;  %s11846_s4 = sld [smem:[#allocation68_spill]] }
 0x133   : > { %8973 = vmatprep.subr.bf16.mxu0 %v8972_v56 }
 0x134   : > { %794 = vadd.xlane.f32.xlu1 %v781_v10  ;;  %792 = vadd.xlane.f32.xlu0 %v780_v11 }
 0x136   : > { %8975 = vmatpush3.bf16.msra.mxu0 %v8972_v56 }
 0x137   : > { %8977 = vmatprep.subr.bf16.mxu0 %v8976_v62 }
 0x13a   : > { %8979 = vmatpush3.bf16.msra.mxu0 %v8976_v62 }
 0x1b5   : > { %v789_v15 = vpop.xlane.xlu1 %788  ;;  %v858_v16 = vpop.xlane.xlu0 %857 }
 0x1b6   : > { %v797_v17 = vmul.f32 0.0078125, %v789_v15  ;;  %v869_v18 = vmul.f32 0.015625, %v858_v16  ;;  %v942_v15 = vld [vmem:[#allocation8 + $0x68] sm:$0xff] }
 0x1b7   : > { %v8988_v16 = vpack.c.bf16 %v942_v15, %v941_v14  ;;  %v1154_v14 = vld [vmem:[#allocation11 + $0x28] sm:$0xff] }
 0x1b8   : > { %v10352_v19 = vsub.f32 %v782_v0, %v869_v18  ;;  %v10354_v23 = vsub.f32 %v778_v2, %v797_v17  ;;  %v1040_v0 = vld [vmem:[#allocation9 + $0x18] sm:$0xff]  ;;  %v937_v2 = vld [vmem:[#allocation8 + $0x40] sm:$0xff]  ;;  %v1150_v18 = vld [vmem:[#allocation11 + $0x8] sm:$0xff] }
 0x1b9   : > { %v791_v20 = vpop.xlane.xlu1 %790  ;;  %v861_v21 = vpop.xlane.xlu0 %860  ;;  %v1149_v17 = vld [vmem:[#allocation11] sm:$0xff] }
 0x1ba   : > { %v798_v22 = vmul.f32 0.0078125, %v791_v20  ;;  %v870_v24 = vmul.f32 0.015625, %v861_v21  ;;  %v877_v25 = vmul.f32 %v10352_v19, %v10352_v19  ;;  %v805_v30 = vmul.f32 %v10354_v23, %v10354_v23  ;;  %v943_v20 = vld [vmem:[#allocation8 + $0x70] sm:$0xff] }
 0x1bb   : > { %v10388_v21 = vpack.c.bf16 %v1150_v18, %v1149_v17 }
 0x1bc   : > { %v10358_v26 = vsub.f32 %v783_v1, %v870_v24  ;;  %v881_v27 = vsel %vm855_vm0, %v877_v25, 0.0  ;;  %v10363_v32 = vsub.f32 %v779_v4, %v798_v22  ;;  %v9000_v1 = vpack.c.bf16 %v1040_v0, %v1039_v63  ;;  %v944_v22 = vld [vmem:[#allocation8 + $0x78] sm:$0xff] }
 0x1bd   : > { %v867_v28 = vpop.xlane.xlu1 %866  ;;  %v864_v29 = vpop.xlane.xlu0 %863  ;;  %882 = vadd.xlane.f32.xlu0 %v881_v27  ;;  %v8980_v4 = vpack.c.bf16 %v938_v3, %v937_v2  ;;  %v8992_v24 = vpack.c.bf16 %v944_v22, %v943_v20  ;;  %v1151_v3 = vld [vmem:[#allocation11 + $0x10] sm:$0xff] }
 0x1be   : > { %v872_v31 = vmul.f32 0.015625, %v867_v28  ;;  %v871_v33 = vmul.f32 0.015625, %v864_v29  ;;  %v878_v34 = vmul.f32 %v10358_v26, %v10358_v26  ;;  %v806_v40 = vmul.f32 %v10363_v32, %v10363_v32  ;;  %9001 = vmatprep.subr.bf16.mxu1 %v9000_v1 }
 0x1bf   : > { %8981 = vmatprep.subr.bf16.mxu0 %v8980_v4  ;;  %9003 = vmatpush3.bf16.msra.mxu1 %v9000_v1 }
 0x1c0   : > { %v10367_v35 = vsub.f32 %v785_v6, %v872_v31  ;;  %v10369_v36 = vsub.f32 %v784_v7, %v871_v33  ;;  %v884_v37 = vsel %vm855_vm0, %v878_v34, 0.0  ;;  %v1042_v6 = vld [vmem:[#allocation9 + $0x28] sm:$0xff]  ;;  %8983 = vmatpush3.bf16.msra.mxu0 %v8980_v4  ;;  %v1152_v4 = vld [vmem:[#allocation11 + $0x18] sm:$0xff] }
 0x1c1   : > { %v795_v38 = vpop.xlane.xlu1 %794  ;;  %885 = vadd.xlane.f32.xlu1 %v884_v37  ;;  %809 = vadd.xlane.f32.xlu0 %v805_v30  ;;  %v793_v39 = vpop.xlane.xlu0 %792  ;;  %v9004_v7 = vpack.c.bf16 %v1042_v6, %v1041_v5 }
 0x1c2   : > { %v800_v41 = vmul.f32 0.0078125, %v795_v38  ;;  %v799_v42 = vmul.f32 0.0078125, %v793_v39  ;;  %v879_v43 = vmul.f32 %v10369_v36, %v10369_v36  ;;  %v880_v44 = vmul.f32 %v10367_v35, %v10367_v35 }
 0x1c3   : > { %9005 = vmatprep.subr.bf16.mxu1 %v9004_v7 }
 0x1c4   : > { %v887_v45 = vsel %vm855_vm0, %v879_v43, 0.0  ;;  %v10379_v46 = vsub.f32 %v780_v11, %v799_v42  ;;  %v10381_v47 = vsub.f32 %v781_v10, %v800_v41  ;;  %v890_v49 = vsel %vm855_vm0, %v880_v44, 0.0  ;;  %9007 = vmatpush3.bf16.msra.mxu1 %v9004_v7  ;;  %v1043_v11 = vld [vmem:[#allocation9 + $0x30] sm:$0xff] }
 0x1c5   : > { %888 = vadd.xlane.f32.xlu0 %v887_v45  ;;  %811 = vadd.xlane.f32.xlu1 %v806_v40  ;;  %v8984_v10 = vpack.c.bf16 %v940_v9, %v939_v8  ;;  %v9008_v13 = vpack.c.bf16 %v1044_v12, %v1043_v11 }
 0x1c6   : > { %v807_v48 = vmul.f32 %v10379_v46, %v10379_v46  ;;  %v808_v50 = vmul.f32 %v10381_v47, %v10381_v47 }
 0x1c7   : > { %8985 = vmatprep.subr.bf16.mxu0 %v8984_v10  ;;  %9009 = vmatprep.subr.bf16.mxu1 %v9008_v13 }
 0x1c8   : > { %8987 = vmatpush3.bf16.msra.mxu0 %v8984_v10  ;;  %9011 = vmatpush3.bf16.msra.mxu1 %v9008_v13  ;;  %v1153_v13 = vld [vmem:[#allocation11 + $0x20] sm:$0xff] }
 0x1c9   : > { %813 = vadd.xlane.f32.xlu0 %v807_v48  ;;  %891 = vadd.xlane.f32.xlu1 %v890_v49  ;;  %v9020_v20 = vpack.c.bf16 %v1154_v14, %v1153_v13 }
 0x1ca   : > { %8989 = vmatprep.subr.bf16.mxu0 %v8988_v16  ;;  %9013 = vmatprep.subr.bf16.mxu1 %v10388_v21 }
 0x1cc   : > { %8991 = vmatpush3.bf16.msra.mxu0 %v8988_v16 }
 0x1cd   : > { %815 = vadd.xlane.f32.xlu1 %v808_v50  ;;  %8993 = vmatprep.subr.bf16.mxu0 %v8992_v24 }
 0x1d0   : > { %8995 = vmatpush3.bf16.msra.mxu0 %v8992_v24  ;;  %v1155_v24 = vld [vmem:[#allocation11 + $0x30] sm:$0xff] }
 0x24a   : > { %v883_v25 = vpop.xlane.xlu0 %882 }
 0x24b   : > { %v893_v27 = vmul.f32 0.015625, %v883_v25  ;;  %v1156_v25 = vld [vmem:[#allocation11 + $0x38] sm:$0xff] }
 0x24d   : > { %v897_v28 = vadd.f32 1e-05, %v893_v27 }
 0x24e   : > { %v810_v29 = vpop.xlane.xlu0 %809  ;;  %v886_v30 = vpop.xlane.xlu1 %885 }
 0x24f   : > { %9331 = vrsqrt.f32 %v897_v28  ;;  %v817_v31 = vmul.f32 0.0078125, %v810_v29  ;;  %v894_v33 = vmul.f32 0.015625, %v886_v30 }
 0x251   : > { %v821_v34 = vadd.f32 1e-05, %v817_v31  ;;  %v898_v37 = vadd.f32 1e-05, %v894_v33  ;;  %v8126_v33 = vld [vmem:[%s11743_s9] ss:$0 sm:$0xff] }
 0x252   : > { %v889_v38 = vpop.xlane.xlu0 %888  ;;  %v812_v39 = vpop.xlane.xlu1 %811 }
 0x253   : > { %9333 = vrsqrt.f32 %v821_v34  ;;  %v895_v40 = vmul.f32 0.015625, %v889_v38  ;;  %v818_v41 = vmul.f32 0.0078125, %v812_v39 }
 0x254   : > { %9335 = vrsqrt.f32 %v898_v37 }
 0x255   : > { %v899_v42 = vadd.f32 1e-05, %v895_v40  ;;  %v822_v43 = vadd.f32 1e-05, %v818_v41  ;;  %v8125_v40 = vld [vmem:[%s11741_s7] ss:$0 sm:$0xff] }
 0x256   : > { %v814_v44 = vpop.xlane.xlu0 %813  ;;  %v892_v45 = vpop.xlane.xlu1 %891 }
 0x257   : > { %9337 = vrsqrt.f32 %v899_v42  ;;  %v819_v48 = vmul.f32 0.0078125, %v814_v44  ;;  %v896_v49 = vmul.f32 0.015625, %v892_v45 }
 0x258   : > { %9339 = vrsqrt.f32 %v822_v43 }
 0x259   : > { %v9332_v50 = vpop.eup %9331  ;;  %v823_v51 = vadd.f32 1e-05, %v819_v48  ;;  %v900_v52 = vadd.f32 1e-05, %v896_v49 }
 0x25a   : > { %v816_v54 = vpop.xlane.xlu1 %815  ;;  %v905_v55 = vmul.f32 %v9332_v50, %v10352_v19  ;;  %v8122_v19 = vld [vmem:[%s11845_s21] ss:$0 sm:$0xff]  ;;  %s8243_s21 = sshll.u32 %s10017_s3, 9  ;;  %s9888_s3 = smov [#allocation17]  }
 0x25b   : > { %9341 = vrsqrt.f32 %v823_v51  ;;  %v820_v56 = vmul.f32 0.0078125, %v816_v54  ;;  %s9783_s0 = sshll.u32 %s9888_s3, 4  ;;  %s9784_s0 = int_to_ptr.vmem [resolvable:$false] %s9783_s0 }
 0x25c   : > { %9343 = vrsqrt.f32 %v900_v52  ;;  %v915_v58 = vmul.f32 %v8123_v53, %v905_v55  ;;  %v8131_v55 = vld [vmem:[%s11846_s4] ss:$0 sm:$0xff]  ;;  %s11853_s4 = sld [smem:[#allocation72_spill]] }
 0x25d   : > { %v9334_v59 = vpop.eup %9333  ;;  %v824_v60 = vadd.f32 1e-05, %v820_v56 }
 0x25e   : > { %v9336_v62 = vpop.eup %9335  ;;  %v925_v63 = vadd.f32 %v8124_v57, %v915_v58  ;;  %v829_v0 = vmul.f32 %v9334_v59, %v10354_v23  ;;  %v9016_v23 = vpack.c.bf16 %v1152_v4, %v1151_v3 }
 0x25f   : > { %9345 = vrsqrt.f32 %v824_v60  ;;  %v906_v1 = vmul.f32 %v9336_v62, %v10358_v26 }
 0x260   : > { %8578 = vmatprep.mubr.msk.f32.mxu1 %vm855_vm0, %v925_v63  ;;  %v839_v2 = vmul.f32 %v8121_v61, %v829_v0 }
 0x261   : > { %v9338_v5 = vpop.eup %9337  ;;  %v916_v6 = vmul.f32 %v8123_v53, %v906_v1 }
 0x262   : > { %v9340_v7 = vpop.eup %9339  ;;  %v849_v8 = vadd.f32 %v8122_v19, %v839_v2  ;;  %v907_v9 = vmul.f32 %v9338_v5, %v10369_v36 }
 0x263   : > { %v926_v10 = vadd.f32 %v8124_v57, %v916_v6  ;;  %v830_v11 = vmul.f32 %v9340_v7, %v10363_v32 }
 0x264   : > { %8556 = vmatprep.mubr.f32.mxu0 %v849_v8  ;;  %v917_v12 = vmul.f32 %v8123_v53, %v907_v9 }
 0x265   : > { %v9342_v26 = vpop.eup %9341  ;;  %8579 = vmatmul.mubr.msk.f32.vlgmr.msra.gmra.mrb[0].mxu1 %vm855_vm0, %v926_v10  ;;  %v840_v15 = vmul.f32 %v8121_v61, %v830_v11 }
 0x266   : > { %v9344_v16 = vpop.eup %9343  ;;  %9015 = vmatpush3.bf16.msra.mxu1 %v10388_v21  ;;  %v927_v17 = vadd.f32 %v8124_v57, %v917_v12  ;;  %v831_v18 = vmul.f32 %v9342_v26, %v10379_v46  ;;  %v9024_v46 = vpack.c.bf16 %v1156_v25, %v1155_v24 }
 0x267   : > { %9017 = vmatprep.subr.bf16.mxu1 %v9016_v23  ;;  %v850_v36 = vadd.f32 %v8122_v19, %v840_v15  ;;  %v908_v22 = vmul.f32 %v9344_v16, %v10367_v35 }
 0x268   : > { %8581 = vmatprep.mubr.msk.f32.mxu1 %vm855_vm0, %v927_v17  ;;  %v841_v32 = vmul.f32 %v8121_v61, %v831_v18 }
 0x269   : > { %v9346_v27 = vpop.eup %9345  ;;  %8557 = vmatmul.mubr.f32.vlgmr.msra.gmra.mrb[0].mxu0 %v850_v36  ;;  %v918_v28 = vmul.f32 %v8123_v53, %v908_v22 }
 0x26a   : > { %9019 = vmatpush3.bf16.msra.mxu1 %v9016_v23  ;;  %v851_v29 = vadd.f32 %v8122_v19, %v841_v32  ;;  %v832_v21 = vmul.f32 %v9346_v27, %v10381_v47  ;;  %v9879_v47 = vmov 0.0  }
 0x26b   : > { %9021 = vmatprep.subr.bf16.mxu1 %v9020_v20  ;;  %v928_v30 = vadd.f32 %v8124_v57, %v918_v28  ;;  %8606 = vmatprep.subr.mxu0 %v9879_v47 }
 0x26c   : > { %8559 = vmatprep.mubr.f32.mxu0 %v851_v29  ;;  %v842_v31 = vmul.f32 %v8121_v61, %v832_v21 }
 0x26d   : > { %8582 = vmatmul.mubr.msk.f32.gmra.mrb[2].mxu1 %vm855_vm0, %v928_v30 }
 0x26e   : > { %9023 = vmatpush3.bf16.msra.mxu1 %v9020_v20  ;;  %8600 = vmatprep.mubr.msk.f32.mxu1 %vm855_vm0, %v925_v63  ;;  %v852_v35 = vadd.f32 %v8122_v19, %v842_v31 }
 0x26f   : > { %9025 = vmatprep.subr.bf16.mxu1 %v9024_v46 }
 0x270   : > { %8560 = vmatmul.mubr.f32.gmra.mrb[2].mxu0 %v852_v35 }
 0x271   : > { %8608 = vmatprep.mubr.msk.f32.mxu0 %vm9880_vm1, %v9879_v47 }
 0x272   : > { %9027 = vmatpush3.bf16.msra.mxu1 %v9024_v46 }
 0x273   : > { %8611 = vmatprep.subr.mxu1 %v9879_v47 }
 0x275   : > { %8601 = vmatmul.mubr.msk.f32.vlgmr.msra.gmra.mrb[4].mxu1 %vm855_vm0, %v926_v10 }
 0x276   : > { %8603 = vmatprep.mubr.msk.f32.mxu1 %vm855_vm0, %v927_v17 }
 0x279   : > { %8604 = vmatmul.mubr.msk.f32.gmra.mrb[6].mxu1 %vm855_vm0, %v928_v30 }
 0x27a   : > { %8613 = vmatprep.mubr.msk.f32.mxu1 %vm9880_vm1, %v9879_v47 }
 0x338   : > { %v8580_v34 = vpop.f32.mrb[0].mxu1 }
 0x339   : > { %v10429_v37 = vadd.f32 %v8580_v34, %v8126_v33  ;;  %v1130_v38 = vpop.f32.mrb[1].mxu1 }
 0x33a   : > { %v10431_v39 = vadd.f32 %v8126_v33, %v1130_v38 }
 0x33b   : > { %8612 = vmatpush3.xpose.msk.msra.mxu1 %vm1249_vm2, %v10429_v37 }
 0x33c   : > { %v8558_v41 = vpop.f32.mrb[0].mxu0  ;;  %8607 = vmatpush3.xpose.msk.msra.mxu0 %vm1249_vm2, %v10431_v39  ;;  %8621 = vmatprep.subr.mxu1 %v9879_v47 }
 0x33d   : > { %v10441_v42 = vadd.f32 %v8558_v41, %v8125_v40  ;;  %v1018_v43 = vpop.f32.mrb[1].mxu0  ;;  %8616 = vmatprep.subr.mxu0 %v9879_v47 }
 0x33e   : > { %v10444_v44 = vadd.f32 %v8125_v40, %v1018_v43 }
 0x33f   : > { %8614 = vmatmul.mubr.msk.f32.vlgmr.msra.gmra.mrb[8].mxu1 %vm1249_vm2, %v10441_v42 }
 0x340   : > { %v8583_v45 = vpop.f32.mrb[2].mxu1  ;;  %8609 = vmatmul.mubr.msk.f32.vlgmr.msra.gmra.mrb[4].mxu0 %vm1249_vm2, %v10444_v44  ;;  %8623 = vmatprep.mubr.msk.f32.mxu1 %vm9880_vm1, %v9879_v47 }
 0x341   : > { %v10452_v48 = vadd.f32 %v8583_v45, %v8126_v33  ;;  %v1140_v49 = vpop.f32.mrb[3].mxu1  ;;  %8618 = vmatprep.mubr.msk.f32.mxu0 %vm9880_vm1, %v9879_v47 }
 0x342   : > { %v10456_v50 = vadd.f32 %v8126_v33, %v1140_v49 }
 0x343   : > { %8622 = vmatpush3.xpose.msk.msra.mxu1 %vm1249_vm2, %v10452_v48  ;;  %v8561_v51 = vpop.f32.mrb[2].mxu0 }
 0x344   : > { %v10460_v52 = vadd.f32 %v8561_v51, %v8125_v40  ;;  %8617 = vmatpush3.xpose.msk.msra.mxu0 %vm1249_vm2, %v10456_v50  ;;  %v1028_v53 = vpop.f32.mrb[3].mxu0  ;;  %8631 = vmatprep.subr.mxu1 %v9879_v47 }
 0x345   : > { %v10465_v54 = vadd.f32 %v8125_v40, %v1028_v53  ;;  %8626 = vmatprep.subr.mxu0 %v9879_v47 }
 0x346   : > { %8624 = vmatmul.mubr.msk.f32.vlgmr.msra.gmra.mrb[10].mxu1 %vm1249_vm2, %v10460_v52 }
 0x347   : > { %8619 = vmatmul.mubr.msk.f32.vlgmr.msra.gmra.mrb[6].mxu0 %vm1249_vm2, %v10465_v54  ;;  %8633 = vmatprep.mubr.msk.f32.mxu1 %vm9880_vm1, %v9879_v47 }
 0x348   : > { %v8602_v56 = vpop.f32.mrb[4].mxu1  ;;  %8628 = vmatprep.mubr.msk.f32.mxu0 %vm9880_vm1, %v9879_v47 }
 0x349   : > { %v10479_v57 = vadd.f32 %v8602_v56, %v8131_v55  ;;  %v1230_v58 = vpop.f32.mrb[5].mxu1 }
 0x34a   : > { %v10481_v59 = vadd.f32 %v8131_v55, %v1230_v58 }
 0x34b   : > { %8632 = vmatpush3.msra.mxu1 %v10479_v57 }
 0x34c   : > { %v8605_v60 = vpop.f32.mrb[6].mxu1  ;;  %8627 = vmatpush3.msra.mxu0 %v10481_v59  ;;  %8641 = vmatprep.subr.mxu1 %v9879_v47 }
 0x34d   : > { %v10486_v61 = vadd.f32 %v8605_v60, %v8131_v55  ;;  %v1240_v62 = vpop.f32.mrb[7].mxu1  ;;  %8636 = vmatprep.subr.mxu0 %v9879_v47 }
 0x34e   : > { %v10489_v63 = vadd.f32 %v8131_v55, %v1240_v62 }
 0x412   : > { %v1398_v0 = vpop.f32.mrb[8].mxu1 }
 0x413   : > { %v1322_v19 = vpop.f32.mrb[4].mxu0  ;;  %v8615_v1 = vpop.f32.mrb[9].mxu1  ;;  %v1558_v2 = vsel %vm1554_vm3, %v1398_v0, -inf }
 0x414   : > { %1559 = vmax.xlane.f32.xlu1 %v1558_v2  ;;  %v8610_v3 = vpop.f32.mrb[5].mxu0  ;;  %v1555_v4 = vsel %vm1554_vm3, %v1322_v19, -inf }
 0x415   : > { %1556 = vmax.xlane.f32.xlu0 %v1555_v4 }
 0x419   : > { %v1550_v5 = vpop.f32.mrb[10].mxu1 }
 0x41a   : > { %v1474_v6 = vpop.f32.mrb[6].mxu0  ;;  %v8625_v7 = vpop.f32.mrb[11].mxu1  ;;  %v1564_v8 = vsel %vm1554_vm3, %v1550_v5, -inf }
 0x41b   : > { %1565 = vmax.xlane.f32.xlu1 %v1564_v8  ;;  %v8620_v9 = vpop.f32.mrb[7].mxu0  ;;  %v1561_v10 = vsel %vm1554_vm3, %v1474_v6, -inf }
 0x41c   : > { %1562 = vmax.xlane.f32.xlu0 %v1561_v10 }
 0x4a1   : > { %v1560_v23 = vpop.xlane.xlu1 %1559 }
 0x4a2   : > { %v1568_v11 = vsub.f32 %v1398_v0, %v1560_v23  ;;  %v1557_v12 = vpop.xlane.xlu0 %1556 }
 0x4a3   : > { %v1567_v13 = vsub.f32 %v1322_v19, %v1557_v12 }
 0x4a4   : > { %v1573_v14 = vmul.f32 1.442695, %v1568_v11 }
 0x4a5   : > { %v1571_v26 = vmul.f32 1.442695, %v1567_v13 }
 0x4a6   : > { %9347 = vpow2.f32 %v1573_v14 }
 0x4a7   : > { %9349 = vpow2.f32 %v1571_v26 }
 0x4a8   : > { %v1566_v15 = vpop.xlane.xlu1 %1565 }
 0x4a9   : > { %v1570_v16 = vsub.f32 %v1550_v5, %v1566_v15  ;;  %v1563_v17 = vpop.xlane.xlu0 %1562 }
 0x4aa   : > { %v1569_v18 = vsub.f32 %v1474_v6, %v1563_v17 }
 0x4ab   : > { %v1577_v36 = vmul.f32 1.442695, %v1570_v16 }
 0x4ac   : > { %v1575_v20 = vmul.f32 1.442695, %v1569_v18 }
 0x4ad   : > { %9351 = vpow2.f32 %v1577_v36 }
 0x4ae   : > { %9353 = vpow2.f32 %v1575_v20 }
 0x4b0   : > { %v9348_v22 = vpop.eup %9347 }
 0x4b1   : > { %v9350_v32 = vpop.eup %9349  ;;  %v1582_v24 = vsel %vm1554_vm3, %v9348_v22, 0.0 }
 0x4b2   : > { %1583 = vadd.xlane.f32.xlu1 %v1582_v24  ;;  %v1579_v25 = vsel %vm1554_vm3, %v9350_v32, 0.0 }
 0x4b3   : > { %1580 = vadd.xlane.f32.xlu0 %v1579_v25 }
 0x4b7   : > { %v9352_v27 = vpop.eup %9351 }
 0x4b8   : > { %v9354_v28 = vpop.eup %9353  ;;  %v1588_v29 = vsel %vm1554_vm3, %v9352_v27, 0.0 }
 0x4b9   : > { %1589 = vadd.xlane.f32.xlu1 %v1588_v29  ;;  %v1585_v21 = vsel %vm1554_vm3, %v9354_v28, 0.0 }
 0x4ba   : > { %1586 = vadd.xlane.f32.xlu0 %v1585_v21 }
 0x4ca   : > { %1987 = vrot.lane.b32.xlu1 %v10429_v37, %s9881_s8 }
 0x4ce   : > { %1907 = vrot.lane.b32.xlu1 %v10444_v44, %s9881_s8 }
 0x4d0   : > { %1909 = vrot.lane.b32.xlu0 %v10431_v39, %s9881_s8 }
 0x4d2   : > { %1985 = vrot.lane.b32.xlu1 %v10441_v42, %s9881_s8 }
 0x4d4   : > { %2065 = vrot.lane.b32.xlu0 %v10456_v50, %s9881_s8 }
 0x4d6   : > { %2143 = vrot.lane.b32.xlu1 %v10452_v48, %s9881_s8 }
 0x4d8   : > { %2063 = vrot.lane.b32.xlu0 %v10465_v54, %s9881_s8 }
 0x4da   : > { %2141 = vrot.lane.b32.xlu1 %v10460_v52, %s9881_s8 }
 0x53f   : > { %v1584_v30 = vpop.xlane.xlu1 %1583 }
 0x540   : > { %9355 = vrcp.f32 %v1584_v30  ;;  %v1581_v46 = vpop.xlane.xlu0 %1580 }
 0x541   : > { %9357 = vrcp.f32 %v1581_v46 }
 0x546   : > { %v1590_v31 = vpop.xlane.xlu1 %1589 }
 0x547   : > { %9359 = vrcp.f32 %v1590_v31  ;;  %v1587_v35 = vpop.xlane.xlu0 %1586 }
 0x548   : > { %9361 = vrcp.f32 %v1587_v35 }
 0x54a   : > { %v9356_v33 = vpop.eup %9355  ;;  %v1988_v34 = vpop.permute.xlu1 %1987 }
 0x54b   : > { %v9358_v38 = vpop.eup %9357  ;;  %v1596_v40 = vmul.f32 %v9356_v33, %v1584_v30  ;;  %v1910_v4 = vpop.permute.xlu0 %1909 }
 0x54c   : > { %v1595_v41 = vmul.f32 %v9358_v38, %v1581_v46 }
 0x54d   : > { %v1600_v43 = vsub.f32 2.0, %v1596_v40 }
 0x54e   : > { %v1599_v45 = vsub.f32 2.0, %v1595_v41  ;;  %v1908_v51 = vpop.permute.xlu1 %1907 }
 0x54f   : > { %v1604_v49 = vmul.f32 %v9356_v33, %v1600_v43  ;;  %v2066_v9 = vpop.permute.xlu0 %2065 }
 0x550   : > { %v1603_v53 = vmul.f32 %v9358_v38, %v1599_v45 }
 0x551   : > { %v9360_v55 = vpop.eup %9359  ;;  %v1608_v56 = vmul.f32 %v9348_v22, %v1604_v49 }
 0x552   : > { %v9362_v58 = vpop.eup %9361  ;;  %v1607_v60 = vmul.f32 %v9350_v32, %v1603_v53  ;;  %v1598_v62 = vmul.f32 %v9360_v55, %v1590_v31  ;;  %v1986_v2 = vpop.permute.xlu1 %1985 }
 0x553   : > { %v1597_v0 = vmul.f32 %v9362_v58, %v1587_v35  ;;  %8634 = vmatmul.mubr.msk.f32.vlgmr.msra.gmra.mrb[12].mxu1 %vm1554_vm3, %v1608_v56  ;;  %v2064_v23 = vpop.permute.xlu0 %2063 }
 0x554   : > { %v1602_v19 = vsub.f32 2.0, %v1598_v62  ;;  %8642 = vmatpush3.msra.mxu1 %v10486_v61  ;;  %8629 = vmatmul.mubr.msk.f32.vlgmr.msra.gmra.mrb[8].mxu0 %vm1554_vm3, %v1607_v60 }
 0x555   : > { %v1601_v1 = vsub.f32 2.0, %v1597_v0  ;;  %8637 = vmatpush3.msra.mxu0 %v10489_v63  ;;  %8643 = vmatprep.mubr.msk.f32.mxu1 %vm9880_vm1, %v9879_v47 }
 0x556   : > { %v1606_v3 = vmul.f32 %v9360_v55, %v1602_v19  ;;  %8651 = vmatprep.subr.mxu1 %v9879_v47  ;;  %8638 = vmatprep.mubr.msk.f32.mxu0 %vm9880_vm1, %v9879_v47  ;;  %v2144_v8 = vpop.permute.xlu1 %2143 }
 0x557   : > { %v1605_v5 = vmul.f32 %v9362_v58, %v1601_v1  ;;  %8646 = vmatprep.subr.mxu0 %v9879_v47 }
 0x558   : > { %v1610_v6 = vmul.f32 %v9352_v27, %v1606_v3 }
 0x559   : > { %v1609_v7 = vmul.f32 %v9354_v28, %v1605_v5 }
 0x55a   : > { %8644 = vmatmul.mubr.msk.f32.vlgmr.msra.gmra.mrb[14].mxu1 %vm1554_vm3, %v1610_v6  ;;  %v2142_v10 = vpop.permute.xlu1 %2141 }
 0x55b   : > { %8652 = vmatpush3.xpose.msk.msra.mxu1 %vm1249_vm2, %v1988_v34  ;;  %8639 = vmatmul.mubr.msk.f32.vlgmr.msra.gmra.mrb[10].mxu0 %vm1554_vm3, %v1609_v7 }
 0x55c   : > { %8647 = vmatpush3.xpose.msk.msra.mxu0 %vm1249_vm2, %v1910_v4  ;;  %8653 = vmatprep.mubr.msk.f32.mxu1 %vm9880_vm1, %v9879_v47 }
 0x55d   : > { %8661 = vmatprep.subr.mxu1 %v9879_v47  ;;  %8648 = vmatprep.mubr.msk.f32.mxu0 %vm9880_vm1, %v9879_v47 }
 0x55e   : > { %8654 = vmatmul.mubr.msk.f32.vlgmr.msra.gmra.mrb[16].mxu1 %vm1249_vm2, %v1986_v2  ;;  %8656 = vmatprep.subr.mxu0 %v9879_v47 }
 0x55f   : > { %8662 = vmatpush3.xpose.msk.msra.mxu1 %vm1249_vm2, %v2144_v8  ;;  %8649 = vmatmul.mubr.msk.f32.vlgmr.msra.gmra.mrb[12].mxu0 %vm1249_vm2, %v1908_v51 }
 0x560   : > { %8657 = vmatpush3.xpose.msk.msra.mxu0 %vm1249_vm2, %v2066_v9  ;;  %8663 = vmatprep.mubr.msk.f32.mxu1 %vm9880_vm1, %v9879_v47 }
 0x561   : > { %8658 = vmatprep.mubr.msk.f32.mxu0 %vm9880_vm1, %v9879_v47  ;;  %8671 = vmatprep.subr.mxu1 %v9879_v47 }
 0x562   : > { %8664 = vmatmul.mubr.msk.f32.vlgmr.msra.gmra.mrb[18].mxu1 %vm1249_vm2, %v2142_v10  ;;  %8666 = vmatprep.subr.mxu0 %v9879_v47 }
 0x563   : > { %8659 = vmatmul.mubr.msk.f32.vlgmr.msra.gmra.mrb[14].mxu0 %vm1249_vm2, %v2064_v23  ;;  %8673 = vmatprep.mubr.msk.f32.mxu1 %vm9880_vm1, %v9879_v47 }
 0x564   : > { %8668 = vmatprep.mubr.msk.f32.mxu0 %vm9880_vm1, %v9879_v47 }
 0x626   : > { %v1753_v11 = vpop.f32.mrb[12].mxu1 }
 0x627   : > { %1904 = vst.msk [vmem:[#allocation2 + $0x8] sm:$0xff] %vm1249_vm2, %v1753_v11  ;;  %v1680_v12 = vpop.f32.mrb[8].mxu0  ;;  %v8635_v13 = vpop.f32.mrb[13].mxu1 }
 0x628   : > { %1903 = vst.msk [vmem:[#allocation2] sm:$0xff] %vm1249_vm2, %v1680_v12  ;;  %v8630_v14 = vpop.f32.mrb[9].mxu0 }
 0x62d   : > { %v1899_v26 = vpop.f32.mrb[14].mxu1 }
 0x62e   : > { %1906 = vst.msk [vmem:[#allocation2 + $0x18] sm:$0xff] %vm1249_vm2, %v1899_v26  ;;  %v1826_v15 = vpop.f32.mrb[10].mxu0  ;;  %v8645_v16 = vpop.f32.mrb[15].mxu1 }
 0x62f   : > { %1905 = vst.msk [vmem:[#allocation2 + $0x10] sm:$0xff] %vm1249_vm2, %v1826_v15  ;;  %v8640_v17 = vpop.f32.mrb[11].mxu0 }
 0x631   : > { %v2059_v18 = vpop.f32.mrb[16].mxu1 }
 0x632   : > { %v1981_v36 = vpop.f32.mrb[12].mxu0  ;;  %v8655_v20 = vpop.f32.mrb[17].mxu1  ;;  %v2222_v22 = vsel %vm1554_vm3, %v2059_v18, -inf }
 0x633   : > { %v8650_v32 = vpop.f32.mrb[13].mxu0  ;;  %2223 = vmax.xlane.f32.xlu1 %v2222_v22  ;;  %v2219_v24 = vsel %vm1554_vm3, %v1981_v36, -inf }
 0x634   : > { %2220 = vmax.xlane.f32.xlu0 %v2219_v24 }
 0x635   : > { %v2215_v25 = vpop.f32.mrb[18].mxu1 }
 0x636   : > { %v2137_v27 = vpop.f32.mrb[14].mxu0  ;;  %v8665_v28 = vpop.f32.mrb[19].mxu1  ;;  %v2228_v30 = vsel %vm1554_vm3, %v2215_v25, -inf }
 0x637   : > { %v8660_v29 = vpop.f32.mrb[15].mxu0  ;;  %v2225_v21 = vsel %vm1554_vm3, %v2137_v27, -inf }
 0x638   : > { %2226 = vmax.xlane.f32.xlu0 %v2225_v21 }
 0x63c   : > { %2229 = vmax.xlane.f32.xlu0 %v2228_v30 }
 0x6c0   : > { %v2224_v46 = vpop.xlane.xlu1 %2223 }
 0x6c1   : > { %v2232_v31 = vsub.f32 %v2059_v18, %v2224_v46  ;;  %v2221_v35 = vpop.xlane.xlu0 %2220 }
 0x6c2   : > { %v2231_v33 = vsub.f32 %v1981_v36, %v2221_v35 }
 0x6c3   : > { %v2237_v34 = vmul.f32 1.442695, %v2232_v31 }
 0x6c4   : > { %v2235_v38 = vmul.f32 1.442695, %v2231_v33 }
 0x6c5   : > { %9363 = vpow2.f32 %v2237_v34  ;;  %v2227_v49 = vpop.xlane.xlu0 %2226 }
 0x6c6   : > { %9365 = vpow2.f32 %v2235_v38  ;;  %v2233_v51 = vsub.f32 %v2137_v27, %v2227_v49 }
 0x6c8   : > { %v2239_v53 = vmul.f32 1.442695, %v2233_v51 }
 0x6c9   : > { %v2230_v55 = vpop.xlane.xlu0 %2229 }
 0x6ca   : > { %v2234_v56 = vsub.f32 %v2215_v25, %v2230_v55  ;;  %9367 = vpow2.f32 %v2239_v53 }
 0x6cc   : > { %v2241_v58 = vmul.f32 1.442695, %v2234_v56 }
 0x6ce   : > { %9369 = vpow2.f32 %v2241_v58 }
 0x6cf   : > { %v9364_v40 = vpop.eup %9363 }
 0x6d0   : > { %v9366_v41 = vpop.eup %9365  ;;  %v2246_v43 = vsel %vm1554_vm3, %v9364_v40, 0.0 }
 0x6d1   : > { %2247 = vadd.xlane.f32.xlu1 %v2246_v43  ;;  %v2243_v45 = vsel %vm1554_vm3, %v9366_v41, 0.0 }
 0x6d2   : > { %2244 = vadd.xlane.f32.xlu0 %v2243_v45 }
 0x6d4   : > { %v9368_v60 = vpop.eup %9367 }
 0x6d5   : > { %v2249_v62 = vsel %vm1554_vm3, %v9368_v60, 0.0 }
 0x6d8   : > { %v10570_v0 = vpop.eup %9369 }
 0x6d9   : > { %v2252_v19 = vsel %vm1554_vm3, %v10570_v0, 0.0 }
 0x6e2   : > { %2353 = vrot.lane.b32.xlu1 %v10479_v57, %s9881_s8 }
 0x6e6   : > { %2430 = vrot.lane.b32.xlu1 %v10489_v63, %s9881_s8 }
 0x6e8   : > { %2276 = vrot.lane.b32.xlu0 %v10481_v59, %s9881_s8 }
 0x6ea   : > { %2507 = vrot.lane.b32.xlu1 %v10486_v61, %s9881_s8 }
 0x707   : > { %2250 = vadd.xlane.f32.xlu0 %v2249_v62 }
 0x70e   : > { %2253 = vadd.xlane.f32.xlu1 %v2252_v19 }
 0x71d   : > { %2606 = vrot.lane.b32.xlu0 %v10431_v39, %s9882_s13 }
 0x71f   : > { %2684 = vrot.lane.b32.xlu1 %v10429_v37, %s9882_s13 }
 0x721   : > { %2604 = vrot.lane.b32.xlu0 %v10444_v44, %s9882_s13 }
 0x723   : > { %2682 = vrot.lane.b32.xlu1 %v10441_v42, %s9882_s13 }
 0x725   : > { %2762 = vrot.lane.b32.xlu0 %v10456_v50, %s9882_s13 }
 0x727   : > { %2840 = vrot.lane.b32.xlu1 %v10452_v48, %s9882_s13 }
 0x729   : > { %2760 = vrot.lane.b32.xlu0 %v10465_v54, %s9882_s13 }
 0x72b   : > { %2838 = vrot.lane.b32.xlu1 %v10460_v52, %s9882_s13 }
 0x75e   : > { %v2248_v1 = vpop.xlane.xlu1 %2247 }
 0x75f   : > { %9371 = vrcp.f32 %v2248_v1  ;;  %v2245_v2 = vpop.xlane.xlu0 %2244 }
 0x760   : > { %9373 = vrcp.f32 %v2245_v2 }
 0x762   : > { %v2354_v3 = vpop.permute.xlu1 %2353 }
 0x763   : > { %v2277_v4 = vpop.permute.xlu0 %2276  ;;  %8672 = vmatpush3.msra.mxu1 %v2354_v3 }
 0x764   : > { %8667 = vmatpush3.msra.mxu0 %v2277_v4  ;;  %8681 = vmatprep.subr.mxu1 %v9879_v47 }
 0x765   : > { %8676 = vmatprep.subr.mxu0 %v9879_v47 }
 0x766   : > { %v2431_v10 = vpop.permute.xlu1 %2430 }
 0x769   : > { %v9372_v5 = vpop.eup %9371 }
 0x76a   : > { %v9374_v6 = vpop.eup %9373  ;;  %v2260_v7 = vmul.f32 %v9372_v5, %v2248_v1  ;;  %v2508_v26 = vpop.permute.xlu1 %2507 }
 0x76b   : > { %v2259_v8 = vmul.f32 %v9374_v6, %v2245_v2 }
 0x76c   : > { %v2264_v9 = vsub.f32 2.0, %v2260_v7 }
 0x76d   : > { %v2263_v23 = vsub.f32 2.0, %v2259_v8 }
 0x76e   : > { %v2268_v11 = vmul.f32 %v9372_v5, %v2264_v9 }
 0x76f   : > { %v2267_v12 = vmul.f32 %v9374_v6, %v2263_v23 }
 0x770   : > { %v2272_v13 = vmul.f32 %v9364_v40, %v2268_v11 }
 0x771   : > { %v2271_v14 = vmul.f32 %v9366_v41, %v2267_v12 }
 0x772   : > { %8674 = vmatmul.mubr.msk.f32.vlgmr.msra.gmra.mrb[20].mxu1 %vm1554_vm3, %v2272_v13 }
 0x773   : > { %8682 = vmatpush3.msra.mxu1 %v2508_v26  ;;  %8669 = vmatmul.mubr.msk.f32.vlgmr.msra.gmra.mrb[16].mxu0 %vm1554_vm3, %v2271_v14 }
 0x774   : > { %8677 = vmatpush3.msra.mxu0 %v2431_v10  ;;  %8678 = vmatprep.mubr.msk.f32.mxu0 %vm9880_vm1, %v9879_v47 }
 0x775   : > { %8686 = vmatprep.subr.mxu0 %v9879_v47  ;;  %8683 = vmatprep.mubr.msk.f32.mxu1 %vm9880_vm1, %v9879_v47 }
 0x776   : > { %8691 = vmatprep.subr.mxu1 %v9879_v47 }
 0x794   : > { %v2251_v15 = vpop.xlane.xlu0 %2250 }
 0x795   : > { %9375 = vrcp.f32 %v2251_v15 }
 0x798   : > { %v2607_v17 = vpop.permute.xlu0 %2606 }
 0x79b   : > { %v2254_v16 = vpop.xlane.xlu1 %2253 }
 0x79c   : > { %9377 = vrcp.f32 %v2254_v16  ;;  %v2605_v22 = vpop.permute.xlu0 %2604 }
 0x79f   : > { %v9376_v18 = vpop.eup %9375  ;;  %v2685_v24 = vpop.permute.xlu1 %2684 }
 0x7a0   : > { %v2261_v36 = vmul.f32 %v9376_v18, %v2251_v15  ;;  %v2763_v21 = vpop.permute.xlu0 %2762 }
 0x7a2   : > { %v2265_v20 = vsub.f32 2.0, %v2261_v36 }
 0x7a3   : > { %v2683_v30 = vpop.permute.xlu1 %2682 }
 0x7a4   : > { %v2269_v32 = vmul.f32 %v9376_v18, %v2265_v20  ;;  %v2761_v35 = vpop.permute.xlu0 %2760 }
 0x7a6   : > { %v9378_v25 = vpop.eup %9377  ;;  %v2273_v27 = vmul.f32 %v9368_v60, %v2269_v32 }
 0x7a7   : > { %v2262_v28 = vmul.f32 %v9378_v25, %v2254_v16  ;;  %v2841_v33 = vpop.permute.xlu1 %2840 }
 0x7a8   : > { %8679 = vmatmul.mubr.msk.f32.vlgmr.msra.gmra.mrb[18].mxu0 %vm1554_vm3, %v2273_v27 }
 0x7a9   : > { %v2266_v29 = vsub.f32 2.0, %v2262_v28  ;;  %8687 = vmatpush3.xpose.msk.msra.mxu0 %vm1249_vm2, %v2607_v17  ;;  %8688 = vmatprep.mubr.msk.f32.mxu0 %vm9880_vm1, %v9879_v47 }
 0x7aa   : > { %8696 = vmatprep.subr.mxu0 %v9879_v47 }
 0x7ab   : > { %v2270_v46 = vmul.f32 %v9378_v25, %v2266_v29  ;;  %v2839_v34 = vpop.permute.xlu1 %2838 }
 0x7ac   : > { %8689 = vmatmul.mubr.msk.f32.vlgmr.msra.gmra.mrb[20].mxu0 %vm1249_vm2, %v2605_v22 }
 0x7ad   : > { %v2274_v31 = vmul.f32 %v10570_v0, %v2270_v46  ;;  %8697 = vmatpush3.xpose.msk.msra.mxu0 %vm1249_vm2, %v2763_v21  ;;  %8698 = vmatprep.mubr.msk.f32.mxu0 %vm9880_vm1, %v9879_v47 }
 0x7ae   : > { %8706 = vmatprep.subr.mxu0 %v9879_v47 }
 0x7af   : > { %8684 = vmatmul.mubr.msk.f32.vlgmr.msra.gmra.mrb[22].mxu1 %vm1554_vm3, %v2274_v31 }
 0x7b0   : > { %8692 = vmatpush3.xpose.msk.msra.mxu1 %vm1249_vm2, %v2685_v24  ;;  %8699 = vmatmul.mubr.msk.f32.vlgmr.msra.gmra.mrb[22].mxu0 %vm1249_vm2, %v2761_v35 }
 0x7b1   : > { %8693 = vmatprep.mubr.msk.f32.mxu1 %vm9880_vm1, %v9879_v47  ;;  %8701 = vmatprep.subr.mxu1 %v9879_v47 }
 0x7b2   : > { %8708 = vmatprep.mubr.msk.f32.mxu0 %vm9880_vm1, %v9879_v47 }
 0x7b3   : > { %8694 = vmatmul.mubr.msk.f32.vlgmr.msra.gmra.mrb[24].mxu1 %vm1249_vm2, %v2683_v30 }
 0x7b4   : > { %8702 = vmatpush3.xpose.msk.msra.mxu1 %vm1249_vm2, %v2841_v33  ;;  %8703 = vmatprep.mubr.msk.f32.mxu1 %vm9880_vm1, %v9879_v47 }
 0x7b5   : > { %8711 = vmatprep.subr.mxu1 %v9879_v47 }
 0x7b7   : > { %8704 = vmatmul.mubr.msk.f32.vlgmr.msra.gmra.mrb[26].mxu1 %vm1249_vm2, %v2839_v34 }
 0x7b8   : > { %8713 = vmatprep.mubr.msk.f32.mxu1 %vm9880_vm1, %v9879_v47 }
 0x845   : > { %v10627_v38 = vpop.f32.mrb[20].mxu1 }
 0x846   : > { %v10629_v40 = vpop.f32.mrb[16].mxu0  ;;  %v8675_v41 = vpop.f32.mrb[21].mxu1 }
 0x847   : > { %v8670_v43 = vpop.f32.mrb[17].mxu0 }
 0x87b   : > { %v10631_v45 = vpop.f32.mrb[18].mxu0 }
 0x87c   : > { %v8680_v49 = vpop.f32.mrb[19].mxu0 }
 0x87f   : > { %v2678_v51 = vpop.f32.mrb[20].mxu0 }
 0x880   : > { %v8690_v53 = vpop.f32.mrb[21].mxu0  ;;  %v2916_v55 = vsel %vm1554_vm3, %v2678_v51, -inf }
 0x881   : > { %2917 = vmax.xlane.f32.xlu0 %v2916_v55 }
 0x882   : > { %v10634_v56 = vpop.f32.mrb[22].mxu1 }
 0x883   : > { %v8685_v58 = vpop.f32.mrb[23].mxu1  ;;  %v2834_v60 = vpop.f32.mrb[22].mxu0 }
 0x884   : > { %v8700_v62 = vpop.f32.mrb[23].mxu0  ;;  %v2922_v0 = vsel %vm1554_vm3, %v2834_v60, -inf }
 0x885   : > { %2923 = vmax.xlane.f32.xlu0 %v2922_v0 }
 0x886   : > { %v2756_v19 = vpop.f32.mrb[24].mxu1 }
 0x887   : > { %v8695_v1 = vpop.f32.mrb[25].mxu1  ;;  %v2919_v2 = vsel %vm1554_vm3, %v2756_v19, -inf }
 0x888   : > { %2920 = vmax.xlane.f32.xlu1 %v2919_v2 }
 0x88a   : > { %v2912_v3 = vpop.f32.mrb[26].mxu1 }
 0x88b   : > { %v8705_v4 = vpop.f32.mrb[27].mxu1  ;;  %v2925_v5 = vsel %vm1554_vm3, %v2912_v3, -inf }
 0x88c   : > { %2926 = vmax.xlane.f32.xlu0 %v2925_v5 }
 0x90e   : > { %v2918_v6 = vpop.xlane.xlu0 %2917 }
 0x90f   : > { %v2928_v7 = vsub.f32 %v2678_v51, %v2918_v6 }
 0x911   : > { %v2932_v8 = vmul.f32 1.442695, %v2928_v7 }
 0x912   : > { %v2924_v26 = vpop.xlane.xlu0 %2923 }
 0x913   : > { %9379 = vpow2.f32 %v2932_v8  ;;  %v2930_v15 = vsub.f32 %v2834_v60, %v2924_v26 }
 0x915   : > { %v2921_v9 = vpop.xlane.xlu1 %2920  ;;  %v2936_v16 = vmul.f32 1.442695, %v2930_v15 }
 0x916   : > { %v2929_v10 = vsub.f32 %v2756_v19, %v2921_v9 }
 0x918   : > { %v2934_v23 = vmul.f32 1.442695, %v2929_v10 }
 0x919   : > { %v2927_v17 = vpop.xlane.xlu0 %2926 }
 0x91a   : > { %9381 = vpow2.f32 %v2934_v23  ;;  %v2931_v18 = vsub.f32 %v2912_v3, %v2927_v17 }
 0x91b   : > { %9383 = vpow2.f32 %v2936_v16 }
 0x91c   : > { %v2938_v20 = vmul.f32 1.442695, %v2931_v18 }
 0x91d   : > { %v9380_v11 = vpop.eup %9379 }
 0x91e   : > { %v2940_v12 = vsel %vm1554_vm3, %v9380_v11, 0.0  ;;  %9385 = vpow2.f32 %v2938_v20 }
 0x91f   : > { %2941 = vadd.xlane.f32.xlu0 %v2940_v12 }
 0x924   : > { %v9382_v13 = vpop.eup %9381 }
 0x925   : > { %v2943_v14 = vsel %vm1554_vm3, %v9382_v13, 0.0  ;;  %v9384_v36 = vpop.eup %9383 }
 0x926   : > { %2944 = vadd.xlane.f32.xlu1 %v2943_v14  ;;  %v2946_v22 = vsel %vm1554_vm3, %v9384_v36, 0.0 }
 0x928   : > { %v10650_v32 = vpop.eup %9385 }
 0x929   : > { %v2949_v24 = vsel %vm1554_vm3, %v10650_v32, 0.0 }
 0x935   : > { %2972 = vrot.lane.b32.xlu0 %v10481_v59, %s9882_s13 }
 0x937   : > { %3048 = vrot.lane.b32.xlu1 %v10479_v57, %s9882_s13 }
 0x93b   : > { %3124 = vrot.lane.b32.xlu1 %v10489_v63, %s9882_s13 }
 0x93f   : > { %3200 = vrot.lane.b32.xlu1 %v10486_v61, %s9882_s13 }
 0x954   : > { %2947 = vadd.xlane.f32.xlu0 %v2946_v22 }
 0x963   : > { %2950 = vadd.xlane.f32.xlu1 %v2949_v24 }
 0x96a   : > { %3299 = vrot.lane.b32.xlu0 %v10431_v39, %s9883_s28 }
 0x96e   : > { %3297 = vrot.lane.b32.xlu0 %v10444_v44, %s9883_s28 }
 0x972   : > { %3455 = vrot.lane.b32.xlu0 %v10456_v50, %s9883_s28 }
 0x974   : > { %3377 = vrot.lane.b32.xlu1 %v10429_v37, %s9883_s28 }
 0x976   : > { %3453 = vrot.lane.b32.xlu0 %v10465_v54, %s9883_s28 }
 0x978   : > { %3375 = vrot.lane.b32.xlu1 %v10441_v42, %s9883_s28 }
 0x97c   : > { %3533 = vrot.lane.b32.xlu1 %v10452_v48, %s9883_s28 }
 0x980   : > { %3531 = vrot.lane.b32.xlu1 %v10460_v52, %s9883_s28 }
 0x9ac   : > { %v2942_v25 = vpop.xlane.xlu0 %2941 }
 0x9ad   : > { %9387 = vrcp.f32 %v2942_v25 }
 0x9b0   : > { %v2973_v27 = vpop.permute.xlu0 %2972 }
 0x9b1   : > { %8707 = vmatpush3.msra.mxu0 %v2973_v27 }
 0x9b2   : > { %8716 = vmatprep.subr.mxu0 %v9879_v47 }
 0x9b3   : > { %v2945_v28 = vpop.xlane.xlu1 %2944 }
 0x9b4   : > { %9389 = vrcp.f32 %v2945_v28 }
 0x9b7   : > { %v9388_v29 = vpop.eup %9387  ;;  %v3049_v21 = vpop.permute.xlu1 %3048 }
 0x9b8   : > { %v2956_v30 = vmul.f32 %v9388_v29, %v2942_v25  ;;  %8712 = vmatpush3.msra.mxu1 %v3049_v21 }
 0x9b9   : > { %8721 = vmatprep.subr.mxu1 %v9879_v47 }
 0x9ba   : > { %v2960_v46 = vsub.f32 2.0, %v2956_v30 }
 0x9bb   : > { %v3125_v41 = vpop.permute.xlu1 %3124 }
 0x9bc   : > { %v2964_v31 = vmul.f32 %v9388_v29, %v2960_v46 }
 0x9be   : > { %v9390_v35 = vpop.eup %9389  ;;  %v2968_v33 = vmul.f32 %v9380_v11, %v2964_v31 }
 0x9bf   : > { %v2957_v34 = vmul.f32 %v9390_v35, %v2945_v28  ;;  %v3201_v53 = vpop.permute.xlu1 %3200 }
 0x9c0   : > { %8709 = vmatmul.mubr.msk.f32.vlgmr.msra.gmra.mrb[24].mxu0 %vm1554_vm3, %v2968_v33 }
 0x9c1   : > { %v2961_v43 = vsub.f32 2.0, %v2957_v34  ;;  %8717 = vmatpush3.msra.mxu0 %v3125_v41  ;;  %8718 = vmatprep.mubr.msk.f32.mxu0 %vm9880_vm1, %v9879_v47 }
 0x9c2   : > { %8726 = vmatprep.subr.mxu0 %v9879_v47 }
 0x9c3   : > { %v2965_v49 = vmul.f32 %v9390_v35, %v2961_v43 }
 0x9c5   : > { %v2969_v51 = vmul.f32 %v9382_v13, %v2965_v49 }
 0x9c7   : > { %8714 = vmatmul.mubr.msk.f32.vlgmr.msra.gmra.mrb[28].mxu1 %vm1554_vm3, %v2969_v51 }
 0x9c8   : > { %8722 = vmatpush3.msra.mxu1 %v3201_v53  ;;  %8723 = vmatprep.mubr.msk.f32.mxu1 %vm9880_vm1, %v9879_v47 }
 0x9c9   : > { %8731 = vmatprep.subr.mxu1 %v9879_v47 }
 0x9e1   : > { %v2948_v55 = vpop.xlane.xlu0 %2947 }
 0x9e2   : > { %9391 = vrcp.f32 %v2948_v55 }
 0x9e5   : > { %v3300_v58 = vpop.permute.xlu0 %3299 }
 0x9e9   : > { %v3298_v19 = vpop.permute.xlu0 %3297 }
 0x9ec   : > { %v9392_v60 = vpop.eup %9391 }
 0x9ed   : > { %v2958_v62 = vmul.f32 %v9392_v60, %v2948_v55  ;;  %v3456_v4 = vpop.permute.xlu0 %3455 }
 0x9ef   : > { %v2962_v0 = vsub.f32 2.0, %v2958_v62 }
 0x9f0   : > { %v2951_v1 = vpop.xlane.xlu1 %2950 }
 0x9f1   : > { %v2966_v2 = vmul.f32 %v9392_v60, %v2962_v0  ;;  %9393 = vrcp.f32 %v2951_v1  ;;  %v3454_v8 = vpop.permute.xlu0 %3453 }
 0x9f3   : > { %v2970_v3 = vmul.f32 %v9384_v36, %v2966_v2 }
 0x9f4   : > { %v3378_v5 = vpop.permute.xlu1 %3377 }
 0x9f5   : > { %8719 = vmatmul.mubr.msk.f32.vlgmr.msra.gmra.mrb[26].mxu0 %vm1554_vm3, %v2970_v3 }
 0x9f6   : > { %8727 = vmatpush3.xpose.msk.msra.mxu0 %vm1249_vm2, %v3300_v58  ;;  %8728 = vmatprep.mubr.msk.f32.mxu0 %vm9880_vm1, %v9879_v47 }
 0x9f7   : > { %8736 = vmatprep.subr.mxu0 %v9879_v47 }
 0x9f8   : > { %v3376_v10 = vpop.permute.xlu1 %3375 }
 0x9f9   : > { %8729 = vmatmul.mubr.msk.f32.vlgmr.msra.gmra.mrb[28].mxu0 %vm1249_vm2, %v3298_v19 }
 0x9fa   : > { %8737 = vmatpush3.xpose.msk.msra.mxu0 %vm1249_vm2, %v3456_v4  ;;  %8738 = vmatprep.mubr.msk.f32.mxu0 %vm9880_vm1, %v9879_v47 }
 0x9fb   : > { %v9394_v6 = vpop.eup %9393  ;;  %8746 = vmatprep.subr.mxu0 %v9879_v47 }
 0x9fc   : > { %v2959_v7 = vmul.f32 %v9394_v6, %v2951_v1  ;;  %v3534_v12 = vpop.permute.xlu1 %3533 }
 0x9fd   : > { %8739 = vmatmul.mubr.msk.f32.vlgmr.msra.gmra.mrb[30].mxu0 %vm1249_vm2, %v3454_v8 }
 0x9fe   : > { %v2963_v9 = vsub.f32 2.0, %v2959_v7  ;;  %8748 = vmatprep.mubr.msk.f32.mxu0 %vm9880_vm1, %v9879_v47 }
 0xa00   : > { %v2967_v23 = vmul.f32 %v9394_v6, %v2963_v9  ;;  %v3532_v13 = vpop.permute.xlu1 %3531 }
 0xa02   : > { %v2971_v11 = vmul.f32 %v10650_v32, %v2967_v23 }
 0xa04   : > { %8724 = vmatmul.mubr.msk.f32.vlgmr.msra.gmra.mrb[30].mxu1 %vm1554_vm3, %v2971_v11 }
 0xa05   : > { %8732 = vmatpush3.xpose.msk.msra.mxu1 %vm1249_vm2, %v3378_v5  ;;  %8733 = vmatprep.mubr.msk.f32.mxu1 %vm9880_vm1, %v9879_v47 }
 0xa06   : > { %8741 = vmatprep.subr.mxu1 %v9879_v47 }
 0xa08   : > { %8734 = vmatmul.mubr.msk.f32.vlgmr.msra.gmra.mrb[32].mxu1 %vm1249_vm2, %v3376_v10 }
 0xa09   : > { %8742 = vmatpush3.xpose.msk.msra.mxu1 %vm1249_vm2, %v3534_v12  ;;  %8743 = vmatprep.mubr.msk.f32.mxu1 %vm9880_vm1, %v9879_v47 }
 0xa0a   : > { %8751 = vmatprep.subr.mxu1 %v9879_v47 }
 0xa0c   : > { %8744 = vmatmul.mubr.msk.f32.vlgmr.msra.gmra.mrb[34].mxu1 %vm1249_vm2, %v3532_v13 }
 0xa0d   : > { %8753 = vmatprep.mubr.msk.f32.mxu1 %vm9880_vm1, %v9879_v47 }
 0xa93   : > { %v10707_v14 = vpop.f32.mrb[24].mxu0 }
 0xa94   : > { %v8710_v26 = vpop.f32.mrb[25].mxu0 }
 0xa9a   : > { %v10709_v15 = vpop.f32.mrb[28].mxu1 }
 0xa9b   : > { %v8715_v16 = vpop.f32.mrb[29].mxu1 }
 0xac8   : > { %v10711_v17 = vpop.f32.mrb[26].mxu0 }
 0xac9   : > { %v8720_v18 = vpop.f32.mrb[27].mxu0 }
 0xacc   : > { %v3371_v36 = vpop.f32.mrb[28].mxu0 }
 0xacd   : > { %v8730_v20 = vpop.f32.mrb[29].mxu0  ;;  %v3609_v22 = vsel %vm1554_vm3, %v3371_v36, -inf }
 0xace   : > { %3610 = vmax.xlane.f32.xlu0 %v3609_v22 }
 0xad0   : > { %v3527_v32 = vpop.f32.mrb[30].mxu0 }
 0xad1   : > { %v8740_v24 = vpop.f32.mrb[31].mxu0  ;;  %v3615_v25 = vsel %vm1554_vm3, %v3527_v32, -inf }
 0xad2   : > { %3616 = vmax.xlane.f32.xlu0 %v3615_v25 }
 0xad7   : > { %v10715_v27 = vpop.f32.mrb[30].mxu1 }
 0xad8   : > { %v8725_v28 = vpop.f32.mrb[31].mxu1 }
 0xadb   : > { %v3449_v29 = vpop.f32.mrb[32].mxu1 }
 0xadc   : > { %v8735_v21 = vpop.f32.mrb[33].mxu1  ;;  %v3612_v30 = vsel %vm1554_vm3, %v3449_v29, -inf }
 0xadd   : > { %3613 = vmax.xlane.f32.xlu1 %v3612_v30 }
 0xadf   : > { %v3605_v46 = vpop.f32.mrb[34].mxu1 }
 0xae0   : > { %v8745_v31 = vpop.f32.mrb[35].mxu1  ;;  %v3618_v35 = vsel %vm1554_vm3, %v3605_v46, -inf }
 0xae1   : > { %3619 = vmax.xlane.f32.xlu0 %v3618_v35 }
 0xb5b   : > { %v3611_v33 = vpop.xlane.xlu0 %3610 }
 0xb5c   : > { %v3621_v34 = vsub.f32 %v3371_v36, %v3611_v33 }
 0xb5e   : > { %v3625_v41 = vmul.f32 1.442695, %v3621_v34 }
 0xb5f   : > { %v3617_v62 = vpop.xlane.xlu0 %3616 }
 0xb60   : > { %9395 = vpow2.f32 %v3625_v41  ;;  %v3623_v0 = vsub.f32 %v3527_v32, %v3617_v62 }
 0xb62   : > { %v3629_v19 = vmul.f32 1.442695, %v3623_v0 }
 0xb6a   : > { %v9396_v43 = vpop.eup %9395  ;;  %v3614_v49 = vpop.xlane.xlu1 %3613 }
 0xb6b   : > { %v3622_v51 = vsub.f32 %v3449_v29, %v3614_v49  ;;  %v3633_v53 = vsel %vm1554_vm3, %v9396_v43, 0.0 }
 0xb6c   : > { %3634 = vadd.xlane.f32.xlu0 %v3633_v53 }
 0xb6d   : > { %v3627_v55 = vmul.f32 1.442695, %v3622_v51 }
 0xb6e   : > { %v3620_v2 = vpop.xlane.xlu0 %3619 }
 0xb6f   : > { %9397 = vpow2.f32 %v3627_v55  ;;  %v3624_v4 = vsub.f32 %v3605_v46, %v3620_v2 }
 0xb70   : > { %9399 = vpow2.f32 %v3629_v19 }
 0xb71   : > { %v3631_v5 = vmul.f32 1.442695, %v3624_v4 }
 0xb73   : > { %9401 = vpow2.f32 %v3631_v5 }
 0xb79   : > { %v9398_v58 = vpop.eup %9397 }
 0xb7a   : > { %v3636_v60 = vsel %vm1554_vm3, %v9398_v58, 0.0  ;;  %v9400_v1 = vpop.eup %9399 }
 0xb7b   : > { %3637 = vadd.xlane.f32.xlu1 %v3636_v60  ;;  %v3639_v3 = vsel %vm1554_vm3, %v9400_v1, 0.0 }
 0xb7d   : > { %v10730_v6 = vpop.eup %9401 }
 0xb7e   : > { %v3642_v7 = vsel %vm1554_vm3, %v10730_v6, 0.0 }
 0xb82   : > { %3665 = vrot.lane.b32.xlu0 %v10481_v59, %s9883_s28 }
 0xb8c   : > { %3741 = vrot.lane.b32.xlu1 %v10479_v57, %s9883_s28 }
 0xb90   : > { %3817 = vrot.lane.b32.xlu1 %v10489_v63, %s9883_s28 }
 0xb94   : > { %3893 = vrot.lane.b32.xlu1 %v10486_v61, %s9883_s28 }
 0xba1   : > { %3640 = vadd.xlane.f32.xlu0 %v3639_v3 }
 0xbb7   : > { %3992 = vrot.lane.b32.xlu0 %v10431_v39, %s9884_s20 }
 0xbb8   : > { %3643 = vadd.xlane.f32.xlu1 %v3642_v7 }
 0xbbb   : > { %3990 = vrot.lane.b32.xlu0 %v10444_v44, %s9884_s20 }
 0xbbf   : > { %4148 = vrot.lane.b32.xlu0 %v10456_v50, %s9884_s20 }
 0xbc3   : > { %4146 = vrot.lane.b32.xlu0 %v10465_v54, %s9884_s20 }
 0xbc9   : > { %4070 = vrot.lane.b32.xlu1 %v10429_v37, %s9884_s20 }
 0xbcd   : > { %4068 = vrot.lane.b32.xlu1 %v10441_v42, %s9884_s20 }
 0xbd1   : > { %4226 = vrot.lane.b32.xlu1 %v10452_v48, %s9884_s20 }
 0xbd5   : > { %4224 = vrot.lane.b32.xlu1 %v10460_v52, %s9884_s20 }
 0xbf9   : > { %v3635_v8 = vpop.xlane.xlu0 %3634 }
 0xbfa   : > { %9403 = vrcp.f32 %v3635_v8 }
 0xbfd   : > { %v3666_v9 = vpop.permute.xlu0 %3665 }
 0xbfe   : > { %8747 = vmatpush3.msra.mxu0 %v3666_v9 }
 0xbff   : > { %8756 = vmatprep.subr.mxu0 %v9879_v47 }
 0xc04   : > { %v9404_v10 = vpop.eup %9403 }
 0xc05   : > { %v3649_v23 = vmul.f32 %v9404_v10, %v3635_v8 }
 0xc07   : > { %v3653_v11 = vsub.f32 2.0, %v3649_v23 }
 0xc08   : > { %v3638_v12 = vpop.xlane.xlu1 %3637 }
 0xc09   : > { %v3657_v13 = vmul.f32 %v9404_v10, %v3653_v11  ;;  %9405 = vrcp.f32 %v3638_v12 }
 0xc0b   : > { %v3661_v26 = vmul.f32 %v9396_v43, %v3657_v13 }
 0xc0c   : > { %v3742_v16 = vpop.permute.xlu1 %3741 }
 0xc0d   : > { %8749 = vmatmul.mubr.msk.f32.vlgmr.msra.gmra.mrb[32].mxu0 %vm1554_vm3, %v3661_v26  ;;  %8752 = vmatpush3.msra.mxu1 %v3742_v16 }
 0xc0e   : > { %8761 = vmatprep.subr.mxu1 %v9879_v47  ;;  %8758 = vmatprep.mubr.msk.f32.mxu0 %vm9880_vm1, %v9879_v47 }
 0xc10   : > { %v3818_v18 = vpop.permute.xlu1 %3817 }
 0xc11   : > { %8757 = vmatpush3.msra.mxu0 %v3818_v18 }
 0xc12   : > { %8766 = vmatprep.subr.mxu0 %v9879_v47 }
 0xc13   : > { %v9406_v36 = vpop.eup %9405 }
 0xc14   : > { %v3650_v20 = vmul.f32 %v9406_v36, %v3638_v12  ;;  %v3894_v25 = vpop.permute.xlu1 %3893 }
 0xc16   : > { %v3654_v22 = vsub.f32 2.0, %v3650_v20 }
 0xc18   : > { %v3658_v32 = vmul.f32 %v9406_v36, %v3654_v22 }
 0xc1a   : > { %v3662_v24 = vmul.f32 %v9398_v58, %v3658_v32 }
 0xc1c   : > { %8754 = vmatmul.mubr.msk.f32.vlgmr.msra.gmra.mrb[36].mxu1 %vm1554_vm3, %v3662_v24 }
 0xc1d   : > { %8762 = vmatpush3.msra.mxu1 %v3894_v25  ;;  %8763 = vmatprep.mubr.msk.f32.mxu1 %vm9880_vm1, %v9879_v47 }
 0xc1e   : > { %8771 = vmatprep.subr.mxu1 %v9879_v47 }
 0xc2e   : > { %v3641_v28 = vpop.xlane.xlu0 %3640 }
 0xc2f   : > { %9407 = vrcp.f32 %v3641_v28 }
 0xc32   : > { %v3993_v29 = vpop.permute.xlu0 %3992 }
 0xc36   : > { %v3991_v31 = vpop.permute.xlu0 %3990 }
 0xc39   : > { %v9408_v21 = vpop.eup %9407 }
 0xc3a   : > { %v3651_v30 = vmul.f32 %v9408_v21, %v3641_v28  ;;  %v4149_v34 = vpop.permute.xlu0 %4148 }
 0xc3c   : > { %v3655_v46 = vsub.f32 2.0, %v3651_v30 }
 0xc3e   : > { %v3659_v35 = vmul.f32 %v9408_v21, %v3655_v46  ;;  %v4147_v43 = vpop.permute.xlu0 %4146 }
 0xc40   : > { %v3663_v33 = vmul.f32 %v9400_v1, %v3659_v35 }
 0xc42   : > { %8759 = vmatmul.mubr.msk.f32.vlgmr.msra.gmra.mrb[34].mxu0 %vm1554_vm3, %v3663_v33 }
 0xc43   : > { %8767 = vmatpush3.xpose.msk.msra.mxu0 %vm1249_vm2, %v3993_v29  ;;  %8768 = vmatprep.mubr.msk.f32.mxu0 %vm9880_vm1, %v9879_v47 }
 0xc44   : > { %8776 = vmatprep.subr.mxu0 %v9879_v47 }
 0xc45   : > { %v3644_v41 = vpop.xlane.xlu1 %3643 }
 0xc46   : > { %9409 = vrcp.f32 %v3644_v41  ;;  %8769 = vmatmul.mubr.msk.f32.vlgmr.msra.gmra.mrb[36].mxu0 %vm1249_vm2, %v3991_v31 }
 0xc47   : > { %8777 = vmatpush3.xpose.msk.msra.mxu0 %vm1249_vm2, %v4149_v34  ;;  %8778 = vmatprep.mubr.msk.f32.mxu0 %vm9880_vm1, %v9879_v47 }
 0xc48   : > { %8786 = vmatprep.subr.mxu0 %v9879_v47 }
 0xc49   : > { %v4071_v49 = vpop.permute.xlu1 %4070 }
 0xc4a   : > { %8779 = vmatmul.mubr.msk.f32.vlgmr.msra.gmra.mrb[38].mxu0 %vm1249_vm2, %v4147_v43 }
 0xc4b   : > { %8788 = vmatprep.mubr.msk.f32.mxu0 %vm9880_vm1, %v9879_v47 }
 0xc4d   : > { %v4069_v58 = vpop.permute.xlu1 %4068 }
 0xc50   : > { %v9410_v51 = vpop.eup %9409 }
 0xc51   : > { %v3652_v53 = vmul.f32 %v9410_v51, %v3644_v41  ;;  %v4227_v0 = vpop.permute.xlu1 %4226 }
 0xc53   : > { %v3656_v55 = vsub.f32 2.0, %v3652_v53 }
 0xc55   : > { %v3660_v60 = vmul.f32 %v9410_v51, %v3656_v55  ;;  %v4225_v19 = vpop.permute.xlu1 %4224 }
 0xc57   : > { %v3664_v62 = vmul.f32 %v10730_v6, %v3660_v60 }
 0xc59   : > { %8764 = vmatmul.mubr.msk.f32.vlgmr.msra.gmra.mrb[38].mxu1 %vm1554_vm3, %v3664_v62 }
 0xc5a   : > { %8772 = vmatpush3.xpose.msk.msra.mxu1 %vm1249_vm2, %v4071_v49  ;;  %8773 = vmatprep.mubr.msk.f32.mxu1 %vm9880_vm1, %v9879_v47 }
 0xc5b   : > { %8781 = vmatprep.subr.mxu1 %v9879_v47 }
 0xc5d   : > { %8774 = vmatmul.mubr.msk.f32.vlgmr.msra.gmra.mrb[40].mxu1 %vm1249_vm2, %v4069_v58 }
 0xc5e   : > { %8782 = vmatpush3.xpose.msk.msra.mxu1 %vm1249_vm2, %v4227_v0  ;;  %8783 = vmatprep.mubr.msk.f32.mxu1 %vm9880_vm1, %v9879_v47 }
 0xc5f   : > { %8791 = vmatprep.subr.mxu1 %v9879_v47 }
 0xc61   : > { %8784 = vmatmul.mubr.msk.f32.vlgmr.msra.gmra.mrb[42].mxu1 %vm1249_vm2, %v4225_v19 }
 0xc62   : > { %8793 = vmatprep.mubr.msk.f32.mxu1 %vm9880_vm1, %v9879_v47 }
 0xce0   : > { %v10787_v1 = vpop.f32.mrb[32].mxu0 }
 0xce1   : > { %v8750_v2 = vpop.f32.mrb[33].mxu0 }
 0xcef   : > { %v10789_v3 = vpop.f32.mrb[36].mxu1 }
 0xcf0   : > { %v8755_v4 = vpop.f32.mrb[37].mxu1 }
 0xd15   : > { %v10791_v5 = vpop.f32.mrb[34].mxu0 }
 0xd16   : > { %v8760_v6 = vpop.f32.mrb[35].mxu0 }
 0xd19   : > { %v4064_v7 = vpop.f32.mrb[36].mxu0 }
 0xd1a   : > { %v8770_v8 = vpop.f32.mrb[37].mxu0  ;;  %v4302_v9 = vsel %vm1554_vm3, %v4064_v7, -inf }
 0xd1b   : > { %4303 = vmax.xlane.f32.xlu0 %v4302_v9 }
 0xd1d   : > { %v4220_v10 = vpop.f32.mrb[38].mxu0 }
 0xd1e   : > { %v8780_v23 = vpop.f32.mrb[39].mxu0  ;;  %v4308_v11 = vsel %vm1554_vm3, %v4220_v10, -inf }
 0xd1f   : > { %4309 = vmax.xlane.f32.xlu0 %v4308_v11 }
 0xd2c   : > { %v10795_v12 = vpop.f32.mrb[38].mxu1 }
 0xd2d   : > { %v8765_v13 = vpop.f32.mrb[39].mxu1 }
 0xd30   : > { %v4142_v26 = vpop.f32.mrb[40].mxu1 }
 0xd31   : > { %v8775_v16 = vpop.f32.mrb[41].mxu1  ;;  %v4305_v18 = vsel %vm1554_vm3, %v4142_v26, -inf }
 0xd32   : > { %4306 = vmax.xlane.f32.xlu1 %v4305_v18 }
 0xd34   : > { %v4298_v36 = vpop.f32.mrb[42].mxu1 }
 0xd35   : > { %v8785_v20 = vpop.f32.mrb[43].mxu1  ;;  %v4311_v22 = vsel %vm1554_vm3, %v4298_v36, -inf }
 0xd36   : > { %4312 = vmax.xlane.f32.xlu0 %v4311_v22 }
 0xda8   : > { %v4304_v32 = vpop.xlane.xlu0 %4303 }
 0xda9   : > { %v4314_v24 = vsub.f32 %v4064_v7, %v4304_v32 }
 0xdab   : > { %v4318_v25 = vmul.f32 1.442695, %v4314_v24 }
 0xdac   : > { %v4310_v33 = vpop.xlane.xlu0 %4309 }
 0xdad   : > { %9411 = vpow2.f32 %v4318_v25  ;;  %v4316_v34 = vsub.f32 %v4220_v10, %v4310_v33 }
 0xdaf   : > { %v4322_v41 = vmul.f32 1.442695, %v4316_v34 }
 0xdb7   : > { %v9412_v28 = vpop.eup %9411 }
 0xdb8   : > { %v4326_v29 = vsel %vm1554_vm3, %v9412_v28, 0.0 }
 0xdb9   : > { %4327 = vadd.xlane.f32.xlu0 %v4326_v29 }
 0xdbf   : > { %v4307_v21 = vpop.xlane.xlu1 %4306 }
 0xdc0   : > { %v4315_v30 = vsub.f32 %v4142_v26, %v4307_v21 }
 0xdc2   : > { %v4320_v46 = vmul.f32 1.442695, %v4315_v30 }
 0xdc3   : > { %v4313_v51 = vpop.xlane.xlu0 %4312 }
 0xdc4   : > { %9413 = vpow2.f32 %v4320_v46  ;;  %v4317_v53 = vsub.f32 %v4298_v36, %v4313_v51 }
 0xdc5   : > { %9415 = vpow2.f32 %v4322_v41 }
 0xdc6   : > { %v4324_v55 = vmul.f32 1.442695, %v4317_v53 }
 0xdc8   : > { %9417 = vpow2.f32 %v4324_v55 }
 0xdce   : > { %v9414_v31 = vpop.eup %9413 }
 0xdcf   : > { %4358 = vrot.lane.b32.xlu0 %v10481_v59, %s9884_s20  ;;  %v4329_v35 = vsel %vm1554_vm3, %v9414_v31, 0.0  ;;  %v9416_v43 = vpop.eup %9415 }
 0xdd0   : > { %4330 = vadd.xlane.f32.xlu1 %v4329_v35  ;;  %v4332_v49 = vsel %vm1554_vm3, %v9416_v43, 0.0 }
 0xdd2   : > { %v10814_v58 = vpop.eup %9417 }
 0xdd3   : > { %v4335_v60 = vsel %vm1554_vm3, %v10814_v58, 0.0 }
 0xde1   : > { %4434 = vrot.lane.b32.xlu1 %v10479_v57, %s9884_s20 }
 0xde5   : > { %4510 = vrot.lane.b32.xlu1 %v10489_v63, %s9884_s20 }
 0xde9   : > { %4586 = vrot.lane.b32.xlu1 %v10486_v61, %s9884_s20 }
 0xdee   : > { %4333 = vadd.xlane.f32.xlu0 %v4332_v49 }
 0xe04   : > { %4685 = vrot.lane.b32.xlu0 %v10431_v39, %s9885_s18 }
 0xe08   : > { %4683 = vrot.lane.b32.xlu0 %v10444_v44, %s9885_s18 }
 0xe0c   : > { %4841 = vrot.lane.b32.xlu0 %v10456_v50, %s9885_s18 }
 0xe0d   : > { %4336 = vadd.xlane.f32.xlu1 %v4335_v60 }
 0xe10   : > { %4839 = vrot.lane.b32.xlu0 %v10465_v54, %s9885_s18 }
 0xe1e   : > { %4763 = vrot.lane.b32.xlu1 %v10429_v37, %s9885_s18 }
 0xe22   : > { %4761 = vrot.lane.b32.xlu1 %v10441_v42, %s9885_s18 }
 0xe26   : > { %4919 = vrot.lane.b32.xlu1 %v10452_v48, %s9885_s18 }
 0xe2a   : > { %4917 = vrot.lane.b32.xlu1 %v10460_v52, %s9885_s18 }
 0xe46   : > { %v4328_v62 = vpop.xlane.xlu0 %4327 }
 0xe47   : > { %9419 = vrcp.f32 %v4328_v62 }
 0xe4a   : > { %v4359_v0 = vpop.permute.xlu0 %4358 }
 0xe4b   : > { %8787 = vmatpush3.msra.mxu0 %v4359_v0 }
 0xe4c   : > { %8796 = vmatprep.subr.mxu0 %v9879_v47 }
 0xe51   : > { %v9420_v19 = vpop.eup %9419 }
 0xe52   : > { %v4342_v2 = vmul.f32 %v9420_v19, %v4328_v62 }
 0xe54   : > { %v4346_v4 = vsub.f32 2.0, %v4342_v2 }
 0xe56   : > { %v4350_v6 = vmul.f32 %v9420_v19, %v4346_v4 }
 0xe58   : > { %v4354_v7 = vmul.f32 %v9412_v28, %v4350_v6 }
 0xe5a   : > { %8789 = vmatmul.mubr.msk.f32.vlgmr.msra.gmra.mrb[40].mxu0 %vm1554_vm3, %v4354_v7 }
 0xe5b   : > { %8798 = vmatprep.mubr.msk.f32.mxu0 %vm9880_vm1, %v9879_v47 }
 0xe5d   : > { %v4331_v8 = vpop.xlane.xlu1 %4330 }
 0xe5e   : > { %9421 = vrcp.f32 %v4331_v8 }
 0xe61   : > { %v4435_v9 = vpop.permute.xlu1 %4434 }
 0xe62   : > { %8792 = vmatpush3.msra.mxu1 %v4435_v9 }
 0xe63   : > { %8801 = vmatprep.subr.mxu1 %v9879_v47 }
 0xe65   : > { %v4511_v10 = vpop.permute.xlu1 %4510 }
 0xe66   : > { %8797 = vmatpush3.msra.mxu0 %v4511_v10 }
 0xe67   : > { %8806 = vmatprep.subr.mxu0 %v9879_v47 }
 0xe68   : > { %v9422_v23 = vpop.eup %9421 }
 0xe69   : > { %v4343_v11 = vmul.f32 %v9422_v23, %v4331_v8  ;;  %v4587_v18 = vpop.permute.xlu1 %4586 }
 0xe6b   : > { %v4347_v13 = vsub.f32 2.0, %v4343_v11 }
 0xe6d   : > { %v4351_v26 = vmul.f32 %v9422_v23, %v4347_v13 }
 0xe6f   : > { %v4355_v16 = vmul.f32 %v9414_v31, %v4351_v26 }
 0xe71   : > { %8794 = vmatmul.mubr.msk.f32.vlgmr.msra.gmra.mrb[44].mxu1 %vm1554_vm3, %v4355_v16 }
 0xe72   : > { %8802 = vmatpush3.msra.mxu1 %v4587_v18  ;;  %8803 = vmatprep.mubr.msk.f32.mxu1 %vm9880_vm1, %v9879_v47 }
 0xe73   : > { %8811 = vmatprep.subr.mxu1 %v9879_v47 }
 0xe7b   : > { %v4334_v36 = vpop.xlane.xlu0 %4333 }
 0xe7c   : > { %9423 = vrcp.f32 %v4334_v36 }
 0xe7f   : > { %v4686_v20 = vpop.permute.xlu0 %4685 }
 0xe83   : > { %v4684_v25 = vpop.permute.xlu0 %4683 }
 0xe86   : > { %v9424_v22 = vpop.eup %9423 }
 0xe87   : > { %v4344_v32 = vmul.f32 %v9424_v22, %v4334_v36  ;;  %v4842_v21 = vpop.permute.xlu0 %4841 }
 0xe89   : > { %v4348_v24 = vsub.f32 2.0, %v4344_v32 }
 0xe8b   : > { %v4352_v28 = vmul.f32 %v9424_v22, %v4348_v24  ;;  %v4840_v30 = vpop.permute.xlu0 %4839 }
 0xe8d   : > { %v4356_v29 = vmul.f32 %v9416_v43, %v4352_v28 }
 0xe8f   : > { %8799 = vmatmul.mubr.msk.f32.vlgmr.msra.gmra.mrb[42].mxu0 %vm1554_vm3, %v4356_v29 }
 0xe90   : > { %8807 = vmatpush3.xpose.msk.msra.mxu0 %vm1249_vm2, %v4686_v20  ;;  %8808 = vmatprep.mubr.msk.f32.mxu0 %vm9880_vm1, %v9879_v47 }
 0xe91   : > { %8816 = vmatprep.subr.mxu0 %v9879_v47 }
 0xe93   : > { %8809 = vmatmul.mubr.msk.f32.vlgmr.msra.gmra.mrb[44].mxu0 %vm1249_vm2, %v4684_v25 }
 0xe94   : > { %8817 = vmatpush3.xpose.msk.msra.mxu0 %vm1249_vm2, %v4842_v21  ;;  %8818 = vmatprep.mubr.msk.f32.mxu0 %vm9880_vm1, %v9879_v47 }
 0xe95   : > { %8826 = vmatprep.subr.mxu0 %v9879_v47 }
 0xe97   : > { %8819 = vmatmul.mubr.msk.f32.vlgmr.msra.gmra.mrb[46].mxu0 %vm1249_vm2, %v4840_v30 }
 0xe98   : > { %8828 = vmatprep.mubr.msk.f32.mxu0 %vm9880_vm1, %v9879_v47 }
 0xe9a   : > { %v4337_v46 = vpop.xlane.xlu1 %4336 }
 0xe9b   : > { %9425 = vrcp.f32 %v4337_v46 }
 0xe9e   : > { %v4764_v31 = vpop.permute.xlu1 %4763 }
 0xea2   : > { %v4762_v41 = vpop.permute.xlu1 %4761 }
 0xea5   : > { %v9426_v35 = vpop.eup %9425 }
 0xea6   : > { %v4345_v33 = vmul.f32 %v9426_v35, %v4337_v46  ;;  %v4920_v51 = vpop.permute.xlu1 %4919 }
 0xea8   : > { %v4349_v34 = vsub.f32 2.0, %v4345_v33 }
 0xeaa   : > { %v4353_v43 = vmul.f32 %v9426_v35, %v4349_v34  ;;  %v4918_v53 = vpop.permute.xlu1 %4917 }
 0xeac   : > { %v4357_v49 = vmul.f32 %v10814_v58, %v4353_v43 }
 0xeae   : > { %8804 = vmatmul.mubr.msk.f32.vlgmr.msra.gmra.mrb[46].mxu1 %vm1554_vm3, %v4357_v49 }
 0xeaf   : > { %8812 = vmatpush3.xpose.msk.msra.mxu1 %vm1249_vm2, %v4764_v31  ;;  %8813 = vmatprep.mubr.msk.f32.mxu1 %vm9880_vm1, %v9879_v47 }
 0xeb0   : > { %8821 = vmatprep.subr.mxu1 %v9879_v47 }
 0xeb2   : > { %8814 = vmatmul.mubr.msk.f32.vlgmr.msra.gmra.mrb[48].mxu1 %vm1249_vm2, %v4762_v41 }
 0xeb3   : > { %8822 = vmatpush3.xpose.msk.msra.mxu1 %vm1249_vm2, %v4920_v51  ;;  %8823 = vmatprep.mubr.msk.f32.mxu1 %vm9880_vm1, %v9879_v47 }
 0xeb4   : > { %8831 = vmatprep.subr.mxu1 %v9879_v47 }
 0xeb6   : > { %8824 = vmatmul.mubr.msk.f32.vlgmr.msra.gmra.mrb[50].mxu1 %vm1249_vm2, %v4918_v53 }
 0xeb7   : > { %8833 = vmatprep.mubr.msk.f32.mxu1 %vm9880_vm1, %v9879_v47 }
 0xf2d   : > { %v10867_v55 = vpop.f32.mrb[40].mxu0 }
 0xf2e   : > { %v8790_v58 = vpop.f32.mrb[41].mxu0 }
 0xf44   : > { %v10869_v60 = vpop.f32.mrb[44].mxu1 }
 0xf45   : > { %v8795_v62 = vpop.f32.mrb[45].mxu1 }
 0xf62   : > { %v10871_v0 = vpop.f32.mrb[42].mxu0 }
 0xf63   : > { %v8800_v19 = vpop.f32.mrb[43].mxu0 }
 0xf66   : > { %v4757_v2 = vpop.f32.mrb[44].mxu0 }
 0xf67   : > { %v8810_v4 = vpop.f32.mrb[45].mxu0  ;;  %v4995_v6 = vsel %vm1554_vm3, %v4757_v2, -inf }
 0xf68   : > { %4996 = vmax.xlane.f32.xlu0 %v4995_v6 }
 0xf6a   : > { %v4913_v7 = vpop.f32.mrb[46].mxu0 }
 0xf6b   : > { %v8820_v8 = vpop.f32.mrb[47].mxu0  ;;  %v5001_v9 = vsel %vm1554_vm3, %v4913_v7, -inf }
 0xf6c   : > { %5002 = vmax.xlane.f32.xlu0 %v5001_v9 }
 0xf81   : > { %v10875_v10 = vpop.f32.mrb[46].mxu1 }
 0xf82   : > { %v8805_v23 = vpop.f32.mrb[47].mxu1 }
 0xf85   : > { %v4835_v11 = vpop.f32.mrb[48].mxu1 }
 0xf86   : > { %v8815_v13 = vpop.f32.mrb[49].mxu1  ;;  %v4998_v26 = vsel %vm1554_vm3, %v4835_v11, -inf }
 0xf87   : > { %4999 = vmax.xlane.f32.xlu1 %v4998_v26 }
 0xf89   : > { %v4991_v16 = vpop.f32.mrb[50].mxu1 }
 0xf8a   : > { %v8825_v18 = vpop.f32.mrb[51].mxu1  ;;  %v5004_v36 = vsel %vm1554_vm3, %v4991_v16, -inf }
 0xf8b   : > { %5005 = vmax.xlane.f32.xlu0 %v5004_v36 }
 0xff5   : > { %v4997_v20 = vpop.xlane.xlu0 %4996 }
 0xff6   : > { %v5007_v22 = vsub.f32 %v4757_v2, %v4997_v20 }
 0xff8   : > { %v5011_v32 = vmul.f32 1.442695, %v5007_v22 }
 0xff9   : > { %v5003_v30 = vpop.xlane.xlu0 %5002 }
 0xffa   : > { %9427 = vpow2.f32 %v5011_v32  ;;  %v5009_v35 = vsub.f32 %v4913_v7, %v5003_v30 }
 0xffc   : > { %v5015_v33 = vmul.f32 1.442695, %v5009_v35 }
0x1004   : > { %v9428_v24 = vpop.eup %9427 }
0x1005   : > { %v5019_v25 = vsel %vm1554_vm3, %v9428_v24, 0.0 }
0x1006   : > { %5020 = vadd.xlane.f32.xlu0 %v5019_v25 }
0x1014   : > { %v5000_v28 = vpop.xlane.xlu1 %4999 }
0x1015   : > { %v5008_v29 = vsub.f32 %v4835_v11, %v5000_v28 }
0x1017   : > { %v5013_v21 = vmul.f32 1.442695, %v5008_v29 }
0x1018   : > { %v5006_v43 = vpop.xlane.xlu0 %5005 }
0x1019   : > { %9429 = vpow2.f32 %v5013_v21  ;;  %v5010_v49 = vsub.f32 %v4991_v16, %v5006_v43 }
0x101a   : > { %9431 = vpow2.f32 %v5015_v33 }
0x101b   : > { %v5017_v51 = vmul.f32 1.442695, %v5010_v49 }
0x101c   : > { %5051 = vrot.lane.b32.xlu0 %v10481_v59, %s9885_s18 }
0x101d   : > { %9433 = vpow2.f32 %v5017_v51 }
0x1023   : > { %v9430_v46 = vpop.eup %9429 }
0x1024   : > { %v5022_v31 = vsel %vm1554_vm3, %v9430_v46, 0.0  ;;  %v9432_v34 = vpop.eup %9431 }
0x1025   : > { %5023 = vadd.xlane.f32.xlu1 %v5022_v31  ;;  %v5025_v41 = vsel %vm1554_vm3, %v9432_v34, 0.0 }
0x1027   : > { %v10898_v53 = vpop.eup %9433 }
0x1028   : > { %v5028_v58 = vsel %vm1554_vm3, %v10898_v53, 0.0 }
0x1036   : > { %5127 = vrot.lane.b32.xlu1 %v10479_v57, %s9885_s18 }
0x103a   : > { %5203 = vrot.lane.b32.xlu1 %v10489_v63, %s9885_s18 }
0x103b   : > { %5026 = vadd.xlane.f32.xlu0 %v5025_v41 }
0x103e   : > { %5279 = vrot.lane.b32.xlu1 %v10486_v61, %s9885_s18 }
0x1051   : > { %5378 = vrot.lane.b32.xlu0 %v10431_v39, %s9886_s6 }
0x1055   : > { %5376 = vrot.lane.b32.xlu0 %v10444_v44, %s9886_s6 }
0x1059   : > { %5534 = vrot.lane.b32.xlu0 %v10456_v50, %s9886_s6 }
0x105d   : > { %5532 = vrot.lane.b32.xlu0 %v10465_v54, %s9886_s6 }
0x1062   : > { %5029 = vadd.xlane.f32.xlu1 %v5028_v58 }
0x1073   : > { %5456 = vrot.lane.b32.xlu1 %v10429_v37, %s9886_s6 }
0x1077   : > { %5454 = vrot.lane.b32.xlu1 %v10441_v42, %s9886_s6 }
0x107b   : > { %5612 = vrot.lane.b32.xlu1 %v10452_v48, %s9886_s6 }
0x107f   : > { %5610 = vrot.lane.b32.xlu1 %v10460_v52, %s9886_s6 }
0x1093   : > { %v5021_v62 = vpop.xlane.xlu0 %5020 }
0x1094   : > { %9435 = vrcp.f32 %v5021_v62 }
0x1097   : > { %v5052_v19 = vpop.permute.xlu0 %5051 }
0x1098   : > { %8827 = vmatpush3.msra.mxu0 %v5052_v19 }
0x1099   : > { %8836 = vmatprep.subr.mxu0 %v9879_v47 }
0x109e   : > { %v9436_v2 = vpop.eup %9435 }
0x109f   : > { %v5035_v4 = vmul.f32 %v9436_v2, %v5021_v62 }
0x10a1   : > { %v5039_v6 = vsub.f32 2.0, %v5035_v4 }
0x10a3   : > { %v5043_v7 = vmul.f32 %v9436_v2, %v5039_v6 }
0x10a5   : > { %v5047_v8 = vmul.f32 %v9428_v24, %v5043_v7 }
0x10a7   : > { %8829 = vmatmul.mubr.msk.f32.vlgmr.msra.gmra.mrb[48].mxu0 %vm1554_vm3, %v5047_v8 }
0x10a8   : > { %8838 = vmatprep.mubr.msk.f32.mxu0 %vm9880_vm1, %v9879_v47 }
0x10b2   : > { %v5024_v9 = vpop.xlane.xlu1 %5023 }
0x10b3   : > { %9437 = vrcp.f32 %v5024_v9 }
0x10b6   : > { %v5128_v23 = vpop.permute.xlu1 %5127 }
0x10b7   : > { %8832 = vmatpush3.msra.mxu1 %v5128_v23 }
0x10b8   : > { %8841 = vmatprep.subr.mxu1 %v9879_v47 }
0x10ba   : > { %v5204_v11 = vpop.permute.xlu1 %5203 }
0x10bb   : > { %8837 = vmatpush3.msra.mxu0 %v5204_v11 }
0x10bc   : > { %8846 = vmatprep.subr.mxu0 %v9879_v47 }
0x10bd   : > { %v9438_v13 = vpop.eup %9437 }
0x10be   : > { %v5036_v26 = vmul.f32 %v9438_v13, %v5024_v9  ;;  %v5280_v20 = vpop.permute.xlu1 %5279 }
0x10c0   : > { %v5040_v16 = vsub.f32 2.0, %v5036_v26 }
0x10c2   : > { %v5044_v18 = vmul.f32 %v9438_v13, %v5040_v16 }
0x10c4   : > { %v5048_v36 = vmul.f32 %v9430_v46, %v5044_v18 }
0x10c6   : > { %8834 = vmatmul.mubr.msk.f32.vlgmr.msra.gmra.mrb[52].mxu1 %vm1554_vm3, %v5048_v36 }
0x10c7   : > { %8842 = vmatpush3.msra.mxu1 %v5280_v20  ;;  %8843 = vmatprep.mubr.msk.f32.mxu1 %vm9880_vm1, %v9879_v47 }
0x10c8   : > { %v5027_v22 = vpop.xlane.xlu0 %5026  ;;  %8851 = vmatprep.subr.mxu1 %v9879_v47 }
0x10c9   : > { %9439 = vrcp.f32 %v5027_v22 }
0x10cc   : > { %v5379_v32 = vpop.permute.xlu0 %5378 }
0x10d0   : > { %v5377_v29 = vpop.permute.xlu0 %5376 }
0x10d3   : > { %v9440_v24 = vpop.eup %9439 }
0x10d4   : > { %v5037_v25 = vmul.f32 %v9440_v24, %v5027_v22  ;;  %v5535_v46 = vpop.permute.xlu0 %5534 }
0x10d6   : > { %v5041_v28 = vsub.f32 2.0, %v5037_v25 }
0x10d8   : > { %v5045_v21 = vmul.f32 %v9440_v24, %v5041_v28  ;;  %v5533_v31 = vpop.permute.xlu0 %5532 }
0x10da   : > { %v5049_v30 = vmul.f32 %v9432_v34, %v5045_v21 }
0x10dc   : > { %8839 = vmatmul.mubr.msk.f32.vlgmr.msra.gmra.mrb[50].mxu0 %vm1554_vm3, %v5049_v30 }
0x10dd   : > { %8847 = vmatpush3.xpose.msk.msra.mxu0 %vm1249_vm2, %v5379_v32  ;;  %8848 = vmatprep.mubr.msk.f32.mxu0 %vm9880_vm1, %v9879_v47 }
0x10de   : > { %8856 = vmatprep.subr.mxu0 %v9879_v47 }
0x10e0   : > { %8849 = vmatmul.mubr.msk.f32.vlgmr.msra.gmra.mrb[52].mxu0 %vm1249_vm2, %v5377_v29 }
0x10e1   : > { %8857 = vmatpush3.xpose.msk.msra.mxu0 %vm1249_vm2, %v5535_v46  ;;  %8858 = vmatprep.mubr.msk.f32.mxu0 %vm9880_vm1, %v9879_v47 }
0x10e2   : > { %8866 = vmatprep.subr.mxu0 %v9879_v47 }
0x10e4   : > { %8859 = vmatmul.mubr.msk.f32.vlgmr.msra.gmra.mrb[54].mxu0 %vm1249_vm2, %v5533_v31 }
0x10e5   : > { %8868 = vmatprep.mubr.msk.f32.mxu0 %vm9880_vm1, %v9879_v47 }
0x10ef   : > { %v5030_v35 = vpop.xlane.xlu1 %5029 }
0x10f0   : > { %9441 = vrcp.f32 %v5030_v35 }
0x10f3   : > { %v5457_v33 = vpop.permute.xlu1 %5456 }
0x10f7   : > { %v5455_v49 = vpop.permute.xlu1 %5454 }
0x10fa   : > { %v9442_v34 = vpop.eup %9441 }
0x10fb   : > { %v5038_v41 = vmul.f32 %v9442_v34, %v5030_v35  ;;  %v5613_v62 = vpop.permute.xlu1 %5612 }
0x10fd   : > { %v5042_v43 = vsub.f32 2.0, %v5038_v41 }
0x10ff   : > { %v5046_v51 = vmul.f32 %v9442_v34, %v5042_v43 }
0x1101   : > { %v5050_v58 = vmul.f32 %v10898_v53, %v5046_v51  ;;  %v5611_v53 = vpop.permute.xlu1 %5610 }
0x1103   : > { %8844 = vmatmul.mubr.msk.f32.vlgmr.msra.gmra.mrb[54].mxu1 %vm1554_vm3, %v5050_v58 }
0x1104   : > { %8852 = vmatpush3.xpose.msk.msra.mxu1 %vm1249_vm2, %v5457_v33  ;;  %8853 = vmatprep.mubr.msk.f32.mxu1 %vm9880_vm1, %v9879_v47 }
0x1105   : > { %8861 = vmatprep.subr.mxu1 %v9879_v47 }
0x1107   : > { %8854 = vmatmul.mubr.msk.f32.vlgmr.msra.gmra.mrb[56].mxu1 %vm1249_vm2, %v5455_v49 }
0x1108   : > { %8862 = vmatpush3.xpose.msk.msra.mxu1 %vm1249_vm2, %v5613_v62  ;;  %8863 = vmatprep.mubr.msk.f32.mxu1 %vm9880_vm1, %v9879_v47 }
0x1109   : > { %8871 = vmatprep.subr.mxu1 %v9879_v47 }
0x110b   : > { %8864 = vmatmul.mubr.msk.f32.vlgmr.msra.gmra.mrb[58].mxu1 %vm1249_vm2, %v5611_v53 }
0x110c   : > { %8873 = vmatprep.mubr.msk.f32.mxu1 %vm9880_vm1, %v9879_v47 }
0x117a   : > { %v10947_v19 = vpop.f32.mrb[48].mxu0 }
0x117b   : > { %v8830_v2 = vpop.f32.mrb[49].mxu0 }
0x1199   : > { %v10949_v4 = vpop.f32.mrb[52].mxu1 }
0x119a   : > { %v8835_v6 = vpop.f32.mrb[53].mxu1 }
0x11af   : > { %v10951_v7 = vpop.f32.mrb[50].mxu0 }
0x11b0   : > { %v8840_v8 = vpop.f32.mrb[51].mxu0 }
0x11b3   : > { %v5450_v9 = vpop.f32.mrb[52].mxu0 }
0x11b4   : > { %v8850_v23 = vpop.f32.mrb[53].mxu0  ;;  %v5688_v11 = vsel %vm1554_vm3, %v5450_v9, -inf }
0x11b5   : > { %5689 = vmax.xlane.f32.xlu0 %v5688_v11 }
0x11b7   : > { %v5606_v13 = vpop.f32.mrb[54].mxu0 }
0x11b8   : > { %v8860_v26 = vpop.f32.mrb[55].mxu0  ;;  %v5694_v16 = vsel %vm1554_vm3, %v5606_v13, -inf }
0x11b9   : > { %5695 = vmax.xlane.f32.xlu0 %v5694_v16 }
0x11d6   : > { %v10955_v18 = vpop.f32.mrb[54].mxu1 }
0x11d7   : > { %v8845_v36 = vpop.f32.mrb[55].mxu1 }
0x11da   : > { %v5528_v20 = vpop.f32.mrb[56].mxu1 }
0x11db   : > { %v8855_v22 = vpop.f32.mrb[57].mxu1  ;;  %v5691_v32 = vsel %vm1554_vm3, %v5528_v20, -inf }
0x11dc   : > { %5692 = vmax.xlane.f32.xlu1 %v5691_v32 }
0x11de   : > { %v5684_v24 = vpop.f32.mrb[58].mxu1 }
0x11df   : > { %v8865_v25 = vpop.f32.mrb[59].mxu1  ;;  %v5697_v28 = vsel %vm1554_vm3, %v5684_v24, -inf }
0x11e0   : > { %5698 = vmax.xlane.f32.xlu0 %v5697_v28 }
0x1242   : > { %v5690_v29 = vpop.xlane.xlu0 %5689 }
0x1243   : > { %v5700_v21 = vsub.f32 %v5450_v9, %v5690_v29 }
0x1245   : > { %v5704_v30 = vmul.f32 1.442695, %v5700_v21 }
0x1246   : > { %v5696_v46 = vpop.xlane.xlu0 %5695 }
0x1247   : > { %9443 = vpow2.f32 %v5704_v30  ;;  %v5702_v31 = vsub.f32 %v5606_v13, %v5696_v46 }
0x1249   : > { %v5708_v35 = vmul.f32 1.442695, %v5702_v31 }
0x124b   : > { %9445 = vpow2.f32 %v5708_v35 }
0x1251   : > { %v9444_v33 = vpop.eup %9443 }
0x1252   : > { %v5712_v34 = vsel %vm1554_vm3, %v9444_v33, 0.0 }
0x1253   : > { %5713 = vadd.xlane.f32.xlu0 %v5712_v34 }
0x1255   : > { %v9446_v41 = vpop.eup %9445 }
0x1256   : > { %v5718_v43 = vsel %vm1554_vm3, %v9446_v41, 0.0 }
0x1257   : > { %5719 = vadd.xlane.f32.xlu0 %v5718_v43 }
0x1269   : > { %v5693_v49 = vpop.xlane.xlu1 %5692 }
0x126a   : > { %v5701_v51 = vsub.f32 %v5528_v20, %v5693_v49 }
0x126c   : > { %v5706_v58 = vmul.f32 1.442695, %v5701_v51 }
0x126d   : > { %5744 = vrot.lane.b32.xlu0 %v10481_v59, %s9886_s6  ;;  %v5699_v62 = vpop.xlane.xlu0 %5698 }
0x126e   : > { %9447 = vpow2.f32 %v5706_v58  ;;  %v5703_v53 = vsub.f32 %v5684_v24, %v5699_v62 }
0x1270   : > { %v5710_v2 = vmul.f32 1.442695, %v5703_v53 }
0x1271   : > { %6071 = vrot.lane.b32.xlu0 %v10431_v39, %s9887_s11 }
0x1272   : > { %9449 = vpow2.f32 %v5710_v2 }
0x1275   : > { %6069 = vrot.lane.b32.xlu0 %v10444_v44, %s9887_s11 }
0x1278   : > { %v9448_v6 = vpop.eup %9447 }
0x1279   : > { %6227 = vrot.lane.b32.xlu0 %v10456_v50, %s9887_s11  ;;  %v5715_v8 = vsel %vm1554_vm3, %v9448_v6, 0.0 }
0x127a   : > { %5716 = vadd.xlane.f32.xlu1 %v5715_v8 }
0x127c   : > { %v9450_v9 = vpop.eup %9449 }
0x127d   : > { %6225 = vrot.lane.b32.xlu0 %v10465_v54, %s9887_s11  ;;  %v5721_v23 = vsel %vm1554_vm3, %v9450_v9, 0.0 }
0x127e   : > { %5722 = vadd.xlane.f32.xlu1 %v5721_v23 }
0x128f   : > { %5820 = vrot.lane.b32.xlu1 %v10479_v57, %s9886_s6 }
0x1293   : > { %5896 = vrot.lane.b32.xlu1 %v10489_v63, %s9886_s6 }
0x1297   : > { %5972 = vrot.lane.b32.xlu1 %v10486_v61, %s9886_s6 }
0x129b   : > { %6149 = vrot.lane.b32.xlu1 %v10429_v37, %s9887_s11 }
0x129f   : > { %6147 = vrot.lane.b32.xlu1 %v10441_v42, %s9887_s11 }
0x12a3   : > { %6305 = vrot.lane.b32.xlu1 %v10452_v48, %s9887_s11 }
0x12a7   : > { %6303 = vrot.lane.b32.xlu1 %v10460_v52, %s9887_s11 }
0x12e0   : > { %v5714_v39 = vpop.xlane.xlu0 %5713 }
0x12e1   : > { %9451 = vrcp.f32 %v5714_v39 }
0x12e4   : > { %v5720_v44 = vpop.xlane.xlu0 %5719 }
0x12e5   : > { %9453 = vrcp.f32 %v5720_v44 }
0x12e8   : > { %v5745_v50 = vpop.permute.xlu0 %5744 }
0x12e9   : > { %8867 = vmatpush3.msra.mxu0 %v5745_v50 }
0x12ea   : > { %8876 = vmatprep.subr.mxu0 %v9879_v47 }
0x12eb   : > { %v9452_v54 = vpop.eup %9451 }
0x12ec   : > { %v5728_v11 = vmul.f32 %v9452_v54, %v5714_v39  ;;  %v6072_v22 = vpop.permute.xlu0 %6071 }
0x12ee   : > { %v5732_v13 = vsub.f32 2.0, %v5728_v11 }
0x12ef   : > { %v9454_v42 = vpop.eup %9453 }
0x12f0   : > { %v5736_v37 = vmul.f32 %v9452_v54, %v5732_v13  ;;  %v5730_v48 = vmul.f32 %v9454_v42, %v5720_v44  ;;  %v6070_v21 = vpop.permute.xlu0 %6069 }
0x12f2   : > { %v5740_v26 = vmul.f32 %v9444_v33, %v5736_v37  ;;  %v5734_v16 = vsub.f32 2.0, %v5730_v48 }
0x12f4   : > { %8869 = vmatmul.mubr.msk.f32.vlgmr.msra.gmra.mrb[56].mxu0 %vm1554_vm3, %v5740_v26  ;;  %v5738_v20 = vmul.f32 %v9454_v42, %v5734_v16  ;;  %v6228_v49 = vpop.permute.xlu0 %6227 }
0x12f5   : > { %8878 = vmatprep.mubr.msk.f32.mxu0 %vm9880_vm1, %v9879_v47 }
0x12f6   : > { %v5742_v25 = vmul.f32 %v9446_v41, %v5738_v20 }
0x12f8   : > { %v6226_v53 = vpop.permute.xlu0 %6225 }
0x1307   : > { %v5717_v52 = vpop.xlane.xlu1 %5716 }
0x1308   : > { %9455 = vrcp.f32 %v5717_v52 }
0x130b   : > { %v5723_v36 = vpop.xlane.xlu1 %5722 }
0x130c   : > { %9457 = vrcp.f32 %v5723_v36 }
0x130f   : > { %v5821_v32 = vpop.permute.xlu1 %5820 }
0x1310   : > { %8872 = vmatpush3.msra.mxu1 %v5821_v32 }
0x1311   : > { %8881 = vmatprep.subr.mxu1 %v9879_v47 }
0x1312   : > { %v9456_v24 = vpop.eup %9455 }
0x1313   : > { %v5729_v28 = vmul.f32 %v9456_v24, %v5717_v52  ;;  %v5897_v29 = vpop.permute.xlu1 %5896 }
0x1314   : > { %8877 = vmatpush3.msra.mxu0 %v5897_v29 }
0x1315   : > { %v5733_v30 = vsub.f32 2.0, %v5729_v28  ;;  %8879 = vmatmul.mubr.msk.f32.vlgmr.msra.gmra.mrb[58].mxu0 %vm1554_vm3, %v5742_v25  ;;  %8886 = vmatprep.subr.mxu0 %v9879_v47 }
0x1316   : > { %v9458_v46 = vpop.eup %9457  ;;  %8888 = vmatprep.mubr.msk.f32.mxu0 %vm9880_vm1, %v9879_v47 }
0x1317   : > { %v5737_v31 = vmul.f32 %v9456_v24, %v5733_v30  ;;  %v5731_v35 = vmul.f32 %v9458_v46, %v5723_v36  ;;  %v5973_v33 = vpop.permute.xlu1 %5972 }
0x1319   : > { %v5741_v34 = vmul.f32 %v9448_v6, %v5737_v31  ;;  %v5735_v43 = vsub.f32 2.0, %v5731_v35 }
0x131b   : > { %v5739_v41 = vmul.f32 %v9458_v46, %v5735_v43  ;;  %8874 = vmatmul.mubr.msk.f32.vlgmr.msra.gmra.mrb[60].mxu1 %vm1554_vm3, %v5741_v34  ;;  %8887 = vmatpush3.xpose.msk.msra.mxu0 %vm1249_vm2, %v6072_v22  ;;  %v6150_v51 = vpop.permute.xlu1 %6149 }
0x131c   : > { %8882 = vmatpush3.msra.mxu1 %v5973_v33  ;;  %8883 = vmatprep.mubr.msk.f32.mxu1 %vm9880_vm1, %v9879_v47 }
0x131d   : > { %v5743_v58 = vmul.f32 %v9450_v9, %v5739_v41  ;;  %8896 = vmatprep.subr.mxu0 %v9879_v47  ;;  %8891 = vmatprep.subr.mxu1 %v9879_v47 }
0x131e   : > { %8889 = vmatmul.mubr.msk.f32.vlgmr.msra.gmra.mrb[60].mxu0 %vm1249_vm2, %v6070_v21 }
0x131f   : > { %8884 = vmatmul.mubr.msk.f32.vlgmr.msra.gmra.mrb[62].mxu1 %vm1554_vm3, %v5743_v58  ;;  %8897 = vmatpush3.xpose.msk.msra.mxu0 %vm1249_vm2, %v6228_v49  ;;  %v6148_v62 = vpop.permute.xlu1 %6147 }
0x1320   : > { %8898 = vmatprep.mubr.msk.f32.mxu0 %vm9880_vm1, %v9879_v47  ;;  %8893 = vmatprep.mubr.msk.f32.mxu1 %vm9880_vm1, %v9879_v47 }
0x1321   : > { %8906 = vmatprep.subr.mxu0 %v9879_v47 }
0x1322   : > { %8899 = vmatmul.mubr.msk.f32.vlgmr.msra.gmra.mrb[62].mxu0 %vm1249_vm2, %v6226_v53 }
0x1323   : > { %8892 = vmatpush3.xpose.msk.msra.mxu1 %vm1249_vm2, %v6150_v51  ;;  %v6306_v2 = vpop.permute.xlu1 %6305  ;;  %8908 = vmatprep.mubr.msk.f32.mxu0 %vm9880_vm1, %v9879_v47 }
0x1324   : > { %8901 = vmatprep.subr.mxu1 %v9879_v47 }
0x1326   : > { %8894 = vmatmul.mubr.msk.f32.vlgmr.msra.gmra.mrb[64].mxu1 %vm1249_vm2, %v6148_v62 }
0x1327   : > { %8902 = vmatpush3.xpose.msk.msra.mxu1 %vm1249_vm2, %v6306_v2  ;;  %v6304_v6 = vpop.permute.xlu1 %6303  ;;  %8903 = vmatprep.mubr.msk.f32.mxu1 %vm9880_vm1, %v9879_v47 }
0x1328   : > { %8911 = vmatprep.subr.mxu1 %v9879_v47 }
0x132a   : > { %8904 = vmatmul.mubr.msk.f32.vlgmr.msra.gmra.mrb[66].mxu1 %vm1249_vm2, %v6304_v6 }
0x132b   : > { %8913 = vmatprep.mubr.msk.f32.mxu1 %vm9880_vm1, %v9879_v47 }
0x13c7   : > { %v11023_v8 = vpop.f32.mrb[56].mxu0 }
0x13c8   : > { %v8870_v9 = vpop.f32.mrb[57].mxu0 }
0x13e8   : > { %v11025_v23 = vpop.f32.mrb[58].mxu0 }
0x13e9   : > { %v8880_v39 = vpop.f32.mrb[59].mxu0 }
0x13ee   : > { %v11027_v44 = vpop.f32.mrb[60].mxu1 }
0x13ef   : > { %v8875_v50 = vpop.f32.mrb[61].mxu1 }
0x13f1   : > { %v6143_v54 = vpop.f32.mrb[60].mxu0 }
0x13f2   : > { %v11029_v11 = vpop.f32.mrb[62].mxu1  ;;  %v8890_v13 = vpop.f32.mrb[61].mxu0  ;;  %v6381_v37 = vsel %vm1554_vm3, %v6143_v54, -inf }
0x13f3   : > { %6382 = vmax.xlane.f32.xlu0 %v6381_v37  ;;  %v8885_v26 = vpop.f32.mrb[63].mxu1 }
0x13f5   : > { %v6299_v42 = vpop.f32.mrb[62].mxu0 }
0x13f6   : > { %v8900_v48 = vpop.f32.mrb[63].mxu0  ;;  %v6387_v52 = vsel %vm1554_vm3, %v6299_v42, -inf }
0x13f7   : > { %6388 = vmax.xlane.f32.xlu0 %v6387_v52 }
0x13f9   : > { %v6221_v16 = vpop.f32.mrb[64].mxu1 }
0x13fa   : > { %v8895_v36 = vpop.f32.mrb[65].mxu1  ;;  %v6384_v20 = vsel %vm1554_vm3, %v6221_v16, -inf }
0x13fb   : > { %6385 = vmax.xlane.f32.xlu1 %v6384_v20 }
0x13fd   : > { %v6377_v22 = vpop.f32.mrb[66].mxu1 }
0x13fe   : > { %v8905_v32 = vpop.f32.mrb[67].mxu1  ;;  %v6390_v24 = vsel %vm1554_vm3, %v6377_v22, -inf }
0x13ff   : > { %6391 = vmax.xlane.f32.xlu0 %v6390_v24 }
0x1480   : > { %v6383_v25 = vpop.xlane.xlu0 %6382 }
0x1481   : > { %v6393_v28 = vsub.f32 %v6143_v54, %v6383_v25 }
0x1483   : > { %v6397_v29 = vmul.f32 1.442695, %v6393_v28 }
0x1484   : > { %v6389_v21 = vpop.xlane.xlu0 %6388 }
0x1485   : > { %9459 = vpow2.f32 %v6397_v29  ;;  %v6395_v30 = vsub.f32 %v6299_v42, %v6389_v21 }
0x1487   : > { %v6401_v46 = vmul.f32 1.442695, %v6395_v30 }
0x1488   : > { %v6386_v31 = vpop.xlane.xlu1 %6385 }
0x1489   : > { %9461 = vpow2.f32 %v6401_v46  ;;  %v6394_v35 = vsub.f32 %v6221_v16, %v6386_v31 }
0x148b   : > { %v6399_v33 = vmul.f32 1.442695, %v6394_v35 }
0x148c   : > { %v6392_v34 = vpop.xlane.xlu0 %6391 }
0x148d   : > { %9463 = vpow2.f32 %v6399_v33  ;;  %v6396_v43 = vsub.f32 %v6377_v22, %v6392_v34  ;;  %v6766_v34 = vld [vmem:[#allocation12] sm:$0xff] }
0x148f   : > { %v9460_v49 = vpop.eup %9459  ;;  %v6403_v41 = vmul.f32 1.442695, %v6396_v43  ;;  %v6767_v43 = vld [vmem:[#allocation12 + $0x8] sm:$0xff] }
0x1490   : > { %v6405_v51 = vsel %vm1554_vm3, %v9460_v49, 0.0 }
0x1491   : > { %9465 = vpow2.f32 %v6403_v41  ;;  %6406 = vadd.xlane.f32.xlu0 %v6405_v51  ;;  %v9028_v41 = vpack.c.bf16 %v6767_v43, %v6766_v34  ;;  %v6769_v51 = vld [vmem:[#allocation12 + $0x18] sm:$0xff] }
0x1492   : > { %v9550_v34 = vld [vmem:[%s10316_s2 + $0x18] sm:$0xff] }
0x1493   : > { %v11036_v58 = vpop.eup %9461 }
0x1494   : > { %v6411_v62 = vsel %vm1554_vm3, %v11036_v58, 0.0 }
0x1495   : > { %6412 = vadd.xlane.f32.xlu0 %v6411_v62  ;;  %v6770_v62 = vld [vmem:[#allocation12 + $0x20] sm:$0xff] }
0x1497   : > { %v11040_v53 = vpop.eup %9463 }
0x1498   : > { %v6408_v2 = vsel %vm1554_vm3, %v11040_v53, 0.0 }
0x1499   : > { %6409 = vadd.xlane.f32.xlu1 %v6408_v2 }
0x149b   : > { %v11044_v6 = vpop.eup %9465 }
0x149c   : > { %v6414_v9 = vsel %vm1554_vm3, %v11044_v6, 0.0 }
0x149d   : > { %6415 = vadd.xlane.f32.xlu1 %v6414_v9  ;;  %v6773_v9 = vld [vmem:[#allocation12 + $0x38] sm:$0xff] }
0x14ab   : > { %6437 = vrot.lane.b32.xlu0 %v10481_v59, %s9887_s11 }
0x14ae   : > { %6513 = vrot.lane.b32.xlu1 %v10479_v57, %s9887_s11 }
0x14af   : > { %2587 = vrot.lane.b32.xlu0 %v10629_v40, %s9887_s11 }
0x14b2   : > { %6589 = vrot.lane.b32.xlu1 %v10489_v63, %s9887_s11 }
0x14b3   : > { %3280 = vrot.lane.b32.xlu0 %v10707_v14, %s9886_s6 }
0x14b6   : > { %6665 = vrot.lane.b32.xlu1 %v10486_v61, %s9887_s11 }
0x14b7   : > { %3973 = vrot.lane.b32.xlu0 %v10787_v1, %s9885_s18 }
0x14ba   : > { %2589 = vrot.lane.b32.xlu1 %v10627_v38, %s9887_s11 }
0x14bb   : > { %4666 = vrot.lane.b32.xlu0 %v10867_v55, %s9884_s20 }
0x14be   : > { %3282 = vrot.lane.b32.xlu1 %v10709_v15, %s9886_s6 }
0x14bf   : > { %5359 = vrot.lane.b32.xlu0 %v10947_v19, %s9883_s28 }
0x14c2   : > { %3975 = vrot.lane.b32.xlu1 %v10789_v3, %s9885_s18 }
0x14c3   : > { %6052 = vrot.lane.b32.xlu0 %v11023_v8, %s9882_s13 }
0x14c6   : > { %4668 = vrot.lane.b32.xlu1 %v10869_v60, %s9884_s20 }
0x14c7   : > { %2591 = vrot.lane.b32.xlu0 %v10631_v45, %s9887_s11 }
0x14ca   : > { %5361 = vrot.lane.b32.xlu1 %v10949_v4, %s9883_s28 }
0x14ce   : > { %6054 = vrot.lane.b32.xlu1 %v11027_v44, %s9882_s13 }
0x14d2   : > { %2593 = vrot.lane.b32.xlu1 %v10634_v56, %s9887_s11  ;;  %s11674_s11 = scalar_lea.vmem [#allocation17], %s10312_s25 }
0x14d3   : > { %s7943_s25 = sshll.u32 %s11674_s11, 4  ;;  %s11682_s25 = int_to_ptr.vmem [resolvable:$true] %s7943_s25 }
0x14d4   : > { %s9779_s15 = scalar_lea.vmem %s11682_s25, 512  ;;  %p9786_p9 = scmp.lt.s32.totalorder %s11682_s25, %s9784_s0 }
0x14d5   : > { %p9780_p4 = scmp.ne.s32.totalorder %s11682_s25, %s9779_s15 }
0x14d7   : > { %p9781_p5 = pnand %p9780_p4, %p11921_p10 }
0x14d9   : > { %p9782_p7 = pneg %p9781_p5 }
0x151e   : > { %v6407_v57 = vpop.xlane.xlu0 %6406 }
0x151f   : > { %9467 = vrcp.f32 %v6407_v57 }
0x1522   : > { %v6413_v59 = vpop.xlane.xlu0 %6412 }
0x1523   : > { %9469 = vrcp.f32 %v6413_v59 }
0x1526   : > { %v6410_v61 = vpop.xlane.xlu1 %6409  ;;  %v6438_v63 = vpop.permute.xlu0 %6437 }
0x1527   : > { %9471 = vrcp.f32 %v6410_v61  ;;  %8907 = vmatpush3.msra.mxu0 %v6438_v63 }
0x1528   : > { %8916 = vmatprep.subr.mxu0 %v9879_v47 }
0x1529   : > { %v9468_v38 = vpop.eup %9467 }
0x152a   : > { %v6421_v40 = vmul.f32 %v9468_v38, %v6407_v57  ;;  %v6416_v45 = vpop.xlane.xlu1 %6415  ;;  %v2588_v14 = vpop.permute.xlu0 %2587 }
0x152b   : > { %9473 = vrcp.f32 %v6416_v45  ;;  %2600 = vst.msk [vmem:[#allocation2] sm:$0xff] %vm2599_vm4, %v2588_v14  ;;  %v6778_v14 = vld [vmem:[#allocation12 + $0x60] sm:$0xff] }
0x152c   : > { %v6425_v15 = vsub.f32 2.0, %v6421_v40  ;;  %v6777_v40 = vld [vmem:[#allocation12 + $0x58] sm:$0xff] }
0x152d   : > { %v9470_v56 = vpop.eup %9469 }
0x152e   : > { %v6429_v1 = vmul.f32 %v9468_v38, %v6425_v15  ;;  %v6423_v3 = vmul.f32 %v9470_v56, %v6413_v59  ;;  %v6514_v55 = vpop.permute.xlu1 %6513  ;;  %v3281_v60 = vpop.permute.xlu0 %3280  ;;  %v6774_v59 = vld [vmem:[#allocation12 + $0x40] sm:$0xff]  ;;  %v6776_v38 = vld [vmem:[#allocation12 + $0x50] sm:$0xff]  ;;  %v6779_v15 = vld [vmem:[#allocation12 + $0x68] sm:$0xff] }
0x152f   : > { %3293 = vst.msk [vmem:[#allocation2] sm:$0xff] %vm3292_vm5, %v3281_v60  ;;  %8912 = vmatpush3.msra.mxu1 %v6514_v55 }
0x1530   : > { %v6433_v19 = vmul.f32 %v9460_v49, %v6429_v1  ;;  %v6427_v4 = vsub.f32 2.0, %v6423_v3  ;;  %8921 = vmatprep.subr.mxu1 %v9879_v47  ;;  %v6768_v49 = vld [vmem:[#allocation12 + $0x10] sm:$0xff]  ;;  %v6781_v3 = vld [vmem:[#allocation12 + $0x78] sm:$0xff] }
0x1531   : > { %v9472_v8 = vpop.eup %9471  ;;  %v6780_v1 = vld [vmem:[#allocation12 + $0x70] sm:$0xff] }
0x1532   : > { %v6431_v39 = vmul.f32 %v9470_v56, %v6427_v4  ;;  %v6422_v44 = vmul.f32 %v9472_v8, %v6410_v61  ;;  %v6590_v50 = vpop.permute.xlu1 %6589  ;;  %8909 = vmatmul.mubr.msk.f32.vlgmr.msra.gmra.mrb[64].mxu0 %vm1554_vm3, %v6433_v19  ;;  %v3974_v54 = vpop.permute.xlu0 %3973  ;;  %v6775_v61 = vld [vmem:[#allocation12 + $0x48] sm:$0xff]  ;;  %v9052_v56 = vpack.c.bf16 %v6779_v15, %v6778_v14  ;;  %v9056_v55 = vpack.c.bf16 %v6781_v3, %v6780_v1  ;;  %v6959_v14 = vld [vmem:[#allocation14 + $0x58] sm:$0xff]  ;;  %v6956_v3 = vld [vmem:[#allocation14 + $0x40] sm:$0xff] }
0x1533   : > { %3986 = vst.msk [vmem:[#allocation2] sm:$0xff] %vm3985_vm6, %v3974_v54  ;;  %8917 = vmatpush3.msra.mxu0 %v6590_v50  ;;  %8918 = vmatprep.mubr.msk.f32.mxu0 %vm9880_vm1, %v9879_v47  ;;  %v9044_v63 = vpack.c.bf16 %v6775_v61, %v6774_v59  ;;  %v6950_v61 = vld [vmem:[#allocation14 + $0x10] sm:$0xff]  ;;  %v6963_v15 = vld [vmem:[#allocation14 + $0x78] sm:$0xff] }
0x1534   : > { %v6435_v13 = vmul.f32 %v11036_v58, %v6431_v39  ;;  %v6426_v37 = vsub.f32 2.0, %v6422_v44  ;;  %v9032_v58 = vpack.c.bf16 %v6769_v51, %v6768_v49  ;;  %9029 = vmatprep.subr.bf16.mxu0 %v9028_v41  ;;  %v6949_v51 = vld [vmem:[#allocation14 + $0x8] sm:$0xff]  ;;  %v9096_v1 = vpack.c.bf16 %v6963_v15, %v6959_v14  ;;  %v6991_v14 = vld [vmem:[#allocation14 + $0x158] sm:$0xff] }
0x1535   : > { %v9474_v26 = vpop.eup %9473  ;;  %v6995_v15 = vld [vmem:[#allocation14 + $0x178] sm:$0xff] }
0x1536   : > { %v6430_v42 = vmul.f32 %v9472_v8, %v6426_v37  ;;  %v6424_v48 = vmul.f32 %v9474_v26, %v6416_v45  ;;  %v6666_v52 = vpop.permute.xlu1 %6665  ;;  %v4667_v16 = vpop.permute.xlu0 %4666  ;;  %8919 = vmatmul.mubr.msk.f32.vlgmr.msra.gmra.mrb[66].mxu0 %vm1554_vm3, %v6435_v13  ;;  %v9048_v45 = vpack.c.bf16 %v6777_v40, %v6776_v38  ;;  %v6957_v38 = vld [vmem:[#allocation14 + $0x48] sm:$0xff] }
0x1537   : > { %4679 = vst.msk [vmem:[#allocation2] sm:$0xff] %vm4678_vm7, %v4667_v16  ;;  %9031 = vmatpush3.bf16.msra.mxu0 %v9028_v41 }
0x1538   : > { %v6434_v36 = vmul.f32 %v11040_v53, %v6430_v42  ;;  %v6428_v20 = vsub.f32 2.0, %v6424_v48  ;;  %v6771_v53 = vld [vmem:[#allocation12 + $0x28] sm:$0xff]  ;;  %9033 = vmatprep.subr.bf16.mxu0 %v9032_v58 }
0x1539   : > { %v9036_v2 = vpack.c.bf16 %v6771_v53, %v6770_v62  ;;  %v6951_v62 = vld [vmem:[#allocation14 + $0x18] sm:$0xff] }
0x153a   : > { %v6432_v22 = vmul.f32 %v9474_v26, %v6428_v20  ;;  %8914 = vmatmul.mubr.msk.f32.vlgmr.msra.gmra.mrb[68].mxu1 %vm1554_vm3, %v6434_v36  ;;  %v2590_v32 = vpop.permute.xlu1 %2589  ;;  %v5360_v24 = vpop.permute.xlu0 %5359 }
0x153b   : > { %8922 = vmatpush3.msra.mxu1 %v6666_v52  ;;  %2601 = vst.msk [vmem:[#allocation2 + $0x8] sm:$0xff] %vm2599_vm4, %v2590_v32  ;;  %8923 = vmatprep.mubr.msk.f32.mxu1 %vm9880_vm1, %v9879_v47  ;;  %v9547_v32 = vld [vmem:[%s10316_s2 + $0x8] sm:$0xff] }
0x153c   : > { %5372 = vst.msk [vmem:[#allocation2] sm:$0xff] %vm5371_vm8, %v5360_v24  ;;  %v6436_v25 = vmul.f32 %v11044_v6, %v6432_v22  ;;  %v6772_v6 = vld [vmem:[#allocation12 + $0x30] sm:$0xff]  ;;  %9035 = vmatpush3.bf16.msra.mxu0 %v9032_v58  ;;  %v8232_v22 = vld [vmem:[%s11847_s16] ss:$0 sm:$0xff]  ;;  %v6953_v58 = vld [vmem:[#allocation14 + $0x28] sm:$0xff] }
0x153d   : > { %9037 = vmatprep.subr.bf16.mxu0 %v9036_v2  ;;  %v9040_v57 = vpack.c.bf16 %v6773_v9, %v6772_v6  ;;  %v9060_v53 = vpack.c.bf16 %v6953_v58, %v6949_v51  ;;  %v6948_v6 = vld [vmem:[#allocation14] sm:$0xff]  ;;  %v6983_v51 = vld [vmem:[#allocation14 + $0x118] sm:$0xff] }
0x153e   : > { %8924 = vmatmul.mubr.msk.f32.vlgmr.msra.gmra.mrb[70].mxu1 %vm1554_vm3, %v6436_v25  ;;  %v3283_v28 = vpop.permute.xlu1 %3282  ;;  %v6053_v29 = vpop.permute.xlu0 %6052  ;;  %v6952_v9 = vld [vmem:[#allocation14 + $0x20] sm:$0xff] }
0x153f   : > { %3294 = vst.msk [vmem:[#allocation2 + $0x8] sm:$0xff] %vm3292_vm5, %v3283_v28  ;;  %7098 = vmatprep.mubr.f32.mxu1 %v9879_v47  ;;  %v9548_v28 = vld [vmem:[%s10316_s2] sm:$0xff]  ;;  %v9062_v59 = vpack.c.bf16 %v6952_v9, %v6948_v6  ;;  %9061 = vmatprep.subr.bf16.mxu1 %v9060_v53  ;;  %v6987_v53 = vld [vmem:[#allocation14 + $0x138] sm:$0xff] }
0x1540   : > { %6065 = vst.msk [vmem:[#allocation2] sm:$0xff] %vm6064_vm9, %v6053_v29  ;;  %9039 = vmatpush3.bf16.msra.mxu0 %v9036_v2  ;;  %v6955_v2 = vld [vmem:[#allocation14 + $0x38] sm:$0xff]  ;;  %v6984_v6 = vld [vmem:[#allocation14 + $0x120] sm:$0xff]  ;;  %v9108_v9 = vpack.c.bf16 %v6987_v53, %v6983_v51 }
0x1541   : > { %9041 = vmatprep.subr.bf16.mxu0 %v9040_v57  ;;  %9063 = vmatpush1.bf16.msra.mxu1 %v9062_v59  ;;  %v6982_v59 = vld [vmem:[#allocation14 + $0x110] sm:$0xff] }
0x1542   : > { %v3976_v21 = vpop.permute.xlu1 %3975  ;;  %v2592_v30 = vpop.permute.xlu0 %2591 }
0x1543   : > { %3987 = vst.msk [vmem:[#allocation2 + $0x8] sm:$0xff] %vm3985_vm6, %v3976_v21 }
0x1544   : > { %2602 = vst.msk [vmem:[#allocation2 + $0x10] sm:$0xff] %vm2599_vm4, %v2592_v30  ;;  %9043 = vmatpush3.bf16.msra.mxu0 %v9040_v57  ;;  %v9092_v57 = vpack.c.bf16 %v6955_v2, %v6951_v62  ;;  %v6980_v2 = vld [vmem:[#allocation14 + $0x100] sm:$0xff] }
0x1545   : > { %9045 = vmatprep.subr.bf16.mxu0 %v9044_v63 }
0x1546   : > { %v4669_v46 = vpop.permute.xlu1 %4668 }
0x1547   : > { %4680 = vst.msk [vmem:[#allocation2 + $0x8] sm:$0xff] %vm4678_vm7, %v4669_v46 }
0x1548   : > { %9047 = vmatpush3.bf16.msra.mxu0 %v9044_v63  ;;  %v6954_v63 = vld [vmem:[#allocation14 + $0x30] sm:$0xff] }
0x1549   : > { %9049 = vmatprep.subr.bf16.mxu0 %v9048_v45  ;;  %v9094_v40 = vpack.c.bf16 %v6954_v63, %v6950_v61  ;;  %v6986_v61 = vld [vmem:[#allocation14 + $0x130] sm:$0xff]  ;;  %v6989_v63 = vld [vmem:[#allocation14 + $0x148] sm:$0xff] }
0x154a   : > { %v5362_v31 = vpop.permute.xlu1 %5361 }
0x154b   : > { %5373 = vst.msk [vmem:[#allocation2 + $0x8] sm:$0xff] %vm5371_vm8, %v5362_v31 }
0x154c   : > { %9051 = vmatpush3.bf16.msra.mxu0 %v9048_v45  ;;  %v6961_v45 = vld [vmem:[#allocation14 + $0x68] sm:$0xff] }
0x154d   : > { %9053 = vmatprep.subr.bf16.mxu0 %v9052_v56 }
0x154e   : > { %v6055_v35 = vpop.permute.xlu1 %6054 }
0x154f   : > { %6066 = vst.msk [vmem:[#allocation2 + $0x8] sm:$0xff] %vm6064_vm9, %v6055_v35  ;;  %v9549_v35 = vld [vmem:[%s10316_s2 + $0x10] sm:$0xff]  ;;  %s11920_s2 = sld [smem:[#allocation77_spill]] }
0x1550   : > { %9055 = vmatpush3.bf16.msra.mxu0 %v9052_v56  ;;  %v9064_v56 = vpack.c.bf16 %v6961_v45, %v6957_v38  ;;  %v6993_v45 = vld [vmem:[#allocation14 + $0x168] sm:$0xff] }
0x1551   : > { %9057 = vmatprep.subr.bf16.mxu0 %v9056_v55 }
0x1552   : > { %v2594_v33 = vpop.permute.xlu1 %2593  ;;  %9065 = vmatprep.subr.bf16.mxu1 %v9064_v56 }
0x1553   : > { %2603 = vst.msk [vmem:[#allocation2 + $0x18] sm:$0xff] %vm2599_vm4, %v2594_v33 }
0x1554   : > { %9059 = vmatpush3.bf16.msra.mxu0 %v9056_v55  ;;  %v6960_v55 = vld [vmem:[#allocation14 + $0x60] sm:$0xff] }
0x1555   : > { %9093 = vmatprep.subr.bf16.mxu0 %v9092_v57  ;;  %v9078_v57 = vpack.c.bf16 %v6984_v6, %v6980_v2  ;;  %v8233_v2 = vld [vmem:[%s11852_s14] ss:$0 sm:$0xff]  ;;  %s11689_s26 = scalar_lea.hbm %s11920_s2, %s8243_s21  ;;  %s7930_s14 = scalar_lea.sflag [#allocation5], %s10309_s10 }
0x1605   : > { %v6509_v60 = vpop.f32.mrb[64].mxu0 }
0x1606   : > { %6745 = vrot.lane.b32.xlu0 %v6509_v60, %s9881_s8  ;;  %v8910_v19 = vpop.f32.mrb[65].mxu0  ;;  %v6958_v60 = vld [vmem:[#allocation14 + $0x50] sm:$0xff] }
0x1607   : > { %v9066_v19 = vpack.c.bf16 %v6960_v55, %v6956_v3  ;;  %v9112_v3 = vpack.c.bf16 %v6995_v15, %v6991_v14  ;;  %v6988_v55 = vld [vmem:[#allocation14 + $0x140] sm:$0xff] }
0x1609   : > { %v6661_v4 = vpop.f32.mrb[66].mxu0  ;;  %9067 = vmatpush1.bf16.msra.mxu1 %v9066_v19  ;;  %v6990_v19 = vld [vmem:[#allocation14 + $0x150] sm:$0xff] }
0x160a   : > { %3284 = vrot.lane.b32.xlu0 %v10711_v17, %s9886_s6  ;;  %v8920_v8 = vpop.f32.mrb[67].mxu0 }
0x160b   : > { %v6965_v8 = vld [vmem:[#allocation14 + $0x88] sm:$0xff] }
0x160d   : > { %v6585_v39 = vpop.f32.mrb[68].mxu1 }
0x160e   : > { %6747 = vrot.lane.b32.xlu1 %v6585_v39, %s9881_s8  ;;  %v8915_v44 = vpop.f32.mrb[69].mxu1  ;;  %3977 = vrot.lane.b32.xlu0 %v10791_v5, %s9885_s18  ;;  %v6969_v39 = vld [vmem:[#allocation14 + $0xa8] sm:$0xff] }
0x1611   : > { %v6737_v50 = vpop.f32.mrb[70].mxu1 }
0x1612   : > { %3286 = vrot.lane.b32.xlu1 %v10715_v27, %s9886_s6  ;;  %v8925_v54 = vpop.f32.mrb[71].mxu1  ;;  %4670 = vrot.lane.b32.xlu0 %v10871_v0, %s9884_s20  ;;  %s11915_s6 = sld [smem:[#allocation76_spill]] }
0x1613   : > { %v6967_v54 = vld [vmem:[#allocation14 + $0x98] sm:$0xff] }
0x1616   : > { %3979 = vrot.lane.b32.xlu1 %v10795_v12, %s9885_s18  ;;  %5363 = vrot.lane.b32.xlu0 %v10951_v7, %s9883_s28 }
0x161a   : > { %4672 = vrot.lane.b32.xlu1 %v10875_v10, %s9884_s20  ;;  %6056 = vrot.lane.b32.xlu0 %v11025_v23, %s9882_s13 }
0x161e   : > { %5365 = vrot.lane.b32.xlu1 %v10955_v18, %s9883_s28  ;;  %6749 = vrot.lane.b32.xlu0 %v6661_v4, %s9881_s8  ;;  %v6962_v4 = vld [vmem:[#allocation14 + $0x70] sm:$0xff]  ;;  %s11867_s28 = sld [smem:[#allocation74_spill]] }
0x161f   : > { %v9098_v44 = vpack.c.bf16 %v6962_v4, %v6958_v60  ;;  %v6992_v60 = vld [vmem:[#allocation14 + $0x160] sm:$0xff] }
0x1622   : > { %6058 = vrot.lane.b32.xlu1 %v11029_v11, %s9882_s13 }
0x1626   : > { %6751 = vrot.lane.b32.xlu1 %v6737_v50, %s9881_s8  ;;  %v9068_v50 = vpack.c.bf16 %v6969_v39, %v6965_v8  ;;  %v9082_v39 = vpack.c.bf16 %v6992_v60, %v6988_v55 }
0x1628   : > { %9069 = vmatprep.subr.bf16.mxu1 %v9068_v50  ;;  %v6997_v50 = vld [vmem:[#allocation14 + $0x188] sm:$0xff] }
0x1678   : > { %v6746_v17 = vpop.permute.xlu0 %6745 }
0x1679   : > { %6758 = vst.msk [vmem:[#allocation2] sm:$0xff] %vm6757_vm10, %v6746_v17  ;;  %v6971_v17 = vld [vmem:[#allocation14 + $0xb8] sm:$0xff] }
0x167c   : > { %v3285_v27 = vpop.permute.xlu0 %3284 }
0x167d   : > { %3295 = vst.msk [vmem:[#allocation2 + $0x10] sm:$0xff] %vm3292_vm5, %v3285_v27  ;;  %v6964_v27 = vld [vmem:[#allocation14 + $0x80] sm:$0xff] }
0x1680   : > { %v6748_v5 = vpop.permute.xlu1 %6747  ;;  %v3978_v12 = vpop.permute.xlu0 %3977  ;;  %v6762_v0 = vld [vmem:[#allocation2] sm:$0xff] }
0x1681   : > { %6759 = vst.msk [vmem:[#allocation2 + $0x8] sm:$0xff] %vm6757_vm10, %v6748_v5  ;;  %8958 = vmatprep.mubr.f32.mxu0 %v6762_v0  ;;  %v9100_v5 = vpack.c.bf16 %v6971_v17, %v6967_v54  ;;  %v6966_v0 = vld [vmem:[#allocation14 + $0x90] sm:$0xff]  ;;  %v7001_v54 = vld [vmem:[#allocation14 + $0x1a8] sm:$0xff] }
0x1682   : > { %3988 = vst.msk [vmem:[#allocation2 + $0x10] sm:$0xff] %vm3985_vm6, %v3978_v12  ;;  %v6968_v12 = vld [vmem:[#allocation14 + $0xa0] sm:$0xff] }
0x1684   : > { %v3287_v10 = vpop.permute.xlu1 %3286  ;;  %v4671_v7 = vpop.permute.xlu0 %4670 }
0x1685   : > { %3296 = vst.msk [vmem:[#allocation2 + $0x18] sm:$0xff] %vm3292_vm5, %v3287_v10  ;;  %v6970_v10 = vld [vmem:[#allocation14 + $0xb0] sm:$0xff] }
0x1686   : > { %4681 = vst.msk [vmem:[#allocation2 + $0x10] sm:$0xff] %vm4678_vm7, %v4671_v7  ;;  %v9070_v7 = vpack.c.bf16 %v6968_v12, %v6964_v27  ;;  %v9084_v27 = vpack.c.bf16 %v7001_v54, %v6997_v50  ;;  %v7003_v12 = vld [vmem:[#allocation14 + $0x1b8] sm:$0xff]  ;;  %v7693_v50 = vld [vmem:[#allocation15 + $0x88] sm:$0xff]  ;;  %v7724_v54 = vld [vmem:[#allocation15 + $0x180] sm:$0xff] }
0x1688   : > { %v3980_v18 = vpop.permute.xlu1 %3979  ;;  %v5364_v23 = vpop.permute.xlu0 %5363  ;;  %v6763_v11 = vld [vmem:[#allocation2 + $0x8] sm:$0xff]  ;;  %9071 = vmatpush1.bf16.msra.mxu1 %v9070_v7 }
0x1689   : > { %3989 = vst.msk [vmem:[#allocation2 + $0x18] sm:$0xff] %vm3985_vm6, %v3980_v18  ;;  %8959 = vmatmul.mubr.f32.vlgmr.msra.gmra.mrb[68].mxu0 %v6763_v11  ;;  %v9102_v18 = vpack.c.bf16 %v6970_v10, %v6966_v0  ;;  %v6996_v0 = vld [vmem:[#allocation14 + $0x180] sm:$0xff] }
0x168a   : > { %5374 = vst.msk [vmem:[#allocation2 + $0x10] sm:$0xff] %vm5371_vm8, %v5364_v23  ;;  %9095 = vmatpush1.bf16.msra.mxu0 %v9094_v40  ;;  %v9110_v40 = vpack.c.bf16 %v6986_v61, %v6982_v59 }
0x168b   : > { %9097 = vmatprep.subr.bf16.mxu0 %v9096_v1  ;;  %v9080_v1 = vpack.c.bf16 %v6993_v45, %v6989_v63 }
0x168c   : > { %v4673_v13 = vpop.permute.xlu1 %4672  ;;  %v6057_v37 = vpop.permute.xlu0 %6056 }
0x168d   : > { %4682 = vst.msk [vmem:[#allocation2 + $0x18] sm:$0xff] %vm4678_vm7, %v4673_v13 }
0x168e   : > { %6067 = vst.msk [vmem:[#allocation2 + $0x10] sm:$0xff] %vm6064_vm9, %v6057_v37  ;;  %9099 = vmatpush1.bf16.msra.mxu0 %v9098_v44  ;;  %v6994_v44 = vld [vmem:[#allocation14 + $0x170] sm:$0xff] }
0x168f   : > { %9101 = vmatprep.subr.bf16.mxu0 %v9100_v5  ;;  %v9114_v17 = vpack.c.bf16 %v6994_v44, %v6990_v19  ;;  %v6999_v5 = vld [vmem:[#allocation14 + $0x198] sm:$0xff]  ;;  %v7692_v44 = vld [vmem:[#allocation15 + $0x80] sm:$0xff] }
0x1690   : > { %v5366_v26 = vpop.permute.xlu1 %5365  ;;  %v6750_v42 = vpop.permute.xlu0 %6749  ;;  %v9116_v7 = vpack.c.bf16 %v7003_v12, %v6999_v5  ;;  %v7676_v5 = vld [vmem:[#allocation15] sm:$0xff]  ;;  %v7677_v12 = vld [vmem:[#allocation15 + $0x8] sm:$0xff] }
0x1691   : > { %5375 = vst.msk [vmem:[#allocation2 + $0x18] sm:$0xff] %vm5371_vm8, %v5366_v26 }
0x1692   : > { %6760 = vst.msk [vmem:[#allocation2 + $0x10] sm:$0xff] %vm6757_vm10, %v6750_v42  ;;  %9103 = vmatpush1.bf16.msra.mxu0 %v9102_v18  ;;  %v7000_v18 = vld [vmem:[#allocation14 + $0x1a0] sm:$0xff] }
0x1694   : > { %v6059_v48 = vpop.permute.xlu1 %6058 }
0x1695   : > { %6068 = vst.msk [vmem:[#allocation2 + $0x18] sm:$0xff] %vm6064_vm9, %v6059_v48 }
0x1698   : > { %v6752_v52 = vpop.permute.xlu1 %6751 }
0x1699   : > { %v6764_v16 = vld [vmem:[#allocation2 + $0x10] sm:$0xff]  ;;  %6761 = vst.msk [vmem:[#allocation2 + $0x18] sm:$0xff] %vm6757_vm10, %v6752_v52 }
0x169a   : > { %8961 = vmatprep.mubr.f32.mxu0 %v6764_v16  ;;  %v6973_v16 = vld [vmem:[#allocation14 + $0xc8] sm:$0xff] }
0x16a0   : > { %v6765_v36 = vld [vmem:[#allocation2 + $0x18] sm:$0xff] }
0x16a1   : > { %8962 = vmatmul.mubr.f32.gmra.mrb[70].mxu0 %v6765_v36  ;;  %v6977_v36 = vld [vmem:[#allocation14 + $0xe8] sm:$0xff] }
0x16a2   : > { %7187 = vmatprep.mubr.f32.mxu0 %v9879_v47 }
0x175c   : > { %v8960_v20 = vpop.f32.mrb[68].mxu0 }
0x175d   : > { %v6868_v24 = vadd.f32 %v9547_v32, %v8960_v20  ;;  %v6848_v25 = vpop.f32.mrb[69].mxu0  ;;  %v6975_v20 = vld [vmem:[#allocation14 + $0xd8] sm:$0xff] }
0x175e   : > { %v6867_v29 = vadd.f32 %v9548_v28, %v6848_v25  ;;  %v6979_v32 = vld [vmem:[#allocation14 + $0xf8] sm:$0xff]  ;;  %v6976_v25 = vld [vmem:[#allocation14 + $0xe0] sm:$0xff] }
0x175f   : > { %v11156_v21 = vadd.f32 %v8232_v22, %v6868_v24  ;;  %v6972_v24 = vld [vmem:[#allocation14 + $0xc0] sm:$0xff]  ;;  %v9104_v28 = vpack.c.bf16 %v6979_v32, %v6975_v20 }
0x1760   : > { %v11158_v30 = vadd.f32 %v8232_v22, %v6867_v29  ;;  %v9074_v29 = vpack.c.bf16 %v6976_v25, %v6972_v24  ;;  %v7004_v32 = vld [vmem:[#allocation14 + $0x1c0] sm:$0xff] }
0x1761   : > { %11848 = vst [vmem:[#allocation26_spill] sm:$0xff] %v11156_v21  ;;  %6886 = vadd.xlane.f32.xlu1 %v11156_v21  ;;  %9105 = vmatprep.subr.bf16.mxu0 %v9104_v28  ;;  %v7008_v24 = vld [vmem:[#allocation14 + $0x1e0] sm:$0xff]  ;;  %v7006_v28 = vld [vmem:[#allocation14 + $0x1d0] sm:$0xff] }
0x1762   : > { %11849 = vst [vmem:[#allocation27_spill] sm:$0xff] %v11158_v30  ;;  %6884 = vadd.xlane.f32.xlu0 %v11158_v30 }
0x1774   : > { %v8963_v46 = vpop.f32.mrb[70].mxu0 }
0x1775   : > { %v6858_v31 = vpop.f32.mrb[71].mxu0  ;;  %v6870_v43 = vadd.f32 %v9550_v34, %v8963_v46  ;;  %v6974_v46 = vld [vmem:[#allocation14 + $0xd0] sm:$0xff]  ;;  %v6981_v34 = vld [vmem:[#allocation14 + $0x108] sm:$0xff] }
0x1776   : > { %v6869_v33 = vadd.f32 %v9549_v35, %v6858_v31  ;;  %v6978_v31 = vld [vmem:[#allocation14 + $0xf0] sm:$0xff] }
0x1777   : > { %v11167_v41 = vadd.f32 %v8232_v22, %v6870_v43  ;;  %v9106_v35 = vpack.c.bf16 %v6978_v31, %v6974_v46  ;;  %v6985_v43 = vld [vmem:[#allocation14 + $0x128] sm:$0xff]  ;;  %v9090_v46 = vpack.c.bf16 %v7008_v24, %v7004_v32  ;;  %v7696_v24 = vld [vmem:[#allocation15 + $0xa0] sm:$0xff] }
0x1778   : > { %v11164_v49 = vadd.f32 %v8232_v22, %v6869_v33  ;;  %v9072_v22 = vpack.c.bf16 %v6977_v36, %v6973_v16  ;;  %v9076_v62 = vpack.c.bf16 %v6985_v43, %v6981_v34 }
0x1779   : > { %11851 = vst [vmem:[#allocation29_spill] sm:$0xff] %v11167_v41  ;;  %9107 = vmatpush1.bf16.msra.mxu0 %v9106_v35 }
0x177a   : > { %11850 = vst [vmem:[#allocation28_spill] sm:$0xff] %v11164_v49  ;;  %6888 = vadd.xlane.f32.xlu0 %v11164_v49  ;;  %9073 = vmatprep.subr.bf16.mxu1 %v9072_v22  ;;  %v7011_v22 = vld [vmem:[#allocation14 + $0x1f8] sm:$0xff] }
0x177b   : > { %9075 = vmatpush1.bf16.msra.mxu1 %v9074_v29  ;;  %9109 = vmatprep.subr.bf16.mxu0 %v9108_v9  ;;  %v7010_v29 = vld [vmem:[#allocation14 + $0x1f0] sm:$0xff] }
0x177c   : > { %9077 = vmatprep.subr.bf16.mxu1 %v9076_v62  ;;  %v9122_v31 = vpack.c.bf16 %v7010_v29, %v7006_v28  ;;  %v7728_v28 = vld [vmem:[#allocation15 + $0x1a0] sm:$0xff] }
0x177d   : > { %9111 = vmatpush1.bf16.msra.mxu0 %v9110_v40 }
0x177e   : > { %6890 = vadd.xlane.f32.xlu0 %v11167_v41  ;;  %9113 = vmatprep.subr.bf16.mxu0 %v9112_v3 }
0x177f   : > { %9079 = vmatpush1.bf16.msra.mxu1 %v9078_v57  ;;  %v8234_v57 = vld [vmem:[%s11853_s4] ss:$0 sm:$0xff]  ;;  %s9785_s4 = scalar_lea.vmem %s9784_s0, 1024 }
0x1780   : > { %9081 = vmatprep.subr.bf16.mxu1 %v9080_v1  ;;  %p9787_p8 = scmp.lt.s32.totalorder %s9785_s4, %s9779_s15 }
0x1781   : > { %9115 = vmatpush1.bf16.msra.mxu0 %v9114_v17  ;;  %v9124_v17 = vpack.c.bf16 %v7693_v50, %v7692_v44  ;;  %v7702_v44 = vld [vmem:[#allocation15 + $0xd0] sm:$0xff]  ;;  %v7703_v50 = vld [vmem:[#allocation15 + $0xd8] sm:$0xff] }
0x1782   : > { %9117 = vmatprep.subr.bf16.mxu0 %v9116_v7  ;;  %v7709_v7 = vld [vmem:[#allocation15 + $0x108] sm:$0xff]  ;;  %p9788_p11 = por %p9787_p8, %p9786_p9 }
0x1783   : > { %9083 = vmatpush1.bf16.msra.mxu1 %v9082_v39 }
0x1784   : > { %9085 = vmatprep.subr.bf16.mxu1 %v9084_v27  ;;  %p9789_p3 = pnand %p9788_p11, %p9782_p7 }
0x17ee   : > { %v6887_v23 = vpop.xlane.xlu1 %6886 }
0x17ef   : > { %v6893_v11 = vmul.f32 0.0078125, %v6887_v23  ;;  %v6885_v13 = vpop.xlane.xlu0 %6884  ;;  %v6998_v23 = vld [vmem:[#allocation14 + $0x190] sm:$0xff] }
0x17f0   : > { %v6892_v37 = vmul.f32 0.0078125, %v6885_v13  ;;  %v9086_v13 = vpack.c.bf16 %v7000_v18, %v6996_v0  ;;  %v7708_v0 = vld [vmem:[#allocation15 + $0x100] sm:$0xff] }
0x17f1   : > { %v11171_v26 = vsub.f32 %v11156_v21, %v6893_v11  ;;  %v7002_v11 = vld [vmem:[#allocation14 + $0x1b0] sm:$0xff]  ;;  %v11209_v18 = vpack.c.bf16 %v7709_v7, %v7708_v0 }
0x17f2   : > { %v11174_v42 = vsub.f32 %v11158_v30, %v6892_v37  ;;  %v7005_v37 = vld [vmem:[#allocation14 + $0x1c8] sm:$0xff]  ;;  %v9118_v36 = vpack.c.bf16 %v7002_v11, %v6998_v23  ;;  %9087 = vmatpush1.bf16.msra.mxu1 %v9086_v13  ;;  %v7695_v23 = vld [vmem:[#allocation15 + $0x98] sm:$0xff]  ;;  %v7726_v11 = vld [vmem:[#allocation15 + $0x190] sm:$0xff] }
0x17f3   : > { %v6901_v48 = vmul.f32 %v11171_v26, %v11171_v26  ;;  %v7718_v7 = vld [vmem:[#allocation15 + $0x150] sm:$0xff] }
0x17f4   : > { %v6900_v52 = vmul.f32 %v11174_v42, %v11174_v42  ;;  %9119 = vmatpush1.bf16.msra.mxu0 %v9118_v36 }
0x17f5   : > { %6906 = vadd.xlane.f32.xlu1 %v6901_v48  ;;  %v7009_v48 = vld [vmem:[#allocation14 + $0x1e8] sm:$0xff] }
0x17f6   : > { %6904 = vadd.xlane.f32.xlu0 %v6900_v52  ;;  %v7007_v52 = vld [vmem:[#allocation14 + $0x1d8] sm:$0xff]  ;;  %v9088_v20 = vpack.c.bf16 %v7009_v48, %v7005_v37  ;;  %v7678_v48 = vld [vmem:[#allocation15 + $0x10] sm:$0xff] }
0x17f7   : > { %v9120_v25 = vpack.c.bf16 %v7011_v22, %v7007_v52  ;;  %v7727_v37 = vld [vmem:[#allocation15 + $0x198] sm:$0xff] }
0x17f8   : > { %9089 = vmatprep.subr.bf16.mxu1 %v9088_v20  ;;  %v7679_v52 = vld [vmem:[#allocation15 + $0x18] sm:$0xff]  ;;  %v7710_v20 = vld [vmem:[#allocation15 + $0x110] sm:$0xff] }
0x17f9   : > { %9121 = vmatprep.subr.bf16.mxu0 %v9120_v25  ;;  %9091 = vmatpush1.bf16.msra.mxu1 %v9090_v46  ;;  %v9130_v36 = vpack.c.bf16 %v7679_v52, %v7678_v48  ;;  %v7711_v22 = vld [vmem:[#allocation15 + $0x118] sm:$0xff]  ;;  %v7697_v25 = vld [vmem:[#allocation15 + $0xa8] sm:$0xff] }
0x17fa   : > { %9123 = vmatpush1.bf16.msra.mxu0 %v9122_v31  ;;  %9125 = vmatprep.subr.bf16.mxu1 %v9124_v17  ;;  %v11214_v32 = vpack.c.bf16 %v7711_v22, %v7710_v20  ;;  %v9132_v29 = vpack.c.bf16 %v7697_v25, %v7696_v24  ;;  %v7729_v46 = vld [vmem:[#allocation15 + $0x1a8] sm:$0xff]  ;;  %v7680_v31 = vld [vmem:[#allocation15 + $0x20] sm:$0xff]  ;;  %v9144_v17 = vpack.c.bf16 %v7703_v50, %v7702_v44 }
0x17fb   : > { %v7737_v52 = vld [vmem:[#allocation15 + $0x1e8] sm:$0xff]  ;;  %v7720_v25 = vld [vmem:[#allocation15 + $0x160] sm:$0xff] }
0x17fc   : > { %11854 = vst [vmem:[#allocation30_spill] sm:$0xff] %v11214_v32  ;;  %v7689_v20 = vld [vmem:[#allocation15 + $0x68] sm:$0xff] }
0x1807   : > { %v6889_v33 = vpop.xlane.xlu0 %6888 }
0x1808   : > { %v6894_v58 = vmul.f32 0.0078125, %v6889_v33 }
0x180a   : > { %v11181_v38 = vsub.f32 %v11164_v49, %v6894_v58 }
0x180b   : > { %v6891_v56 = vpop.xlane.xlu0 %6890 }
0x180c   : > { %v6895_v4 = vmul.f32 0.0078125, %v6891_v56  ;;  %v6902_v8 = vmul.f32 %v11181_v38, %v11181_v38 }
0x180e   : > { %v11186_v10 = vsub.f32 %v11167_v41, %v6895_v4  ;;  %6908 = vadd.xlane.f32.xlu0 %v6902_v8 }
0x1810   : > { %v6903_v16 = vmul.f32 %v11186_v10, %v11186_v10 }
0x1812   : > { %6910 = vadd.xlane.f32.xlu1 %v6903_v16  ;;  %v11212_v16 = vpack.c.bf16 %v7727_v37, %v7726_v11  ;;  %v7704_v11 = vld [vmem:[#allocation15 + $0xe0] sm:$0xff] }
0x1813   : > { %v7736_v37 = vld [vmem:[#allocation15 + $0x1e0] sm:$0xff] }
0x1814   : > { %v11242_v22 = vpack.c.bf16 %v7737_v52, %v7736_v37 }
0x1816   : > { %11863 = vst [vmem:[#allocation39_spill] sm:$0xff] %v11242_v22 }
0x1882   : > { %v6907_v35 = vpop.xlane.xlu1 %6906 }
0x1883   : > { %v6913_v33 = vmul.f32 0.0078125, %v6907_v35  ;;  %v6905_v34 = vpop.xlane.xlu0 %6904  ;;  %v7681_v35 = vld [vmem:[#allocation15 + $0x28] sm:$0xff] }
0x1884   : > { %v6912_v43 = vmul.f32 0.0078125, %v6905_v34  ;;  %v9134_v34 = vpack.c.bf16 %v7681_v35, %v7680_v31  ;;  %v7707_v31 = vld [vmem:[#allocation15 + $0xf8] sm:$0xff]  ;;  %v7738_v35 = vld [vmem:[#allocation15 + $0x1f0] sm:$0xff] }
0x1885   : > { %v6917_v51 = vadd.f32 1e-05, %v6913_v33  ;;  %v11218_v33 = vpack.c.bf16 %v7729_v46, %v7728_v28  ;;  %v7721_v28 = vld [vmem:[#allocation15 + $0x168] sm:$0xff]  ;;  %v7706_v46 = vld [vmem:[#allocation15 + $0xf0] sm:$0xff] }
0x1886   : > { %v6916_v58 = vadd.f32 1e-05, %v6912_v43  ;;  %v7712_v43 = vld [vmem:[#allocation15 + $0x120] sm:$0xff] }
0x1887   : > { %9475 = vrsqrt.f32 %v6917_v51  ;;  %11855 = vst [vmem:[#allocation31_spill] sm:$0xff] %v11218_v33  ;;  %v7713_v51 = vld [vmem:[#allocation15 + $0x128] sm:$0xff] }
0x1888   : > { %9477 = vrsqrt.f32 %v6916_v58  ;;  %v11220_v58 = vpack.c.bf16 %v7713_v51, %v7712_v43  ;;  %v7739_v43 = vld [vmem:[#allocation15 + $0x1f8] sm:$0xff]  ;;  %v7690_v51 = vld [vmem:[#allocation15 + $0x70] sm:$0xff] }
0x188a   : > { %11856 = vst [vmem:[#allocation32_spill] sm:$0xff] %v11220_v58 }
0x1891   : > { %v9476_v62 = vpop.eup %9475 }
0x1892   : > { %v9478_v53 = vpop.eup %9477  ;;  %v6925_v9 = vmul.f32 %v9476_v62, %v11171_v26  ;;  %v7698_v62 = vld [vmem:[#allocation15 + $0xb0] sm:$0xff] }
0x1893   : > { %v6924_v6 = vmul.f32 %v9478_v53, %v11174_v42  ;;  %v7699_v53 = vld [vmem:[#allocation15 + $0xb8] sm:$0xff] }
0x1894   : > { %v6935_v63 = vmul.f32 %v8233_v2, %v6925_v9  ;;  %v7731_v9 = vld [vmem:[#allocation15 + $0x1b8] sm:$0xff] }
0x1895   : > { %v6934_v59 = vmul.f32 %v8233_v2, %v6924_v6  ;;  %v9136_v6 = vpack.c.bf16 %v7699_v53, %v7698_v62  ;;  %v7691_v62 = vld [vmem:[#allocation15 + $0x78] sm:$0xff]  ;;  %v11248_v53 = vpack.c.bf16 %v7739_v43, %v7738_v35 }
0x1896   : > { %v6945_v45 = vadd.f32 %v8234_v57, %v6935_v63 }
0x1897   : > { %v6944_v61 = vadd.f32 %v8234_v57, %v6934_v59  ;;  %v7683_v59 = vld [vmem:[#allocation15 + $0x38] sm:$0xff]  ;;  %11865 = vst [vmem:[#allocation41_spill] sm:$0xff] %v11248_v53 }
0x1899   : > { %7099 = vmatmul.mubr.f32.vlgmr.msra.gmra.mrb[72].mxu1 %v6944_v61  ;;  %7188 = vmatmul.mubr.f32.vlgmr.msra.gmra.mrb[72].mxu0 %v6944_v61 }
0x189a   : > { %7104 = vmatprep.mubr.f32.mxu1 %v9879_v47  ;;  %7193 = vmatprep.mubr.f32.mxu0 %v9879_v47 }
0x189b   : > { %v6909_v40 = vpop.xlane.xlu0 %6908 }
0x189c   : > { %v6914_v14 = vmul.f32 0.0078125, %v6909_v40  ;;  %v7714_v40 = vld [vmem:[#allocation15 + $0x130] sm:$0xff] }
0x189d   : > { %7105 = vmatmul.mubr.f32.gmra.mrb[74].mxu1 %v6945_v45  ;;  %7194 = vmatmul.mubr.f32.gmra.mrb[74].mxu0 %v6945_v45  ;;  %v7715_v45 = vld [vmem:[#allocation15 + $0x138] sm:$0xff] }
0x189e   : > { %v6918_v42 = vadd.f32 1e-05, %v6914_v14  ;;  %7110 = vmatprep.mubr.f32.mxu1 %v9879_v47  ;;  %7199 = vmatprep.mubr.f32.mxu0 %v9879_v47  ;;  %v11226_v14 = vpack.c.bf16 %v7715_v45, %v7714_v40 }
0x189f   : > { %v6911_v26 = vpop.xlane.xlu1 %6910 }
0x18a0   : > { %9479 = vrsqrt.f32 %v6918_v42  ;;  %v6915_v15 = vmul.f32 0.0078125, %v6911_v26  ;;  %11858 = vst [vmem:[#allocation34_spill] sm:$0xff] %v11226_v14  ;;  %v7700_v42 = vld [vmem:[#allocation15 + $0xc0] sm:$0xff]  ;;  %v7701_v26 = vld [vmem:[#allocation15 + $0xc8] sm:$0xff] }
0x18a2   : > { %v6919_v56 = vadd.f32 1e-05, %v6915_v15  ;;  %v7732_v15 = vld [vmem:[#allocation15 + $0x1c0] sm:$0xff] }
0x18a4   : > { %9481 = vrsqrt.f32 %v6919_v56  ;;  %v9140_v56 = vpack.c.bf16 %v7701_v26, %v7700_v42  ;;  %v7012_v42 = vld [vmem:[%s11867_s28] sm:$0xf] }
0x18aa   : > { %v9480_v1 = vpop.eup %9479 }
0x18ab   : > { %v6926_v3 = vmul.f32 %v9480_v1, %v11181_v38  ;;  %v7725_v38 = vld [vmem:[#allocation15 + $0x188] sm:$0xff] }
0x18ac   : > { %v11206_v27 = vpack.c.bf16 %v7725_v38, %v7724_v54  ;;  %v7733_v1 = vld [vmem:[#allocation15 + $0x1c8] sm:$0xff]  ;;  %v7734_v54 = vld [vmem:[#allocation15 + $0x1d0] sm:$0xff]  ;;  %v7735_v38 = vld [vmem:[#allocation15 + $0x1d8] sm:$0xff] }
0x18ad   : > { %v6936_v55 = vmul.f32 %v8233_v2, %v6926_v3  ;;  %v7684_v3 = vld [vmem:[#allocation15 + $0x40] sm:$0xff]  ;;  %v11236_v0 = vpack.c.bf16 %v7735_v38, %v7734_v54 }
0x18ae   : > { %v9482_v60 = vpop.eup %9481  ;;  %9157 = vmatprep.subr.bf16.mxu0 %v11206_v27 }
0x18af   : > { %v6946_v19 = vadd.f32 %v8234_v57, %v6936_v55  ;;  %v6927_v4 = vmul.f32 %v9482_v60, %v11186_v10  ;;  %v9126_v10 = vpack.c.bf16 %v7677_v12, %v7676_v5  ;;  %9159 = vmatpush3.bf16.msra.mxu0 %v11209_v18  ;;  %v7685_v55 = vld [vmem:[#allocation15 + $0x48] sm:$0xff]  ;;  %v11230_v60 = vpack.c.bf16 %v7733_v1, %v7732_v15  ;;  %v7686_v5 = vld [vmem:[#allocation15 + $0x50] sm:$0xff]  ;;  %v7687_v12 = vld [vmem:[#allocation15 + $0x58] sm:$0xff] }
0x18b0   : > { %9161 = vmatprep.subr.bf16.mxu0 %v11212_v16  ;;  %11861 = vst [vmem:[#allocation37_spill] sm:$0xff] %v11236_v0 }
0x18b1   : > { %7111 = vmatmul.mubr.f32.gmra.mrb[76].mxu1 %v6946_v19  ;;  %7200 = vmatmul.mubr.f32.gmra.mrb[76].mxu0 %v6946_v19  ;;  %v6937_v8 = vmul.f32 %v8233_v2, %v6927_v4  ;;  %v7730_v2 = vld [vmem:[#allocation15 + $0x1b0] sm:$0xff]  ;;  %11859 = vst [vmem:[#allocation35_spill] sm:$0xff] %v11230_v60  ;;  %v9142_v19 = vpack.c.bf16 %v7685_v55, %v7684_v3  ;;  %v7716_v4 = vld [vmem:[#allocation15 + $0x140] sm:$0xff] }
0x18b2   : > { %7116 = vmatprep.mubr.f32.mxu1 %v9879_v47  ;;  %7205 = vmatprep.mubr.f32.mxu0 %v9879_v47  ;;  %v7694_v47 = vld [vmem:[#allocation15 + $0x90] sm:$0xff]  ;;  %v11224_v61 = vpack.c.bf16 %v7731_v9, %v7730_v2  ;;  %v9154_v2 = vpack.c.bf16 %v7691_v62, %v7690_v51  ;;  %v7723_v9 = vld [vmem:[#allocation15 + $0x178] sm:$0xff] }
0x18b3   : > { %v6947_v39 = vadd.f32 %v8234_v57, %v6937_v8  ;;  %9127 = vmatpush3.bf16.msra.mxu1 %v9126_v10  ;;  %v9128_v13 = vpack.c.bf16 %v7695_v23, %v7694_v47  ;;  %9163 = vmatpush3.bf16.msra.mxu0 %v11214_v32  ;;  %v7682_v57 = vld [vmem:[#allocation15 + $0x30] sm:$0xff]  ;;  %v7717_v8 = vld [vmem:[#allocation15 + $0x148] sm:$0xff]  ;;  %v9146_v10 = vpack.c.bf16 %v7687_v12, %v7686_v5  ;;  %v7719_v47 = vld [vmem:[#allocation15 + $0x158] sm:$0xff] }
0x18b4   : > { %9165 = vmatprep.subr.bf16.mxu0 %v11218_v33  ;;  %11857 = vst [vmem:[#allocation33_spill] sm:$0xff] %v11224_v61  ;;  %v9138_v63 = vpack.c.bf16 %v7683_v59, %v7682_v57  ;;  %v11238_v23 = vpack.c.bf16 %v7719_v47, %v7718_v7  ;;  %v7014_v59 = vlaneseq }
0x18b5   : > { %7117 = vmatmul.mubr.f32.gmra.mrb[78].mxu1 %v6947_v39  ;;  %7206 = vmatmul.mubr.f32.gmra.mrb[78].mxu0 %v6947_v39  ;;  %v11232_v39 = vpack.c.bf16 %v7717_v8, %v7716_v4 }
0x18b6   : > { %9129 = vmatprep.subr.bf16.mxu1 %v9128_v13  ;;  %11862 = vst [vmem:[#allocation38_spill] sm:$0xff] %v11238_v23  ;;  %v7705_v13 = vld [vmem:[#allocation15 + $0xe8] sm:$0xff] }
0x18b7   : > { %9131 = vmatpush3.bf16.msra.mxu1 %v9130_v36  ;;  %9167 = vmatpush3.bf16.msra.mxu0 %v11220_v58  ;;  %11860 = vst [vmem:[#allocation36_spill] sm:$0xff] %v11232_v39  ;;  %v9148_v48 = vpack.c.bf16 %v7705_v13, %v7704_v11  ;;  %v7688_v36 = vld [vmem:[#allocation15 + $0x60] sm:$0xff] }
0x18b8   : > { %9133 = vmatprep.subr.bf16.mxu1 %v9132_v29  ;;  %9169 = vmatprep.subr.bf16.mxu0 %v11224_v61  ;;  %v9150_v24 = vpack.c.bf16 %v7689_v20, %v7688_v36  ;;  %v11244_v29 = vpack.c.bf16 %v7721_v28, %v7720_v25 }
0x18ba   : > { %11864 = vst [vmem:[#allocation40_spill] sm:$0xff] %v11244_v29 }
0x18bb   : > { %9135 = vmatpush3.bf16.msra.mxu1 %v9134_v34  ;;  %9171 = vmatpush3.bf16.msra.mxu0 %v11226_v14  ;;  %v9152_v34 = vpack.c.bf16 %v7707_v31, %v7706_v46 }
0x18bc   : > { %9137 = vmatprep.subr.bf16.mxu1 %v9136_v6  ;;  %9173 = vmatprep.subr.bf16.mxu0 %v11230_v60  ;;  %v7722_v6 = vld [vmem:[#allocation15 + $0x170] sm:$0xff] }
0x18bd   : > { %v11250_v57 = vpack.c.bf16 %v7723_v9, %v7722_v6 }
0x18bf   : > { %9139 = vmatpush3.bf16.msra.mxu1 %v9138_v63  ;;  %9175 = vmatpush3.bf16.msra.mxu0 %v11232_v39  ;;  %11866 = vst [vmem:[#allocation42_spill] sm:$0xff] %v11250_v57  ;;  %v7015_v63 = vshrl.u32 %v7014_v59, 7 }
0x18c0   : > { %9141 = vmatprep.subr.bf16.mxu1 %v9140_v56  ;;  %9177 = vmatprep.subr.bf16.mxu0 %v11236_v0 }
0x18c1   : > { %v7016_v40 = vsub.s32 0, %v7015_v63  ;;  %v7024_v45 = vsub.s32 2, %v7015_v63  ;;  %v7020_v26 = vsub.s32 1, %v7015_v63  ;;  %v7028_v15 = vsub.s32 3, %v7015_v63 }
0x18c3   : > { %9143 = vmatpush3.bf16.msra.mxu1 %v9142_v19  ;;  %9179 = vmatpush3.bf16.msra.mxu0 %v11238_v23  ;;  %v11258_v56 = vrot.slane %v7012_v42, %v7016_v40  ;;  %v11260_v1 = vrot.slane %v7012_v42, %v7024_v45  ;;  %v11262_v3 = vrot.slane %v7012_v42, %v7020_v26 }
0x18c4   : > { %9145 = vmatprep.subr.bf16.mxu1 %v9144_v17  ;;  %9181 = vmatprep.subr.bf16.mxu0 %v11242_v22  ;;  %v11264_v55 = vrot.slane %v7012_v42, %v7028_v15 }
0x18c7   : > { %9147 = vmatpush3.bf16.msra.mxu1 %v9146_v10  ;;  %9183 = vmatpush3.bf16.msra.mxu0 %v11244_v29 }
0x18c8   : > { %9149 = vmatprep.subr.bf16.mxu1 %v9148_v48  ;;  %9185 = vmatprep.subr.bf16.mxu0 %v11248_v53 }
0x18cb   : > { %9151 = vmatpush3.bf16.msra.mxu1 %v9150_v24  ;;  %9187 = vmatpush3.bf16.msra.mxu0 %v11250_v57 }
0x18cc   : > { %9153 = vmatprep.subr.bf16.mxu1 %v9152_v34 }
0x18cf   : > { %9155 = vmatpush3.bf16.msra.mxu1 %v9154_v2 }
0x18d0   : > { %9188 = vmatprep.subr.bf16.mxu1 %v11206_v27 }
0x196c   : > { %v7100_v19 = vpop.f32.mrb[72].mxu1  ;;  %v7189_v27 = vpop.f32.mrb[72].mxu0 }
0x196d   : > { %v7101_v4 = vadd.f32 %v7100_v19, %v11258_v56  ;;  %v7190_v8 = vadd.f32 %v7189_v27, %v11260_v1  ;;  %v7102_v44 = vpop.f32.mrb[73].mxu1  ;;  %v7191_v50 = vpop.f32.mrb[73].mxu0 }
0x196e   : > { %v7103_v54 = vadd.f32 %v7102_v44, %v11262_v3  ;;  %v7192_v5 = vadd.f32 %v7191_v50, %v11264_v55 }
0x196f   : > { %v11269_v17 = vmul.f32 0.70710677, %v7101_v4  ;;  %v11271_v38 = vmul.f32 0.70710677, %v7190_v8  ;;  %v11301_v19 = vmul.f32 0.5, %v7101_v4 }
0x1970   : > { %v11274_v12 = vmul.f32 0.70710677, %v7103_v54  ;;  %v11278_v13 = vmul.f32 0.70710677, %v7192_v5  ;;  %v7106_v36 = vpop.f32.mrb[74].mxu1  ;;  %v7195_v20 = vpop.f32.mrb[74].mxu0 }
0x1971   : > { %v7244_v10 = vand.u32 2147483647, %v11269_v17  ;;  %v7246_v7 = vand.u32 2147483647, %v11271_v38  ;;  %v7108_v24 = vpop.f32.mrb[75].mxu1  ;;  %v7197_v25 = vpop.f32.mrb[75].mxu0  ;;  %v7107_v46 = vadd.f32 %v7106_v36, %v11258_v56  ;;  %v7196_v35 = vadd.f32 %v7195_v20, %v11260_v1 }
0x1972   : > { %v7245_v37 = vand.u32 2147483647, %v11274_v12  ;;  %v7247_v28 = vand.u32 2147483647, %v11278_v13  ;;  %v11287_v51 = vadd.f32 %v7108_v24, %v11262_v3  ;;  %v11299_v26 = vadd.f32 %v7197_v25, %v11264_v55 }
0x1973   : > { %v7260_v47 = vmul.f32 0.3275911, %v7244_v10  ;;  %v7262_v11 = vmul.f32 0.3275911, %v7246_v7  ;;  %v7500_v34 = vsub.f32 0.0, %v7244_v10  ;;  %v7502_v62 = vsub.f32 0.0, %v7246_v7 }
0x1974   : > { %v7261_v31 = vmul.f32 0.3275911, %v7245_v37  ;;  %v11284_v43 = vmul.f32 0.70710677, %v7107_v46  ;;  %v7501_v2 = vsub.f32 0.0, %v7245_v37  ;;  %v7503_v59 = vsub.f32 0.0, %v7247_v28 }
0x1975   : > { %v7276_v48 = vadd.f32 1.0, %v7260_v47  ;;  %v7278_v52 = vadd.f32 1.0, %v7262_v11  ;;  %v11289_v6 = vmul.f32 0.70710677, %v7196_v35  ;;  %v7263_v9 = vmul.f32 0.3275911, %v7247_v28 }
0x1976   : > { %v7248_v63 = vand.u32 2147483647, %v11284_v43  ;;  %v11292_v40 = vadd.f32 1.0, %v7261_v31  ;;  %v11296_v42 = vmul.f32 0.70710677, %v11287_v51  ;;  %v7516_v15 = vmul.f32 %v7500_v34, %v7244_v10 }
0x1977   : > { %9483 = vrcp.f32 %v7276_v48  ;;  %v7250_v45 = vand.u32 2147483647, %v11289_v6  ;;  %v7518_v27 = vmul.f32 %v7502_v62, %v7246_v7  ;;  %v7517_v44 = vmul.f32 %v7501_v2, %v7245_v37 }
0x1978   : > { %9485 = vrcp.f32 %v7278_v52  ;;  %v7264_v50 = vmul.f32 0.3275911, %v7248_v63  ;;  %v11303_v47 = vmul.f32 0.5, %v7190_v8  ;;  %v7519_v11 = vmul.f32 %v7503_v59, %v7247_v28 }
0x1979   : > { %v7266_v36 = vmul.f32 0.3275911, %v7250_v45  ;;  %v7249_v20 = vand.u32 2147483647, %v11296_v42  ;;  %v11306_v24 = vmul.f32 0.5, %v7103_v54  ;;  %9487 = vrcp.f32 %v11292_v40 }
0x197a   : > { %v11309_v31 = vadd.f32 1.0, %v7263_v9  ;;  %v11312_v25 = vmul.f32 0.70710677, %v11299_v26  ;;  %v7532_v10 = vmul.f32 1.442695, %v7516_v15  ;;  %v11314_v7 = vmul.f32 0.5, %v7192_v5 }
0x197b   : > { %v7504_v37 = vsub.f32 0.0, %v7248_v63  ;;  %v7506_v8 = vsub.f32 0.0, %v7250_v45  ;;  %v7536_v62 = vmul.f32 1.442695, %v7518_v27  ;;  %v7534_v2 = vmul.f32 1.442695, %v7517_v44 }
0x197c   : > { %v11316_v59 = vadd.f32 1.0, %v7264_v50  ;;  %v7538_v41 = vmul.f32 1.442695, %v7519_v11  ;;  %v11318_v49 = vadd.f32 1.0, %v7266_v36  ;;  %v7265_v9 = vmul.f32 0.3275911, %v7249_v20 }
0x197d   : > { %9489 = vrcp.f32 %v11309_v31  ;;  %v11321_v30 = vmul.f32 0.5, %v7107_v46  ;;  %v7251_v5 = vand.u32 2147483647, %v11312_v25  ;;  %v11324_v27 = vmul.f32 0.5, %v7196_v35 }
0x197e   : > { %v7522_v44 = vmul.f32 %v7506_v8, %v7250_v45  ;;  %9491 = vrcp.f32 %v11316_v59  ;;  %v7505_v36 = vsub.f32 0.0, %v7249_v20  ;;  %vm7596_vm11 = vcmp.ge.f32.partialorder %v11269_v17, 0.0 }
0x197f   : > { %11868 = vst [vmem:[#allocation43_spill] sm:$0xff] %v11321_v30  ;;  %11869 = vst [vmem:[#allocation44_spill] sm:$0xff] %v11324_v27  ;;  %9493 = vrcp.f32 %v11318_v49  ;;  %v7267_v45 = vmul.f32 0.3275911, %v7251_v5  ;;  %vm7598_vm12 = vcmp.ge.f32.partialorder %v11271_v38, 0.0  ;;  %vm7597_vm13 = vcmp.ge.f32.partialorder %v11274_v12, 0.0 }
0x1980   : > { %9495 = vpow2.f32 %v7532_v10  ;;  %v7521_v23 = vmul.f32 %v7505_v36, %v7249_v20  ;;  %vm7599_vm14 = vcmp.ge.f32.partialorder %v11278_v13, 0.0  ;;  %vm7601_vm15 = vcmp.ge.f32.partialorder %v11296_v42, 0.0 }
0x1981   : > { %v9484_v4 = vpop.eup %9483  ;;  %9497 = vpow2.f32 %v7536_v62  ;;  %vm7603_vm0 = vcmp.ge.f32.partialorder %v11312_v25, 0.0  ;;  %vm7600_vm1 = vcmp.ge.f32.partialorder %v11284_v43, 0.0  ;;  %vm7602_vm2 = vcmp.ge.f32.partialorder %v11289_v6, 0.0 }
0x1982   : > { %v9486_v34 = vpop.eup %9485  ;;  %v7308_v28 = vmul.f32 %v9484_v4, %v7276_v48  ;;  %v7520_v48 = vmul.f32 %v7504_v37, %v7248_v63  ;;  %9499 = vpow2.f32 %v7534_v2 }
0x1983   : > { %v7310_v54 = vmul.f32 %v9486_v34, %v7278_v52 }
0x1984   : > { %v7324_v21 = vsub.f32 2.0, %v7308_v28  ;;  %v7112_v15 = vpop.f32.mrb[76].mxu1  ;;  %v7201_v57 = vpop.f32.mrb[76].mxu0  ;;  %v7540_v8 = vmul.f32 1.442695, %v7520_v48 }
0x1985   : > { %v7326_v53 = vsub.f32 2.0, %v7310_v54  ;;  %v7114_v50 = vpop.f32.mrb[77].mxu1  ;;  %v11326_v52 = vpop.f32.mrb[77].mxu0  ;;  %v11332_v46 = vadd.f32 %v7112_v15, %v11258_v56  ;;  %v11337_v54 = vadd.f32 1.0, %v7265_v9  ;;  %v11340_v35 = vadd.f32 %v7201_v57, %v11260_v1 }
0x1986   : > { %v11328_v11 = vmul.f32 %v9484_v4, %v7324_v21  ;;  %v7507_v9 = vsub.f32 0.0, %v7251_v5  ;;  %v11892_v6 = vld [vmem:[#allocation44_spill] sm:$0xff] }
0x1987   : > { %v11334_v28 = vmul.f32 %v9486_v34, %v7326_v53  ;;  %11870 = vst [vmem:[#allocation45_spill] sm:$0xff] %v11340_v35  ;;  %v7544_v53 = vmul.f32 1.442695, %v7522_v44  ;;  %v9488_v34 = vpop.eup %9487  ;;  %v11349_v29 = vmul.f32 0.70710677, %v11332_v46  ;;  %9501 = vrcp.f32 %v11337_v54 }
0x1988   : > { %v7356_v63 = vmul.f32 1.0614054, %v11328_v11  ;;  %v11343_v21 = vpop.f32.mrb[78].mxu1  ;;  %v11345_v4 = vpop.f32.mrb[78].mxu0  ;;  %v11354_v0 = vmul.f32 0.70710677, %v11340_v35  ;;  %9503 = vpow2.f32 %v7538_v41  ;;  %v7523_v35 = vmul.f32 %v7507_v9, %v7251_v5 }
0x1989   : > { %v7358_v37 = vmul.f32 1.0614054, %v11334_v28  ;;  %11871 = vst [vmem:[#allocation46_spill] sm:$0xff] %v11349_v29  ;;  %v11351_v57 = vpop.f32.mrb[79].mxu1  ;;  %v11356_v10 = vpop.f32.mrb[79].mxu0  ;;  %v11360_v44 = vadd.f32 1.0, %v7267_v45  ;;  %9505 = vpow2.f32 %v7540_v8 }
0x198a   : > { %v7372_v15 = vadd.f32 -1.4531521, %v7356_v63  ;;  %11872 = vst [vmem:[#allocation47_spill] sm:$0xff] %v11354_v0  ;;  %v11363_v62 = vand.u32 2147483647, %v11349_v29  ;;  %v9490_v2 = vpop.eup %9489  ;;  %9507 = vpow2.f32 %v7544_v53 }
0x198b   : > { %v7374_v22 = vadd.f32 -1.4531521, %v7358_v37  ;;  %v7309_v37 = vmul.f32 %v9488_v34, %v11292_v40  ;;  %v11368_v20 = vand.u32 2147483647, %v11354_v0  ;;  %v7542_v45 = vmul.f32 1.442695, %v7521_v23  ;;  %v9492_v14 = vpop.eup %9491 }
0x198c   : > { %v7388_v48 = vmul.f32 %v7372_v15, %v11328_v11  ;;  %v7268_v15 = vmul.f32 0.3275911, %v11363_v62  ;;  %9509 = vrcp.f32 %v11360_v44  ;;  %v7115_v40 = vadd.f32 %v7114_v50, %v11262_v3  ;;  %v9494_v0 = vpop.eup %9493 }
0x198d   : > { %v7390_v63 = vmul.f32 %v7374_v22, %v11334_v28  ;;  %v7270_v60 = vmul.f32 0.3275911, %v11368_v20  ;;  %v7325_v5 = vsub.f32 2.0, %v7309_v37  ;;  %v7311_v9 = vmul.f32 %v9490_v2, %v11309_v31 }
0x198e   : > { %v7404_v36 = vadd.f32 1.4214138, %v7388_v48  ;;  %v11374_v41 = vadd.f32 1.0, %v7268_v15  ;;  %v11380_v23 = vmul.f32 0.5, %v11287_v51  ;;  %v7312_v15 = vmul.f32 %v9492_v14, %v11316_v59 }
0x198f   : > { %v7406_v39 = vadd.f32 1.4214138, %v7390_v63  ;;  %v7286_v48 = vadd.f32 1.0, %v7270_v60  ;;  %v7546_v63 = vmul.f32 1.442695, %v7523_v35  ;;  %v11385_v50 = vmul.f32 0.5, %v11299_v26 }
0x1990   : > { %v7420_v22 = vmul.f32 %v7404_v36, %v11328_v11  ;;  %9511 = vrcp.f32 %v11374_v41  ;;  %v9496_v36 = vpop.eup %9495  ;;  %v7314_v60 = vmul.f32 %v9494_v0, %v11318_v49  ;;  %v11390_v51 = vmul.f32 0.5, %v11332_v46 }
0x1991   : > { %v7422_v8 = vmul.f32 %v7406_v39, %v11334_v28  ;;  %9513 = vrcp.f32 %v7286_v48  ;;  %v9498_v39 = vpop.eup %9497  ;;  %v7327_v59 = vsub.f32 2.0, %v7311_v9  ;;  %v11405_v49 = vadd.f32 %v11343_v21, %v11258_v56 }
0x1992   : > { %v7436_v53 = vadd.f32 -0.28449672, %v7420_v22  ;;  %9515 = vpow2.f32 %v7542_v45  ;;  %11873 = vst [vmem:[#allocation48_spill] sm:$0xff] %v11390_v51  ;;  %v11392_v31 = vpop.eup %9499  ;;  %v11395_v22 = vmul.f32 %v9488_v34, %v7325_v5  ;;  %v7508_v34 = vsub.f32 0.0, %v11363_v62 }
0x1993   : > { %v7438_v27 = vadd.f32 -0.28449672, %v7422_v8  ;;  %v11397_v8 = vmul.f32 0.70710677, %v7115_v40  ;;  %v9502_v26 = vpop.eup %9501  ;;  %9517 = vpow2.f32 %v7546_v63  ;;  %11875 = vst [vmem:[#allocation50_spill] sm:$0xff] %v11405_v49  ;;  %v11425_v29 = vmul.f32 %v9490_v2, %v7327_v59 }
0x1994   : > { %v7452_v37 = vmul.f32 %v7436_v53, %v11328_v11  ;;  %v11401_v53 = vadd.f32 %v11326_v52, %v11264_v55  ;;  %v11407_v46 = vpop.eup %9503  ;;  %v7510_v52 = vsub.f32 0.0, %v11368_v20  ;;  %v11423_v58 = vmul.f32 0.70710677, %v11405_v49 }
0x1995   : > { %v7454_v35 = vmul.f32 %v7438_v27, %v11334_v28  ;;  %v7328_v27 = vsub.f32 2.0, %v7312_v15  ;;  %v7253_v5 = vand.u32 2147483647, %v11397_v8  ;;  %v11411_v9 = vpop.eup %9505  ;;  %v7313_v15 = vmul.f32 %v9502_v26, %v11337_v54 }
0x1996   : > { %v7468_v61 = vadd.f32 0.2548296, %v7452_v37  ;;  %11874 = vst [vmem:[#allocation49_spill] sm:$0xff] %v11401_v53  ;;  %v7330_v37 = vsub.f32 2.0, %v7314_v60  ;;  %v11416_v51 = vmul.f32 0.70710677, %v11401_v53  ;;  %v11418_v56 = vpop.eup %9507  ;;  %v7524_v2 = vmul.f32 %v7508_v34, %v11363_v62 }
0x1997   : > { %v7470_v45 = vadd.f32 0.2548296, %v7454_v35  ;;  %11877 = vst [vmem:[#allocation52_spill] sm:$0xff] %v11418_v56  ;;  %v7269_v35 = vmul.f32 0.3275911, %v7253_v5  ;;  %11878 = vst [vmem:[#allocation53_spill] sm:$0xff] %v11423_v58  ;;  %v9510_v33 = vpop.eup %9509  ;;  %v11434_v54 = vmul.f32 %v9492_v14, %v7328_v27 }
0x1998   : > { %v7484_v63 = vmul.f32 %v7468_v61, %v11328_v11  ;;  %11876 = vst [vmem:[#allocation51_spill] sm:$0xff] %v11416_v51  ;;  %v11427_v61 = vmul.f32 0.5, %v7115_v40  ;;  %v7255_v11 = vand.u32 2147483647, %v11416_v51  ;;  %v7509_v32 = vsub.f32 0.0, %v7253_v5 }
0x1999   : > { %v7486_v21 = vmul.f32 %v7470_v45, %v11334_v28  ;;  %v11430_v53 = vadd.f32 1.0, %v7269_v35  ;;  %v7256_v28 = vand.u32 2147483647, %v11423_v58  ;;  %v11436_v49 = vmul.f32 %v9494_v0, %v7330_v37 }
0x199a   : > { %v7564_v30 = vmul.f32 %v9496_v36, %v7484_v63  ;;  %11879 = vst [vmem:[#allocation54_spill] sm:$0xff] %v11427_v61  ;;  %v9512_v45 = vpop.eup %9511  ;;  %v7271_v36 = vmul.f32 0.3275911, %v7255_v11  ;;  %v7329_v63 = vsub.f32 2.0, %v7313_v15  ;;  %v7511_v0 = vsub.f32 0.0, %v7255_v11 }
0x199b   : > { %v7566_v60 = vmul.f32 %v9498_v39, %v7486_v21  ;;  %v9514_v40 = vpop.eup %9513  ;;  %v7315_v39 = vmul.f32 %v9510_v33, %v11360_v44  ;;  %v7526_v21 = vmul.f32 %v7510_v52, %v11368_v20  ;;  %9519 = vrcp.f32 %v11430_v53 }
0x199c   : > { %v7580_v59 = vsub.f32 1.0, %v7564_v30  ;;  %v11441_v35 = vpop.eup %9515  ;;  %v7318_v58 = vmul.f32 %v9514_v40, %v7286_v48  ;;  %v7287_v14 = vadd.f32 1.0, %v7271_v36  ;;  %v7525_v37 = vmul.f32 %v7509_v32, %v7253_v5 }
0x199d   : > { %v7582_v27 = vsub.f32 1.0, %v7566_v60  ;;  %v7272_v62 = vmul.f32 0.3275911, %v7256_v28  ;;  %v11447_v30 = vadd.f32 %v11345_v4, %v11260_v1  ;;  %v11449_v34 = vpop.eup %9517  ;;  %v7316_v44 = vmul.f32 %v9512_v45, %v11374_v41 }
0x199e   : > { %v7548_v20 = vmul.f32 1.442695, %v7524_v2  ;;  %v7334_v52 = vsub.f32 2.0, %v7318_v58  ;;  %9521 = vrcp.f32 %v7287_v14  ;;  %v7612_v15 = vsub.f32 0.0, %v7580_v59 }
0x199f   : > { %11880 = vst [vmem:[#allocation55_spill] sm:$0xff] %v11447_v30  ;;  %v11452_v48 = vmul.f32 %v9502_v26, %v7329_v63  ;;  %v7552_v51 = vmul.f32 1.442695, %v7526_v21  ;;  %v7288_v36 = vadd.f32 1.0, %v7272_v62  ;;  %v7331_v61 = vsub.f32 2.0, %v7315_v39 }
0x19a0   : > { %v11454_v60 = vmul.f32 %v9514_v40, %v7334_v52  ;;  %v7527_v32 = vmul.f32 %v7511_v0, %v7255_v11  ;;  %v7512_v5 = vsub.f32 0.0, %v7256_v28  ;;  %v7614_v56 = vsub.f32 0.0, %v7582_v27 }
0x19a1   : > { %v7550_v1 = vmul.f32 1.442695, %v7525_v37  ;;  %9523 = vrcp.f32 %v7288_v36  ;;  %v11457_v4 = vmul.f32 0.70710677, %v11447_v30  ;;  %v7332_v41 = vsub.f32 2.0, %v7316_v44 }
0x19a2   : > { %9525 = vpow2.f32 %v7548_v20  ;;  %v7366_v58 = vmul.f32 1.0614054, %v11454_v60  ;;  %v11462_v26 = vadd.f32 %v11351_v57, %v11262_v3  ;;  %v7628_v2 = vsel %vm7596_vm11, %v7580_v59, %v7612_v15 }
0x19a3   : > { %11881 = vst [vmem:[#allocation56_spill] sm:$0xff] %v11457_v4  ;;  %v7528_v40 = vmul.f32 %v7512_v5, %v7256_v28  ;;  %v7258_v11 = vand.u32 2147483647, %v11457_v4  ;;  %v11469_v63 = vadd.f32 %v11356_v10, %v11264_v55  ;;  %v11471_v39 = vmul.f32 %v9510_v33, %v7331_v61 }
0x19a4   : > { %11882 = vst [vmem:[#allocation57_spill] sm:$0xff] %v11462_v26  ;;  %v7382_v21 = vadd.f32 -1.4531521, %v7366_v58  ;;  %9527 = vpow2.f32 %v7552_v51  ;;  %v7554_v0 = vmul.f32 1.442695, %v7527_v32  ;;  %v7630_v37 = vsel %vm7598_vm12, %v7582_v27, %v7614_v56 }
0x19a5   : > { %11883 = vst [vmem:[#allocation58_spill] sm:$0xff] %v11469_v63  ;;  %9529 = vpow2.f32 %v7550_v1  ;;  %v7274_v3 = vmul.f32 0.3275911, %v7258_v11  ;;  %v11476_v17 = vmul.f32 0.70710677, %v11462_v26  ;;  %v9520_v57 = vpop.eup %9519  ;;  %v7644_v28 = vadd.f32 1.0, %v7628_v2 }
0x19a6   : > { %v7398_v59 = vmul.f32 %v7382_v21, %v11454_v60  ;;  %v7514_v62 = vsub.f32 0.0, %v7258_v11  ;;  %v11480_v55 = vmul.f32 0.70710677, %v11469_v63  ;;  %v11482_v33 = vmul.f32 %v9512_v45, %v7332_v41 }
0x19a7   : > { %v7556_v10 = vmul.f32 1.442695, %v7528_v40  ;;  %v7290_v51 = vadd.f32 1.0, %v7274_v3  ;;  %v7257_v38 = vand.u32 2147483647, %v11476_v17  ;;  %v7646_v61 = vadd.f32 1.0, %v7630_v37 }
0x19a8   : > { %11884 = vst [vmem:[#allocation59_spill] sm:$0xff] %v11480_v55  ;;  %v9522_v56 = vpop.eup %9521  ;;  %v7414_v27 = vadd.f32 1.4214138, %v7398_v59  ;;  %9531 = vpow2.f32 %v7554_v0  ;;  %v7259_v44 = vand.u32 2147483647, %v11480_v55  ;;  %v7317_v20 = vmul.f32 %v9520_v57, %v11430_v53 }
0x19a9   : > { %9533 = vrcp.f32 %v7290_v51  ;;  %v7273_v52 = vmul.f32 0.3275911, %v7257_v38  ;;  %v7357_v15 = vmul.f32 1.0614054, %v11395_v22  ;;  %v7530_v45 = vmul.f32 %v7514_v62, %v7258_v11 }
0x19aa   : > { %v7430_v32 = vmul.f32 %v7414_v27, %v11454_v60  ;;  %v7513_v5 = vsub.f32 0.0, %v7257_v38  ;;  %v7275_v1 = vmul.f32 0.3275911, %v7259_v44  ;;  %v7319_v58 = vmul.f32 %v9522_v56, %v7287_v14 }
0x19ab   : > { %v9524_v41 = vpop.eup %9523  ;;  %9535 = vpow2.f32 %v7556_v10  ;;  %v7289_v2 = vadd.f32 1.0, %v7273_v52  ;;  %v7515_v40 = vsub.f32 0.0, %v7259_v44  ;;  %v11492_v59 = vmul.f32 %v7644_v28, %v11301_v19 }
0x19ac   : > { %v11489_v21 = vpop.eup %9525  ;;  %v7446_v0 = vadd.f32 -0.28449672, %v7430_v32  ;;  %v7320_v37 = vmul.f32 %v9524_v41, %v7288_v36  ;;  %v7529_v3 = vmul.f32 %v7513_v5, %v7257_v38  ;;  %v7291_v53 = vadd.f32 1.0, %v7275_v1 }
0x19ad   : > { %v7333_v30 = vsub.f32 2.0, %v7317_v20  ;;  %9537 = vrcp.f32 %v7289_v2  ;;  %v7373_v27 = vadd.f32 -1.4531521, %v7357_v15  ;;  %v11497_v62 = vmul.f32 %v7646_v61, %v11303_v47 }
0x19ae   : > { %v11494_v11 = vpop.eup %9527  ;;  %v7560_v14 = vmul.f32 1.442695, %v7530_v45  ;;  %9539 = vrcp.f32 %v7291_v53  ;;  %v7531_v10 = vmul.f32 %v7515_v40, %v7259_v44  ;;  %v7462_v36 = vmul.f32 %v7446_v0, %v11454_v60 }
0x19af   : > { %v11499_v52 = vpop.eup %9529  ;;  %v7389_v38 = vmul.f32 %v7373_v27, %v11395_v22  ;;  %v7359_v19 = vmul.f32 1.0614054, %v11425_v29  ;;  %v7361_v28 = vmul.f32 1.0614054, %v11452_v48  ;;  %v7335_v20 = vsub.f32 2.0, %v7319_v58 }
0x19b0   : > { %v7336_v15 = vsub.f32 2.0, %v7320_v37  ;;  %v7558_v32 = vmul.f32 1.442695, %v7529_v3  ;;  %v7363_v5 = vmul.f32 1.0614054, %v11471_v39  ;;  %v11506_v47 = vmul.f32 %v9520_v57, %v7333_v30 }
0x19b1   : > { %v7405_v61 = vadd.f32 1.4214138, %v7389_v38  ;;  %v7375_v45 = vadd.f32 -1.4531521, %v7359_v19  ;;  %v7377_v44 = vadd.f32 -1.4531521, %v7361_v28  ;;  %9541 = vpow2.f32 %v7560_v14 }
0x19b2   : > { %v11508_v1 = vpop.eup %9531  ;;  %v7562_v40 = vmul.f32 1.442695, %v7531_v10  ;;  %v7379_v0 = vadd.f32 -1.4531521, %v7363_v5  ;;  %v7360_v27 = vmul.f32 1.0614054, %v11434_v54  ;;  %v11518_v14 = vmul.f32 %v9522_v56, %v7335_v20 }
0x19b3   : > { %v9534_v63 = vpop.eup %9533  ;;  %v7478_v4 = vadd.f32 0.2548296, %v7462_v36  ;;  %v7421_v58 = vmul.f32 %v7405_v61, %v11395_v22  ;;  %v7391_v37 = vmul.f32 %v7375_v45, %v11425_v29  ;;  %v7393_v3 = vmul.f32 %v7377_v44, %v11452_v48 }
0x19b4   : > { %v7322_v30 = vmul.f32 %v9534_v63, %v7290_v51  ;;  %v7395_v57 = vmul.f32 %v7379_v0, %v11471_v39  ;;  %v7376_v38 = vadd.f32 -1.4531521, %v7360_v27  ;;  %v7362_v19 = vmul.f32 1.0614054, %v11436_v49 }
0x19b5   : > { %v11516_v28 = vpop.eup %9535  ;;  %v7437_v10 = vadd.f32 -0.28449672, %v7421_v58  ;;  %v7407_v5 = vadd.f32 1.4214138, %v7391_v37  ;;  %v7409_v55 = vadd.f32 1.4214138, %v7393_v3  ;;  %v11520_v36 = vmul.f32 %v9524_v41, %v7336_v15 }
0x19b6   : > { %9543 = vpow2.f32 %v7558_v32  ;;  %v7411_v61 = vadd.f32 1.4214138, %v7395_v57  ;;  %v7392_v45 = vmul.f32 %v7376_v38, %v11434_v54  ;;  %v7338_v56 = vsub.f32 2.0, %v7322_v30 }
0x19b7   : > { %v9538_v44 = vpop.eup %9537  ;;  %9545 = vpow2.f32 %v7562_v40  ;;  %v7453_v51 = vmul.f32 %v7437_v10, %v11395_v22  ;;  %v7423_v0 = vmul.f32 %v7407_v5, %v11425_v29  ;;  %v7425_v27 = vmul.f32 %v7409_v55, %v11452_v48 }
0x19b8   : > { %v9540_v26 = vpop.eup %9539  ;;  %v7321_v20 = vmul.f32 %v9538_v44, %v7289_v2  ;;  %v7427_v58 = vmul.f32 %v7411_v61, %v11471_v39  ;;  %v7378_v37 = vadd.f32 -1.4531521, %v7362_v19  ;;  %v11529_v40 = vmul.f32 %v7478_v4, %v11454_v60 }
0x19b9   : > { %v7323_v41 = vmul.f32 %v9540_v26, %v7291_v53  ;;  %v7469_v15 = vadd.f32 0.2548296, %v7453_v51  ;;  %v7439_v32 = vadd.f32 -0.28449672, %v7423_v0  ;;  %v7441_v3 = vadd.f32 -0.28449672, %v7425_v27 }
0x19ba   : > { %v7337_v57 = vsub.f32 2.0, %v7321_v20  ;;  %v7443_v38 = vadd.f32 -0.28449672, %v7427_v58  ;;  %v7408_v10 = vadd.f32 1.4214138, %v7392_v45  ;;  %v11536_v53 = vmul.f32 %v9534_v63, %v7338_v56 }
0x19bb   : > { %v7339_v5 = vsub.f32 2.0, %v7323_v41  ;;  %v7485_v55 = vmul.f32 %v7469_v15, %v11395_v22  ;;  %v7455_v2 = vmul.f32 %v7439_v32, %v11425_v29  ;;  %v7365_v30 = vmul.f32 1.0614054, %v11506_v47  ;;  %v11534_v19 = vpop.eup %9541 }
0x19bc   : > { %v7457_v61 = vmul.f32 %v7441_v3, %v11452_v48  ;;  %v7459_v51 = vmul.f32 %v7443_v38, %v11471_v39  ;;  %v7424_v60 = vmul.f32 %v7408_v10, %v11434_v54  ;;  %v11541_v4 = vmul.f32 %v9538_v44, %v7337_v57 }
0x19bd   : > { %v11543_v45 = vmul.f32 %v9540_v26, %v7339_v5  ;;  %v7565_v22 = vmul.f32 %v11392_v31, %v7485_v55  ;;  %v7471_v0 = vadd.f32 0.2548296, %v7455_v2  ;;  %v7394_v63 = vmul.f32 %v7378_v37, %v11436_v49 }
0x19be   : > { %v7473_v27 = vadd.f32 0.2548296, %v7457_v61  ;;  %v7475_v20 = vadd.f32 0.2548296, %v7459_v51  ;;  %v7440_v58 = vadd.f32 -0.28449672, %v7424_v60 }
0x19bf   : > { %v7581_v56 = vsub.f32 1.0, %v7565_v22  ;;  %v7487_v44 = vmul.f32 %v7471_v0, %v11425_v29  ;;  %v7381_v41 = vadd.f32 -1.4531521, %v7365_v30  ;;  %v7364_v26 = vmul.f32 1.0614054, %v11482_v33 }
0x19c0   : > { %v11552_v15 = vpop.eup %9543  ;;  %v7489_v31 = vmul.f32 %v7473_v27, %v11452_v48  ;;  %v7491_v32 = vmul.f32 %v7475_v20, %v11471_v39  ;;  %v7456_v3 = vmul.f32 %v7440_v58, %v11434_v54  ;;  %v7410_v57 = vadd.f32 1.4214138, %v7394_v63 }
0x19c1   : > { %v11557_v37 = vpop.eup %9545  ;;  %v7613_v38 = vsub.f32 0.0, %v7581_v56  ;;  %v7567_v10 = vmul.f32 %v11407_v46, %v7487_v44  ;;  %v7397_v5 = vmul.f32 %v7381_v41, %v11506_v47  ;;  %v7380_v29 = vadd.f32 -1.4531521, %v7364_v26 }
0x19c2   : > { %v7569_v55 = vmul.f32 %v11441_v35, %v7489_v31  ;;  %v7571_v2 = vmul.f32 %v11449_v34, %v7491_v32  ;;  %v7472_v30 = vadd.f32 0.2548296, %v7456_v3  ;;  %v7426_v48 = vmul.f32 %v7410_v57, %v11436_v49 }
0x19c3   : > { %v7629_v39 = vsel %vm7597_vm13, %v7581_v56, %v7613_v38  ;;  %v7583_v61 = vsub.f32 1.0, %v7567_v10  ;;  %v7413_v51 = vadd.f32 1.4214138, %v7397_v5  ;;  %v7396_v60 = vmul.f32 %v7380_v29, %v11482_v33 }
0x19c4   : > { %v7645_v46 = vadd.f32 1.0, %v7629_v39  ;;  %v7585_v22 = vsub.f32 1.0, %v7569_v55  ;;  %v7587_v0 = vsub.f32 1.0, %v7571_v2  ;;  %v7488_v27 = vmul.f32 %v7472_v30, %v11434_v54 }
0x19c5   : > { %v7615_v35 = vsub.f32 0.0, %v7583_v61  ;;  %v7442_v20 = vadd.f32 -0.28449672, %v7426_v48  ;;  %v7429_v34 = vmul.f32 %v7413_v51, %v11506_v47  ;;  %v7412_v58 = vadd.f32 1.4214138, %v7396_v60  ;;  %v11886_v51 = vld [vmem:[#allocation30_spill] sm:$0xff] }
0x19c6   : > { %v7661_v63 = vmul.f32 %v7645_v46, %v11306_v24  ;;  %v7617_v44 = vsub.f32 0.0, %v7585_v22  ;;  %v7619_v41 = vsub.f32 0.0, %v7587_v0  ;;  %v7568_v12 = vmul.f32 %v11411_v9, %v7488_v27 }
0x19c7   : > { %v7631_v56 = vsel %vm7599_vm14, %v7583_v61, %v7615_v35  ;;  %v7458_v26 = vmul.f32 %v7442_v20, %v11436_v49  ;;  %v7445_v31 = vadd.f32 -0.28449672, %v7429_v34  ;;  %v7428_v32 = vmul.f32 %v7412_v58, %v11482_v33  ;;  %v11889_v20 = vld [vmem:[#allocation31_spill] sm:$0xff] }
0x19c8   : > { %7804 = vmatprep.mubr.f32.mxu1 %v7661_v63  ;;  %v7647_v54 = vadd.f32 1.0, %v7631_v56  ;;  %v7633_v3 = vsel %vm7601_vm15, %v7585_v22, %v7617_v44  ;;  %v7635_v24 = vsel %vm7603_vm0, %v7587_v0, %v7619_v41  ;;  %v7584_v57 = vsub.f32 1.0, %v7568_v12  ;;  %v11887_v0 = vld [vmem:[#allocation46_spill] sm:$0xff] }
0x19c9   : > { %7805 = vmatmul.mubr.f32.vlgmr.msra.gmra.mrb[80].mxu1 %v11492_v59  ;;  %v7649_v9 = vadd.f32 1.0, %v7633_v3  ;;  %v7651_v38 = vadd.f32 1.0, %v7635_v24  ;;  %v7474_v13 = vadd.f32 0.2548296, %v7458_v26  ;;  %v7461_v10 = vmul.f32 %v7445_v31, %v11506_v47 }
0x19ca   : > { %v7663_v5 = vmul.f32 %v7647_v54, %v11314_v7  ;;  %9196 = vmatpush3.bf16.msra.mxu1 %v11209_v18  ;;  %v7616_v29 = vsub.f32 0.0, %v7584_v57  ;;  %v7444_v42 = vadd.f32 -0.28449672, %v7428_v32  ;;  %v7369_v55 = vmul.f32 1.0614054, %v11541_v4  ;;  %v11890_v32 = vld [vmem:[#allocation32_spill] sm:$0xff] }
0x19cb   : > { %v7665_v25 = vmul.f32 %v7649_v9, %v11380_v23  ;;  %v7667_v2 = vmul.f32 %v7651_v38, %v11385_v50  ;;  %9189 = vmatprep.subr.bf16.mxu1 %v11212_v16  ;;  %v7490_v59 = vmul.f32 %v7474_v13, %v11436_v49  ;;  %v7477_v30 = vadd.f32 0.2548296, %v7461_v10  ;;  %v11885_v50 = vld [vmem:[#allocation52_spill] sm:$0xff] }
0x19cc   : > { %vm7605_vm3 = vcmp.ge.f32.partialorder %v11397_v8, 0.0  ;;  %7889 = vmatprep.mubr.f32.mxu0 %v7663_v5  ;;  %v7632_v7 = vsel %vm7600_vm1, %v7584_v57, %v7616_v29  ;;  %v7460_v18 = vmul.f32 %v7444_v42, %v11482_v33  ;;  %v7385_v48 = vadd.f32 -1.4531521, %v7369_v55  ;;  %v11891_v57 = vld [vmem:[#allocation33_spill] sm:$0xff] }
0x19cd   : > { %v7368_v39 = vmul.f32 1.0614054, %v11520_v36  ;;  %7890 = vmatmul.mubr.f32.vlgmr.msra.gmra.mrb[80].mxu0 %v11497_v62  ;;  %7809 = vmatprep.mubr.f32.mxu1 %v7665_v25  ;;  %v7648_v23 = vadd.f32 1.0, %v7632_v7  ;;  %v7570_v16 = vmul.f32 %v11885_v50, %v7490_v59  ;;  %v7493_v49 = vmul.f32 %v7477_v30, %v11506_v47  ;;  %v11888_v62 = vld [vmem:[#allocation43_spill] sm:$0xff]  ;;  %v11893_v30 = vld [vmem:[#allocation34_spill] sm:$0xff] }
0x19ce   : > { %v7367_v61 = vmul.f32 1.0614054, %v11518_v14  ;;  %7894 = vmatprep.mubr.f32.mxu0 %v7667_v2  ;;  %9197 = vmatpush3.bf16.msra.mxu1 %v11886_v51  ;;  %v7476_v43 = vadd.f32 0.2548296, %v7460_v18  ;;  %v7401_v60 = vmul.f32 %v7385_v48, %v11541_v4  ;;  %v7371_v22 = vmul.f32 1.0614054, %v11543_v45 }
0x19cf   : > { %v7384_v46 = vadd.f32 -1.4531521, %v7368_v39  ;;  %vm7604_vm4 = vcmp.ge.f32.partialorder %v11887_v0, 0.0  ;;  %v7664_v27 = vmul.f32 %v7648_v23, %v11888_v62  ;;  %v7586_v35 = vsub.f32 1.0, %v7570_v16  ;;  %9190 = vmatprep.subr.bf16.mxu1 %v11889_v20  ;;  %v11894_v39 = vld [vmem:[#allocation35_spill] sm:$0xff] }
0x19d0   : > { %v7573_v47 = vmul.f32 %v11499_v52, %v7493_v49  ;;  %v7383_v34 = vadd.f32 -1.4531521, %v7367_v61  ;;  %v7492_v58 = vmul.f32 %v7476_v43, %v11482_v33  ;;  %v7417_v63 = vadd.f32 1.4214138, %v7401_v60  ;;  %v11895_v61 = vld [vmem:[#allocation54_spill] sm:$0xff] }
0x19d1   : > { %v7400_v44 = vmul.f32 %v7384_v46, %v11520_v36  ;;  %v7387_v41 = vadd.f32 -1.4531521, %v7371_v22  ;;  %7810 = vmatmul.mubr.f32.gmra.mrb[82].mxu1 %v7664_v27  ;;  %v7618_v12 = vsub.f32 0.0, %v7586_v35  ;;  %v7370_v31 = vmul.f32 1.0614054, %v11536_v53 }
0x19d2   : > { %v7589_v56 = vsub.f32 1.0, %v7573_v47  ;;  %v7399_v26 = vmul.f32 %v7383_v34, %v11518_v14  ;;  %9198 = vmatpush3.bf16.msra.mxu1 %v11890_v32  ;;  %v7572_v54 = vmul.f32 %v11489_v21, %v7492_v58  ;;  %v7433_v52 = vmul.f32 %v7417_v63, %v11541_v4  ;;  %v11898_v47 = vld [vmem:[#allocation48_spill] sm:$0xff] }
0x19d3   : > { %v7416_v3 = vadd.f32 1.4214138, %v7400_v44  ;;  %v7403_v33 = vmul.f32 %v7387_v41, %v11543_v45  ;;  %v7634_v24 = vsel %vm7602_vm2, %v7586_v35, %v7618_v12  ;;  %9191 = vmatprep.subr.bf16.mxu1 %v11891_v57  ;;  %v7386_v13 = vadd.f32 -1.4531521, %v7370_v31  ;;  %v11896_v35 = vld [vmem:[#allocation36_spill] sm:$0xff]  ;;  %v11899_v31 = vld [vmem:[#allocation38_spill] sm:$0xff] }
0x19d4   : > { %v7621_v9 = vsub.f32 0.0, %v7589_v56  ;;  %v7415_v38 = vadd.f32 1.4214138, %v7399_v26  ;;  %v7650_v10 = vadd.f32 1.0, %v7634_v24  ;;  %v7588_v5 = vsub.f32 1.0, %v7572_v54  ;;  %v11901_v24 = vld [vmem:[#allocation47_spill] sm:$0xff] }
0x19d5   : > { %v7449_v29 = vadd.f32 -0.28449672, %v7433_v52  ;;  %v7432_v42 = vmul.f32 %v7416_v3, %v11520_v36  ;;  %v7419_v25 = vadd.f32 1.4214138, %v7403_v33  ;;  %v7402_v2 = vmul.f32 %v7386_v13, %v11536_v53  ;;  %v11900_v52 = vld [vmem:[#allocation39_spill] sm:$0xff] }
0x19d6   : > { %v7637_v21 = vsel %vm7605_vm3, %v7589_v56, %v7621_v9  ;;  %v7431_v55 = vmul.f32 %v7415_v38, %v11518_v14  ;;  %v7666_v59 = vmul.f32 %v7650_v10, %v11892_v6  ;;  %9199 = vmatpush3.bf16.msra.mxu1 %v11893_v30  ;;  %v7620_v18 = vsub.f32 0.0, %v7588_v5  ;;  %v11902_v10 = vld [vmem:[#allocation50_spill] sm:$0xff] }
0x19d7   : > { %v7653_v7 = vadd.f32 1.0, %v7637_v21  ;;  %v7465_v48 = vmul.f32 %v7449_v29, %v11541_v4  ;;  %9192 = vmatprep.subr.bf16.mxu1 %v11894_v39  ;;  %v7448_v23 = vadd.f32 -0.28449672, %v7432_v42  ;;  %v7435_v8 = vmul.f32 %v7419_v25, %v11543_v45  ;;  %v11903_v29 = vld [vmem:[#allocation57_spill] sm:$0xff] }
0x19d8   : > { %v7447_v50 = vadd.f32 -0.28449672, %v7431_v55  ;;  %v7418_v16 = vadd.f32 1.4214138, %v7402_v2  ;;  %v7574_v49 = vmul.f32 %v11494_v11, %v11529_v40  ;;  %7895 = vmatmul.mubr.f32.gmra.mrb[82].mxu0 %v7666_v59  ;;  %v7636_v43 = vsel %vm7604_vm4, %v7588_v5, %v7620_v18  ;;  %v11897_v40 = vld [vmem:[#allocation37_spill] sm:$0xff]  ;;  %v11906_v59 = vld [vmem:[#allocation51_spill] sm:$0xff] }
0x19d9   : > { %v7669_v51 = vmul.f32 %v7653_v7, %v11895_v61  ;;  %v7481_v60 = vadd.f32 0.2548296, %v7465_v48  ;;  %v7652_v46 = vadd.f32 1.0, %v7636_v43  ;;  %v7464_v22 = vmul.f32 %v7448_v23, %v11520_v36  ;;  %v11905_v25 = vld [vmem:[#allocation41_spill] sm:$0xff] }
0x19da   : > { %v7463_v62 = vmul.f32 %v7447_v50, %v11518_v14  ;;  %v7451_v27 = vadd.f32 -0.28449672, %v7435_v8  ;;  %9200 = vmatpush3.bf16.msra.mxu1 %v11896_v35  ;;  %v7434_v11 = vmul.f32 %v7418_v16, %v11536_v53  ;;  %v7590_v44 = vsub.f32 1.0, %v7574_v49  ;;  %v11909_v50 = vld [vmem:[#allocation42_spill] sm:$0xff]  ;;  %v11910_v49 = vld [vmem:[#allocation49_spill] sm:$0xff] }
0x19db   : > { %7814 = vmatprep.mubr.f32.mxu1 %v7669_v51  ;;  %v7497_v20 = vmul.f32 %v7481_v60, %v11541_v4  ;;  %9193 = vmatprep.subr.bf16.mxu1 %v11897_v40  ;;  %v7668_v34 = vmul.f32 %v7652_v46, %v11898_v47  ;;  %v7480_v0 = vadd.f32 0.2548296, %v7464_v22  ;;  %vm7606_vm5 = vcmp.ge.f32.partialorder %v11901_v24, 0.0  ;;  %v11911_v22 = vld [vmem:[#allocation56_spill] sm:$0xff] }
0x19dc   : > { %v7479_v58 = vadd.f32 0.2548296, %v7463_v62  ;;  %v7467_v63 = vmul.f32 %v7451_v27, %v11543_v45  ;;  %v7450_v12 = vadd.f32 -0.28449672, %v7434_v11  ;;  %v7622_v57 = vsub.f32 0.0, %v7590_v44  ;;  %v11912_v27 = vld [vmem:[#allocation45_spill] sm:$0xff] }
0x19dd   : > { %v7577_v41 = vmul.f32 %v11552_v15, %v7497_v20  ;;  %7815 = vmatmul.mubr.f32.gmra.mrb[84].mxu1 %v7668_v34  ;;  %v7496_v56 = vmul.f32 %v7480_v0, %v11520_v36  ;;  %vm7609_vm6 = vcmp.ge.f32.partialorder %v11476_v17, 0.0  ;;  %v7224_v5 = vmul.f32 0.5, %v11902_v10  ;;  %v11913_v11 = vld [vmem:[#allocation58_spill] sm:$0xff] }
0x19de   : > { %v7495_v26 = vmul.f32 %v7479_v58, %v11518_v14  ;;  %v7483_v4 = vadd.f32 0.2548296, %v7467_v63  ;;  %9201 = vmatpush3.bf16.msra.mxu1 %v11899_v31  ;;  %v7466_v54 = vmul.f32 %v7450_v12, %v11536_v53  ;;  %v7225_v42 = vmul.f32 0.5, %v11903_v29  ;;  %v11914_v58 = vld [vmem:[#allocation55_spill] sm:$0xff]  ;;  %v11917_v10 = vld [vmem:[#allocation26_spill] sm:$0xff] }
0x19df   : > { %v7593_v32 = vsub.f32 1.0, %v7577_v41  ;;  %9194 = vmatprep.subr.bf16.mxu1 %v11900_v52  ;;  %v7576_v3 = vmul.f32 %v11516_v28, %v7496_v56  ;;  %v11904_v28 = vld [vmem:[#allocation40_spill] sm:$0xff]  ;;  %v7638_v17 = vsel %vm7606_vm5, %v7590_v44, %v7622_v57  ;;  %vm7607_vm7 = vcmp.ge.f32.partialorder %v11906_v59, 0.0  ;;  %v8235_v52 = vld [vmem:[%s11915_s6] ss:$0 sm:$0xff] }
0x19e0   : > { %v7575_v33 = vmul.f32 %v11508_v1, %v7495_v26  ;;  %v7499_v15 = vmul.f32 %v7483_v4, %v11543_v45  ;;  %v7482_v9 = vadd.f32 0.2548296, %v7466_v54  ;;  %v7223_v61 = vmul.f32 0.5, %v11910_v49 }
0x19e1   : > { %v7625_v36 = vsub.f32 0.0, %v7593_v32  ;;  %v7592_v14 = vsub.f32 1.0, %v7576_v3  ;;  %v7654_v43 = vadd.f32 1.0, %v7638_v17  ;;  %vm7610_vm10 = vcmp.ge.f32.partialorder %v11911_v22, 0.0 }
0x19e2   : > { %v7591_v38 = vsub.f32 1.0, %v7575_v33  ;;  %v7579_v13 = vmul.f32 %v11557_v37, %v7499_v15  ;;  %9202 = vmatpush3.bf16.msra.mxu1 %v11904_v28  ;;  %v7498_v45 = vmul.f32 %v7482_v9, %v11536_v53  ;;  %v11907_v37 = vld [vmem:[#allocation53_spill] sm:$0xff]  ;;  %v11908_v53 = vld [vmem:[#allocation59_spill] sm:$0xff]  ;;  %v7222_v35 = vmul.f32 0.5, %v11912_v27 }
0x19e3   : > { %v7641_v1 = vsel %vm7609_vm6, %v7593_v32, %v7625_v36  ;;  %v7624_v55 = vsub.f32 0.0, %v7592_v14  ;;  %9195 = vmatprep.subr.bf16.mxu1 %v11905_v25  ;;  %vm7608_vm8 = vcmp.ge.f32.partialorder %v11907_v37, 0.0  ;;  %vm7611_vm9 = vcmp.ge.f32.partialorder %v11908_v53, 0.0  ;;  %v11916_v33 = vld [vmem:[#allocation27_spill] sm:$0xff]  ;;  %v11918_v37 = vld [vmem:[#allocation28_spill] sm:$0xff] }
0x19e4   : > { %v7657_v21 = vadd.f32 1.0, %v7641_v1  ;;  %v7623_v2 = vsub.f32 0.0, %v7591_v38  ;;  %v7595_v6 = vsub.f32 1.0, %v7579_v13  ;;  %v7578_v30 = vmul.f32 %v11534_v19, %v7498_v45 }
0x19e5   : > { %v7640_v18 = vsel %vm7608_vm8, %v7592_v14, %v7624_v55  ;;  %v7227_v40 = vmul.f32 0.5, %v11913_v11  ;;  %v7670_v47 = vmul.f32 %v7654_v43, %v7222_v35  ;;  %v7226_v63 = vmul.f32 0.5, %v11914_v58 }
0x19e6   : > { %v7673_v7 = vmul.f32 %v7657_v21, %v7225_v42  ;;  %v7639_v48 = vsel %vm7607_vm7, %v7591_v38, %v7623_v2  ;;  %v7627_v39 = vsub.f32 0.0, %v7595_v6  ;;  %v7656_v23 = vadd.f32 1.0, %v7640_v18  ;;  %9203 = vmatpush3.bf16.msra.mxu1 %v11909_v50 }
0x19e7   : > { %v7655_v8 = vadd.f32 1.0, %v7639_v48  ;;  %v7594_v16 = vsub.f32 1.0, %v7578_v30 }
0x19e8   : > { %7819 = vmatprep.mubr.f32.mxu1 %v7673_v7  ;;  %v7643_v51 = vsel %vm7611_vm9, %v7595_v6, %v7627_v39  ;;  %v7672_v60 = vmul.f32 %v7656_v23, %v7224_v5  ;;  %v11919_v39 = vld [vmem:[#allocation29_spill] sm:$0xff] }
0x19e9   : > { %v7626_v46 = vsub.f32 0.0, %v7594_v16  ;;  %v7671_v19 = vmul.f32 %v7655_v8, %v7223_v61  ;;  %v7659_v62 = vadd.f32 1.0, %v7643_v51 }
0x19ea   : > { %7820 = vmatmul.mubr.f32.gmra.mrb[86].mxu1 %v7672_v60 }
0x19eb   : > { %v7642_v20 = vsel %vm7610_vm10, %v7594_v16, %v7626_v46  ;;  %7899 = vmatprep.mubr.f32.mxu1 %v7671_v19  ;;  %v7675_v0 = vmul.f32 %v7659_v62, %v7227_v40 }
0x19ec   : > { %v7658_v34 = vadd.f32 1.0, %v7642_v20 }
0x19ee   : > { %7900 = vmatmul.mubr.f32.vlgmr.msra.gmra.mrb[88].mxu1 %v7670_v47  ;;  %v7674_v44 = vmul.f32 %v7658_v34, %v7226_v63 }
0x19ef   : > { %7904 = vmatprep.mubr.f32.mxu1 %v7675_v0 }
0x19f2   : > { %7905 = vmatmul.mubr.f32.gmra.mrb[90].mxu1 %v7674_v44 }
0x1a9c   : > { %v8468_v41 = vpop.f32.mrb[80].mxu1 }
0x1a9d   : > { %v8469_v12 = vpop.f32.mrb[81].mxu1 }
0x1a9e   : > { %v8470_v56 = vadd.f32 %v8469_v12, %v8468_v41 }
0x1aa0   : > { %v8512_v26 = vpop.f32.mrb[80].mxu0 }
0x1aa1   : > { %v8513_v4 = vpop.f32.mrb[81].mxu0 }
0x1aa2   : > { %v8514_v31 = vadd.f32 %v8513_v4, %v8512_v26 }
0x1aa4   : > { %v7892_v32 = vadd.f32 %v8514_v31, %v8470_v56  ;;  %v8471_v54 = vpop.f32.mrb[82].mxu1 }
0x1aa5   : > { %v8472_v3 = vpop.f32.mrb[83].mxu1 }
0x1aa6   : > { %v7910_v15 = vadd.f32 %v7892_v32, %v11916_v33  ;;  %v8473_v24 = vadd.f32 %v8472_v3, %v8471_v54 }
0x1aa8   : > { %v7921_v57 = vadd.f32 %v8235_v52, %v7910_v15 }
0x1aaa   : > { %7925 = vst [vmem:[%s11674_s11] sm:$0xff] %v7921_v57 }
0x1aab   : > { %v8515_v36 = vpop.f32.mrb[82].mxu0 }
0x1aac   : > { %v8516_v9 = vpop.f32.mrb[83].mxu0 }
0x1aad   : > { %v8517_v14 = vadd.f32 %v8516_v9, %v8515_v36 }
0x1aaf   : > { %v7897_v38 = vadd.f32 %v8517_v14, %v8473_v24 }
0x1ab0   : > { %v8474_v13 = vpop.f32.mrb[84].mxu1 }
0x1ab1   : > { %v7911_v5 = vadd.f32 %v7897_v38, %v11917_v10  ;;  %v8475_v29 = vpop.f32.mrb[85].mxu1 }
0x1ab2   : > { %v8476_v42 = vadd.f32 %v8475_v29, %v8474_v13 }
0x1ab3   : > { %v7922_v28 = vadd.f32 %v8235_v52, %v7911_v5 }
0x1ab5   : > { %7926 = vst [vmem:[%s11674_s11 + $0x8] sm:$0xff] %v7922_v28 }
0x1abd   : > { %v8477_v1 = vpop.f32.mrb[86].mxu1 }
0x1abe   : > { %v8478_v45 = vpop.f32.mrb[87].mxu1 }
0x1abf   : > { %v8479_v21 = vadd.f32 %v8478_v45, %v8477_v1 }
0x1ac1   : > { %v8518_v55 = vpop.f32.mrb[88].mxu1 }
0x1ac2   : > { %v8519_v25 = vpop.f32.mrb[89].mxu1 }
0x1ac3   : > { %v8520_v2 = vadd.f32 %v8519_v25, %v8518_v55 }
0x1ac5   : > { %v7902_v6 = vadd.f32 %v8520_v2, %v8476_v42  ;;  %v8521_v17 = vpop.f32.mrb[90].mxu1 }
0x1ac6   : > { %v8522_v59 = vpop.f32.mrb[91].mxu1 }
0x1ac7   : > { %v7912_v30 = vadd.f32 %v7902_v6, %v11918_v37  ;;  %v8523_v7 = vadd.f32 %v8522_v59, %v8521_v17 }
0x1ac9   : > { %v7923_v18 = vadd.f32 %v8235_v52, %v7912_v30  ;;  %v7907_v48 = vadd.f32 %v8523_v7, %v8479_v21 }
0x1acb   : > { %7927 = vst [vmem:[%s11674_s11 + $0x10] sm:$0xff] %v7923_v18  ;;  %v7913_v53 = vadd.f32 %v7907_v48, %v11919_v39 }
0x1acd   : > { %v7924_v23 = vadd.f32 %v8235_v52, %v7913_v53 }
0x1acf   : > { %7928 = vst [vmem:[%s11674_s11 + $0x18] sm:$0xff] %v7924_v23 }
0x1ad0   : > { %9792 = shalt.err (!%p9789_p3)
}
0x1ad1   : > { %s9793_s8 = scalar_lea.hbm %s11689_s26, 512  ;;  %s9797_s20 = scalar_lea.hbm %s11920_s2, 1024 }
0x1ad2   : > { %p9794_p12 = scmp.ne.s32.totalorder %s11689_s26, %s9793_s8  ;;  %p9798_p0 = scmp.lt.u32.totalorder %s11689_s26, %s11920_s2 }
0x1ad3   : > { %p9799_p6 = scmp.lt.u32.totalorder %s9797_s20, %s9793_s8  ;;  %p9801_p4 = scmp.lt.u32.totalorder %s9793_s8, %s11689_s26 }
0x1ad4   : > { %p9795_p1 = pnand %p9794_p12, %p11921_p10 }
0x1ad5   : > { %p9800_p2 = por %p9799_p6, %p9798_p0 }
0x1ad6   : > { %p9796_p13 = pneg %p9795_p1 }
0x1ad7   : > { %p9802_p5 = por %p9801_p4, %p9800_p2 }
0x1ad9   : > { %p9803_p7 = pnand %p9802_p5, %p9796_p13 }
0x1adb   : > { %9806 = shalt.err (!%p9803_p7)
}
0x1adc   : > { %s9889_s11 = smov 128   ;;  %s9890_s21 = smov 8  }
0x1add   : > { %9232 = dma.vmem_to_hbm [thread:$0]  (%p11921_p10), %s11682_s25, 512, %s11689_s26, %s7930_s14, %s9889_s11, %s9889_s11, %s9890_s21  }
0x1ade PF: > { %s7958_s17 = sand.u32 1, %s9853_s1   ;;  %p11922_p9 = scmp.ne.s32.totalorder %s11829_s19, 0 }
0x1adf   : > { %p11923_p8 = scmp.ge.s32.totalorder %s9865_s24, 2  ;;  %s7959_s16 = scalar_lea.sflag [#allocation5], %s7958_s17 }
0x1ae1   : > { %p9261_p11 = pnand %p11923_p8, %p11922_p9 }
0x1ae3   : > { %9848 = dma.done.wait (!%p9261_p11), %s7959_s16, 512  }
0x1ae4   : > { %9850 = vsyncadd (!%p9261_p11), %s7959_s16, 4294966784  ;;  %s11924_s15 = sld [smem:[#allocation25_spill]]  ;;  %p39_p3 = scmp.ge.s32.totalorder %s10187_s27, 4  }
0x1ae5   : > { %s11925_s1 = smov %s9857_s22  ;;  %s11926_s22 = smov %s9861_s23 }
0x1ae6   : > { %s11928_s24 = smov %s10187_s27  ;;  %41 = sbr.rel (!%p39_p3) target bundleno = 29 (0x1d), region = 182 }
0x1aea   : > { %s11927_s23 = smov %s11924_s15 }
0x1aed   :  { %7964 = vsyncpa [#allocation4], 1 }
0x1aee   :  { %7966 = vsyncpa [#allocation4 + $0x1], 1 }
0x1aef   :  { %7967 = vsyncpa [#allocation7], 1 }
0x1af0   :  { %7969 = vsyncpa [#allocation7 + $0x1], 1 }
0x1af1   :  { %7970 = vsyncpa [#allocation10], 1 }
0x1af2   :  { %7971 = vsyncpa [#allocation13], 1 }
0x1af3   :  { %7972 = vsyncpa [#allocation16], 1 }
0x1af4   :  { %7973 = vsyncpa [#allocation5], 1 }
0x1af5   :  { %7975 = vsyncpa [#allocation5 + $0x1], 1 }

</bundles_post_ra>
